<compile_context>
chip_gen: v5e
topology: v5e:2x2
jax: 0.10.0
libtpu: 0.0.40
codegen_flags: <defaults>
</compile_context>

<pallas_src>
import math

import numpy as np

import jax
import jax.numpy as jnp
from jax.experimental import pallas as pl
from jax.experimental.pallas import tpu as pltpu

_BN_EPS = 1e-5
_SLOT = 128          # lane width of one tap slot / one conv-output column group


# ---------------------------------------------------------------------------
# Parameter construction: PyTorch-like init, BN folding, packing into the
# banded / block-diagonal matrices the kernel consumes.
# ---------------------------------------------------------------------------
def _conv_init(key, k, cin, cout):
    """Conv2d-style init: weight (Cout, Cin, k, k), bias (Cout,)."""
    kw, kb = jax.random.split(key)
    fan_in = cin * k * k
    bound = 1.0 / math.sqrt(fan_in)
    w = jax.random.uniform(kw, (cout, cin, k, k), jnp.float32, -bound, bound)
    b = jax.random.uniform(kb, (cout,), jnp.float32, -bound, bound)
    return w, b


def _fold_bn(w, b):
    """Fold inference-mode BatchNorm2d (default running stats) into the conv."""
    scale = 1.0 / math.sqrt(1.0 + _BN_EPS)
    return w * scale, b * scale


def _band_matrix(w, width):
    """(Cout,Cin,3,3) -> (3*_SLOT, width*Cout) banded matrix (f32).

    Row block [ky*_SLOT, ky*_SLOT + width*Cin) matches tap slot ky of the
    activation buffer (input row r+ky-1); W-direction zero padding is realised
    by clipping the bands; the unused rows of each slot stay zero.
    """
    w = np.asarray(w, np.float32)
    cout, cin = w.shape[0], w.shape[1]
    m = np.zeros((3 * _SLOT, width * cout), np.float32)
    for ky in range(3):
        for wo in range(width):
            for kx in range(3):
                wi = wo + kx - 1
                if 0 <= wi < width:
                    m[ky * _SLOT + wi * cin: ky * _SLOT + (wi + 1) * cin,
                      wo * cout:(wo + 1) * cout] = w[:, :, ky, kx].T
    return m


def _diag_matrix(w, width):
    """1x1 conv weight (Cout, Cin) -> (3*_SLOT, width*Cout); center-tap block-diag."""
    w = np.asarray(w, np.float32)
    cout, cin = w.shape
    m = np.zeros((3 * _SLOT, width * cout), np.float32)
    for wo in range(width):
        m[_SLOT + wo * cin:_SLOT + (wo + 1) * cin,
          wo * cout:(wo + 1) * cout] = w.T
    return m


def _pool_select(width, c):
    """Even|odd W-selection matrices packed side by side -> (_SLOT, _SLOT)."""
    out_w = (width // 2) * c
    p = np.zeros((_SLOT, _SLOT), np.float32)
    eye = np.eye(c, dtype=np.float32)
    for wo in range(width // 2):
        p[(2 * wo) * c:(2 * wo + 1) * c, wo * c:(wo + 1) * c] = eye
        p[(2 * wo + 1) * c:(2 * wo + 2) * c,
          out_w + wo * c:out_w + (wo + 1) * c] = eye
    return p


def build_model(key, conv_arch, cin=3, height=16, width=16, batch=2):
    """Build folded raw params (reference), packed kernel args and static plan."""
    w_cols, b_cols, pools = [], [], []
    raw_stages, stages = [], []
    col_off = 0
    hc, wc, c_in = height, width, cin

    for num_convs, cout in conv_arch:
        assert hc % 2 == 0 and wc % 2 == 0, "spatial dims must stay even"
        assert wc * c_in <= _SLOT and wc * cout <= _SLOT, "lane budget per slot"
        l_in, l_out = wc * c_in, wc * cout
        blocks, raw_blocks = [], []
        for _ in range(num_convs):
            key, k1, k2, k3 = jax.random.split(key, 4)
            w1, b1 = _fold_bn(*_conv_init(k1, 3, c_in, cout))
            w2, b2 = _fold_bn(*_conv_init(k2, 3, cout, cout))
            raw = {"w1": w1, "b1": b1, "w2": w2, "b2": b2, "wd": None, "bd": None}
            down = c_in != cout

            # Layer A: conv1 (+ fused 1x1 downsample in columns 128:256).
            a_cols = 2 * _SLOT if down else _SLOT
            wa = np.zeros((3 * _SLOT, a_cols), np.float32)
            ba = np.zeros((a_cols,), np.float32)
            wa[:, :l_out] = _band_matrix(w1, wc)
            ba[:l_out] = np.tile(np.asarray(b1, np.float32), wc)
            if down:
                wd, bd = _fold_bn(*_conv_init(k3, 1, c_in, cout))
                raw["wd"], raw["bd"] = wd, bd
                wa[:, _SLOT:_SLOT + l_out] = _diag_matrix(wd[:, :, 0, 0], wc)
                ba[_SLOT:_SLOT + l_out] = np.tile(np.asarray(bd, np.float32), wc)
            a_off = col_off
            col_off += a_cols
            w_cols.append(wa)
            b_cols.append(ba)

            # Layer B: conv2.
            wb = np.zeros((3 * _SLOT, _SLOT), np.float32)
            bb = np.zeros((_SLOT,), np.float32)
            wb[:, :l_out] = _band_matrix(w2, wc)
            bb[:l_out] = np.tile(np.asarray(b2, np.float32), wc)
            b_off = col_off
            col_off += _SLOT
            w_cols.append(wb)
            b_cols.append(bb)

            blocks.append({"down": down, "a_off": a_off, "a_cols": a_cols,
                           "b_off": b_off})
            raw_blocks.append(raw)
            c_in = cout

        pools.append(_pool_select(wc, cout))
        stages.append({"H": hc, "W": wc, "l_in": l_in, "l_out": l_out,
                       "out_w": (wc // 2) * cout, "blocks": blocks})
        raw_stages.append(raw_blocks)
        hc //= 2
        wc //= 2

    wpack = jnp.asarray(np.concatenate(w_cols, axis=1), jnp.bfloat16)
    bpack = jnp.asarray(np.concatenate(b_cols)[None, :], jnp.float32)
    ppack = jnp.asarray(np.stack(pools), jnp.bfloat16)
    plan = {"N": batch, "slot": _SLOT, "stages": stages,
            "hf": hc, "wf": wc, "cf": c_in}
    return raw_stages, (wpack, bpack, ppack), plan


# ---------------------------------------------------------------------------
# The fused Pallas kernel
# ---------------------------------------------------------------------------
def _make_kernel(plan):
    n = plan["N"]
    slot = plan["slot"]
    stages = plan["stages"]

    def kernel(x_ref, w_ref, b_ref, p_ref, out_ref, *bufs):
        # One-time zero of the bf16 tap buffers (~36 KiB => a handful of vst's):
        # provides the zero halo rows (3x3 conv padding) and the lane-pad
        # columns of each stage's narrow first layer; every other element is
        # overwritten layer by layer.
        for buf in bufs:
            buf[...] = jnp.zeros(buf.shape, buf.dtype)

        def write_taps(buf, h, l, val):
            """Stage activation (n*h, l) into the tap-concatenated bf16 buffer."""
            v = val.astype(jnp.bfloat16).reshape(n, h, l)
            buf[:, 1:h, 0:l] = v[:, 0:h - 1, :]                   # tap ky=0 (r-1)
            buf[:, :, slot:slot + l] = v                          # tap ky=1 (r)
            buf[:, 0:h - 1, 2 * slot:2 * slot + l] = v[:, 1:h, :]  # tap ky=2 (r+1)

        def conv(buf, h, off, cols):
            """One MXU matmul = full 3x3 conv (+BN) [+ fused 1x1 downsample]."""
            x = buf[...].reshape(n * h, 3 * slot)
            acc = jnp.dot(x, w_ref[:, off:off + cols],
                          preferred_element_type=jnp.float32)
            return acc + b_ref[:, off:off + cols]

        h0, l0 = stages[0]["H"], stages[0]["l_in"]
        cur = x_ref[...].reshape(n * h0, l0)

        for si, st in enumerate(stages):
            h, l_in, l_out = st["H"], st["l_in"], st["l_out"]
            buf = bufs[si]

            for bi, blk in enumerate(st["blocks"]):
                write_taps(buf, h, l_in if bi == 0 else l_out, cur)
                a = conv(buf, h, blk["a_off"], blk["a_cols"])
                h1 = jnp.maximum(a[:, 0:l_out], 0.0)          # conv1+bn1+relu
                identity = a[:, slot:slot + l_out] if blk["down"] else cur
                write_taps(buf, h, l_out, h1)
                o2 = conv(buf, h, blk["b_off"], slot)[:, 0:l_out]  # conv2+bn2
                cur = jnp.maximum(o2 + identity, 0.0)          # residual + relu

            # MaxPool2d(2,2), batched over the whole stage: VPU max over H
            # pairs, then ONE bf16 selection matmul (even|odd selectors packed
            # in the columns) that also compacts the lanes, then the W-pair max.
            hp, out_w = h // 2, st["out_w"]
            c3 = cur.reshape(n * hp, 2, l_out)
            hmax = jnp.maximum(c3[:, 0, :], c3[:, 1, :]).astype(jnp.bfloat16)
            psel = p_ref[si][0:l_out, 0:2 * out_w]
            sel = jnp.dot(hmax, psel, preferred_element_type=jnp.float32)
            cur = jnp.maximum(sel[:, 0:out_w], sel[:, out_w:2 * out_w])

        # Single store of the final (N, Hf, Wf*Cf) slab.
        hf, out_w = stages[-1]["H"] // 2, stages[-1]["out_w"]
        out_ref[...] = cur.reshape(n, hf, out_w)

    return kernel


# ---------------------------------------------------------------------------
# Wrapper: one fused pallas_call for the whole ConvLayers forward
# ---------------------------------------------------------------------------
def conv_layers_forward(x_nchw, packed, plan):
    wpack, bpack, ppack = packed
    batch, cin, height, width = x_nchw.shape
    # NCHW -> lane-dense slab (N, H, W*C)   (NHWC with W and C merged in lanes)
    x_l = jnp.transpose(x_nchw, (0, 2, 3, 1)).reshape(batch, height, width * cin)

    args = (x_l, wpack, bpack, ppack)
    in_specs = [pl.BlockSpec(a.shape, lambda i, nd=a.ndim: (0,) * nd)
                for a in args]

    scratch = [pltpu.VMEM((batch, st["H"], 3 * plan["slot"]), jnp.bfloat16)
               for st in plan["stages"]]

    hf, wf, cf = plan["hf"], plan["wf"], plan["cf"]
    out_shape_l = (batch, hf, wf * cf)

    out_l = pl.pallas_call(
        _make_kernel(plan),
        out_shape=jax.ShapeDtypeStruct(out_shape_l, jnp.float32),
        grid=(1,),
        in_specs=in_specs,
        out_specs=pl.BlockSpec(out_shape_l, lambda i: (0, 0, 0)),
        scratch_shapes=scratch,
        compiler_params=pltpu.CompilerParams(
            dimension_semantics=("arbitrary",)),
    )(*args)

    # slab layout -> NCHW (PyTorch convention)
    return jnp.transpose(out_l.reshape(batch, hf, wf, cf), (0, 3, 1, 2))


# ---------------------------------------------------------------------------
# Pure-JAX reference of the same forward pass (for self-validation)
# ---------------------------------------------------------------------------
def reference_forward(x_nchw, raw_stages):
    def convbn(x, w, b, pad):
        y = jax.lax.conv_general_dilated(
            x, w, window_strides=(1, 1), padding=[(pad, pad), (pad, pad)],
            dimension_numbers=("NCHW", "OIHW", "NCHW"),
            precision=jax.lax.Precision.HIGHEST)
        return y + b[None, :, None, None]

    def res_block(x, p):
        identity = x if p["wd"] is None else convbn(x, p["wd"], p["bd"], 0)
        out = jax.nn.relu(convbn(x, p["w1"], p["b1"], 1))
        out = convbn(out, p["w2"], p["b2"], 1)
        return jax.nn.relu(out + identity)

    def maxpool(x):
        return jax.lax.reduce_window(
            x, -jnp.inf, jax.lax.max,
            window_dimensions=(1, 1, 2, 2), window_strides=(1, 1, 2, 2),
            padding="VALID")

    h = x_nchw
    for blocks in raw_stages:
        for p in blocks:
            h = res_block(h, p)
        h = maxpool(h)
    return h


# ---------------------------------------------------------------------------
if __name__ == "__main__":
    key = jax.random.PRNGKey(0)
    kx, kp = jax.random.split(key)

    conv_arch = [(2, 8), (1, 16)]                 # (num_convs, channels_out)
    batch, cin, height, width = 2, 3, 16, 16
    x = jax.random.normal(kx, (batch, cin, height, width), jnp.float32)  # NCHW

    raw_params, packed_params, plan = build_model(
        kp, conv_arch, cin=cin, height=height, width=width, batch=batch)

    out = conv_layers_forward(x, packed_params, plan)
    out = jax.block_until_ready(out)

    assert out.shape == (batch, conv_arch[-1][1], height // 4, width // 4), out.shape
    assert bool(jnp.all(jnp.isfinite(out)))

    # Self-check against a pure-JAX f32 reference of the same (inference-mode
    # BN) forward; tolerance sized for bf16 matmul inputs / bf16 staging.
    ref = reference_forward(x, raw_params)
    err = float(jnp.max(jnp.abs(out - ref)))
    assert bool(jnp.allclose(out, ref, rtol=3e-2, atol=3e-2)), (
        "max abs err %.4f" % err)

    print("KERNEL_OK")
</pallas_src>

<mosaic_0001>
module attributes {stable_mosaic.version = 11 : i64} {
  func.func @kernel(%arg0: i32, %arg1: memref<2x16x48xf32, #tpu.memory_space<vmem>>, %arg2: memref<384x1024xbf16, #tpu.memory_space<vmem>>, %arg3: memref<1x1024xf32, #tpu.memory_space<vmem>>, %arg4: memref<2x128x128xbf16, #tpu.memory_space<vmem>>, %arg5: memref<2x4x64xf32, #tpu.memory_space<vmem>>, %arg6: memref<2x16x384xbf16, #tpu.memory_space<vmem>>, %arg7: memref<2x8x384xbf16, #tpu.memory_space<vmem>>) attributes {dimension_semantics = [#tpu.dimension_semantics<arbitrary>], iteration_bounds = array<i64: 1>, scalar_prefetch = 0 : i64, scratch_operands = 2 : i64, tpu.core_type = #tpu.core_type<tc>, window_params = [{pipeline_mode = #tpu.pipeline_mode<synchronous>, transform_indices = @transform_0, window_bounds = array<i64: 2, 16, 48>}, {pipeline_mode = #tpu.pipeline_mode<synchronous>, transform_indices = @transform_1, window_bounds = array<i64: 384, 1024>}, {pipeline_mode = #tpu.pipeline_mode<synchronous>, transform_indices = @transform_2, window_bounds = array<i64: 1, 1024>}, {pipeline_mode = #tpu.pipeline_mode<synchronous>, transform_indices = @transform_3, window_bounds = array<i64: 2, 128, 128>}, {pipeline_mode = #tpu.pipeline_mode<synchronous>, transform_indices = @transform_4, window_bounds = array<i64: 2, 4, 64>}]} {
    %cst = arith.constant 0.000000e+00 : bf16
    %0 = vector.broadcast %cst : bf16 to vector<2x16x384xbf16>
    %c0 = arith.constant 0 : index
    %c0_0 = arith.constant 0 : index
    %c0_1 = arith.constant 0 : index
    %1 = vector.load %arg6[%c0, %c0_0, %c0_1] : memref<2x16x384xbf16, #tpu.memory_space<vmem>>, vector<2x16x384xbf16>
    tpu.vector_store %arg6[%c0, %c0_0, %c0_1], %0 {strides = array<i32>} : memref<2x16x384xbf16, #tpu.memory_space<vmem>>, vector<2x16x384xbf16>,
    %cst_2 = arith.constant 0.000000e+00 : bf16
    %2 = vector.broadcast %cst_2 : bf16 to vector<2x8x384xbf16>
    %c0_3 = arith.constant 0 : index
    %c0_4 = arith.constant 0 : index
    %c0_5 = arith.constant 0 : index
    %3 = vector.load %arg7[%c0_3, %c0_4, %c0_5] : memref<2x8x384xbf16, #tpu.memory_space<vmem>>, vector<2x8x384xbf16>
    tpu.vector_store %arg7[%c0_3, %c0_4, %c0_5], %2 {strides = array<i32>} : memref<2x8x384xbf16, #tpu.memory_space<vmem>>, vector<2x8x384xbf16>,
    %c0_6 = arith.constant 0 : index
    %c0_7 = arith.constant 0 : index
    %c0_8 = arith.constant 0 : index
    %4 = vector.load %arg1[%c0_6, %c0_7, %c0_8] : memref<2x16x48xf32, #tpu.memory_space<vmem>>, vector<2x16x48xf32>
    %5 = vector.shape_cast %4 : vector<2x16x48xf32> to vector<32x48xf32>
    %6 = arith.truncf %5 : vector<32x48xf32> to vector<32x48xbf16>
    %7 = vector.shape_cast %6 : vector<32x48xbf16> to vector<2x16x48xbf16>
    %8 = vector.extract_strided_slice %7 {offsets = [0, 0, 0], sizes = [2, 15, 48], strides = [1, 1, 1]} : vector<2x16x48xbf16> to vector<2x15x48xbf16>
    %c0_9 = arith.constant 0 : index
    %c1 = arith.constant 1 : index
    %c0_10 = arith.constant 0 : index
    %9 = vector.load %arg6[%c0_9, %c1, %c0_10] : memref<2x16x384xbf16, #tpu.memory_space<vmem>>, vector<2x15x48xbf16>
    tpu.vector_store %arg6[%c0_9, %c1, %c0_10], %8 {strides = array<i32>} : memref<2x16x384xbf16, #tpu.memory_space<vmem>>, vector<2x15x48xbf16>,
    %c0_11 = arith.constant 0 : index
    %c0_12 = arith.constant 0 : index
    %c128 = arith.constant 128 : index
    %10 = vector.load %arg6[%c0_11, %c0_12, %c128] : memref<2x16x384xbf16, #tpu.memory_space<vmem>>, vector<2x16x48xbf16>
    tpu.vector_store %arg6[%c0_11, %c0_12, %c128], %7 {strides = array<i32>} : memref<2x16x384xbf16, #tpu.memory_space<vmem>>, vector<2x16x48xbf16>,
    %11 = vector.extract_strided_slice %7 {offsets = [0, 1, 0], sizes = [2, 15, 48], strides = [1, 1, 1]} : vector<2x16x48xbf16> to vector<2x15x48xbf16>
    %c0_13 = arith.constant 0 : index
    %c0_14 = arith.constant 0 : index
    %c256 = arith.constant 256 : index
    %12 = vector.load %arg6[%c0_13, %c0_14, %c256] : memref<2x16x384xbf16, #tpu.memory_space<vmem>>, vector<2x15x48xbf16>
    tpu.vector_store %arg6[%c0_13, %c0_14, %c256], %11 {strides = array<i32>} : memref<2x16x384xbf16, #tpu.memory_space<vmem>>, vector<2x15x48xbf16>,
    %c0_15 = arith.constant 0 : index
    %c0_16 = arith.constant 0 : index
    %c0_17 = arith.constant 0 : index
    %13 = vector.load %arg6[%c0_15, %c0_16, %c0_17] : memref<2x16x384xbf16, #tpu.memory_space<vmem>>, vector<2x16x384xbf16>
    %14 = vector.shape_cast %13 : vector<2x16x384xbf16> to vector<32x384xbf16>
    %c0_18 = arith.constant 0 : index
    %c0_19 = arith.constant 0 : index
    %15 = vector.load %arg2[%c0_18, %c0_19] : memref<384x1024xbf16, #tpu.memory_space<vmem>>, vector<384x256xbf16>
    %cst_20 = arith.constant dense<0.000000e+00> : vector<32x256xf32>
    %16 = tpu.matmul %14, %15, %cst_20 {dimension_numbers = #tpu.dot_dimension_numbers<[1], [0], [0], [1], [0, 0, 1, 1], [], []>} : vector<32x384xbf16>, vector<384x256xbf16>, vector<32x256xf32> -> vector<32x256xf32>
    %c0_21 = arith.constant 0 : index
    %c0_22 = arith.constant 0 : index
    %17 = vector.load %arg3[%c0_21, %c0_22] : memref<1x1024xf32, #tpu.memory_space<vmem>>, vector<1x256xf32>
    %18 = vector.broadcast %17 : vector<1x256xf32> to vector<32x256xf32>
    %19 = arith.addf %16, %18 : vector<32x256xf32>
    %20 = vector.extract_strided_slice %19 {offsets = [0, 0], sizes = [32, 128], strides = [1, 1]} : vector<32x256xf32> to vector<32x128xf32>
    %cst_23 = arith.constant 0.000000e+00 : f32
    %21 = vector.broadcast %cst_23 : f32 to vector<32x128xf32>
    %22 = arith.maximumf %20, %21 : vector<32x128xf32>
    %23 = vector.extract_strided_slice %19 {offsets = [0, 128], sizes = [32, 128], strides = [1, 1]} : vector<32x256xf32> to vector<32x128xf32>
    %24 = arith.truncf %22 : vector<32x128xf32> to vector<32x128xbf16>
    %25 = vector.shape_cast %24 : vector<32x128xbf16> to vector<2x16x128xbf16>
    %26 = vector.extract_strided_slice %25 {offsets = [0, 0, 0], sizes = [2, 15, 128], strides = [1, 1, 1]} : vector<2x16x128xbf16> to vector<2x15x128xbf16>
    %c0_24 = arith.constant 0 : index
    %c1_25 = arith.constant 1 : index
    %c0_26 = arith.constant 0 : index
    %27 = vector.load %arg6[%c0_24, %c1_25, %c0_26] : memref<2x16x384xbf16, #tpu.memory_space<vmem>>, vector<2x15x128xbf16>
    tpu.vector_store %arg6[%c0_24, %c1_25, %c0_26], %26 {strides = array<i32>} : memref<2x16x384xbf16, #tpu.memory_space<vmem>>, vector<2x15x128xbf16>,
    %c0_27 = arith.constant 0 : index
    %c0_28 = arith.constant 0 : index
    %c128_29 = arith.constant 128 : index
    %28 = vector.load %arg6[%c0_27, %c0_28, %c128_29] : memref<2x16x384xbf16, #tpu.memory_space<vmem>>, vector<2x16x128xbf16>
    tpu.vector_store %arg6[%c0_27, %c0_28, %c128_29], %25 {strides = array<i32>} : memref<2x16x384xbf16, #tpu.memory_space<vmem>>, vector<2x16x128xbf16>,
    %29 = vector.extract_strided_slice %25 {offsets = [0, 1, 0], sizes = [2, 15, 128], strides = [1, 1, 1]} : vector<2x16x128xbf16> to vector<2x15x128xbf16>
    %c0_30 = arith.constant 0 : index
    %c0_31 = arith.constant 0 : index
    %c256_32 = arith.constant 256 : index
    %30 = vector.load %arg6[%c0_30, %c0_31, %c256_32] : memref<2x16x384xbf16, #tpu.memory_space<vmem>>, vector<2x15x128xbf16>
    tpu.vector_store %arg6[%c0_30, %c0_31, %c256_32], %29 {strides = array<i32>} : memref<2x16x384xbf16, #tpu.memory_space<vmem>>, vector<2x15x128xbf16>,
    %c0_33 = arith.constant 0 : index
    %c0_34 = arith.constant 0 : index
    %c0_35 = arith.constant 0 : index
    %31 = vector.load %arg6[%c0_33, %c0_34, %c0_35] : memref<2x16x384xbf16, #tpu.memory_space<vmem>>, vector<2x16x384xbf16>
    %32 = vector.shape_cast %31 : vector<2x16x384xbf16> to vector<32x384xbf16>
    %c0_36 = arith.constant 0 : index
    %c256_37 = arith.constant 256 : index
    %33 = vector.load %arg2[%c0_36, %c256_37] : memref<384x1024xbf16, #tpu.memory_space<vmem>>, vector<384x128xbf16>
    %cst_38 = arith.constant dense<0.000000e+00> : vector<32x128xf32>
    %34 = tpu.matmul %32, %33, %cst_38 {dimension_numbers = #tpu.dot_dimension_numbers<[1], [0], [0], [1], [0, 0, 1, 1], [], []>} : vector<32x384xbf16>, vector<384x128xbf16>, vector<32x128xf32> -> vector<32x128xf32>
    %c0_39 = arith.constant 0 : index
    %c256_40 = arith.constant 256 : index
    %35 = vector.load %arg3[%c0_39, %c256_40] : memref<1x1024xf32, #tpu.memory_space<vmem>>, vector<1x128xf32>
    %36 = vector.broadcast %35 : vector<1x128xf32> to vector<32x128xf32>
    %37 = arith.addf %34, %36 : vector<32x128xf32>
    %38 = arith.addf %37, %23 : vector<32x128xf32>
    %cst_41 = arith.constant 0.000000e+00 : f32
    %39 = vector.broadcast %cst_41 : f32 to vector<32x128xf32>
    %40 = arith.maximumf %38, %39 : vector<32x128xf32>
    %41 = arith.truncf %40 : vector<32x128xf32> to vector<32x128xbf16>
    %42 = vector.shape_cast %41 : vector<32x128xbf16> to vector<2x16x128xbf16>
    %43 = vector.extract_strided_slice %42 {offsets = [0, 0, 0], sizes = [2, 15, 128], strides = [1, 1, 1]} : vector<2x16x128xbf16> to vector<2x15x128xbf16>
    %c0_42 = arith.constant 0 : index
    %c1_43 = arith.constant 1 : index
    %c0_44 = arith.constant 0 : index
    %44 = vector.load %arg6[%c0_42, %c1_43, %c0_44] : memref<2x16x384xbf16, #tpu.memory_space<vmem>>, vector<2x15x128xbf16>
    tpu.vector_store %arg6[%c0_42, %c1_43, %c0_44], %43 {strides = array<i32>} : memref<2x16x384xbf16, #tpu.memory_space<vmem>>, vector<2x15x128xbf16>,
    %c0_45 = arith.constant 0 : index
    %c0_46 = arith.constant 0 : index
    %c128_47 = arith.constant 128 : index
    %45 = vector.load %arg6[%c0_45, %c0_46, %c128_47] : memref<2x16x384xbf16, #tpu.memory_space<vmem>>, vector<2x16x128xbf16>
    tpu.vector_store %arg6[%c0_45, %c0_46, %c128_47], %42 {strides = array<i32>} : memref<2x16x384xbf16, #tpu.memory_space<vmem>>, vector<2x16x128xbf16>,
    %46 = vector.extract_strided_slice %42 {offsets = [0, 1, 0], sizes = [2, 15, 128], strides = [1, 1, 1]} : vector<2x16x128xbf16> to vector<2x15x128xbf16>
    %c0_48 = arith.constant 0 : index
    %c0_49 = arith.constant 0 : index
    %c256_50 = arith.constant 256 : index
    %47 = vector.load %arg6[%c0_48, %c0_49, %c256_50] : memref<2x16x384xbf16, #tpu.memory_space<vmem>>, vector<2x15x128xbf16>
    tpu.vector_store %arg6[%c0_48, %c0_49, %c256_50], %46 {strides = array<i32>} : memref<2x16x384xbf16, #tpu.memory_space<vmem>>, vector<2x15x128xbf16>,
    %c0_51 = arith.constant 0 : index
    %c0_52 = arith.constant 0 : index
    %c0_53 = arith.constant 0 : index
    %48 = vector.load %arg6[%c0_51, %c0_52, %c0_53] : memref<2x16x384xbf16, #tpu.memory_space<vmem>>, vector<2x16x384xbf16>
    %49 = vector.shape_cast %48 : vector<2x16x384xbf16> to vector<32x384xbf16>
    %c0_54 = arith.constant 0 : index
    %c384 = arith.constant 384 : index
    %50 = vector.load %arg2[%c0_54, %c384] : memref<384x1024xbf16, #tpu.memory_space<vmem>>, vector<384x128xbf16>
    %cst_55 = arith.constant dense<0.000000e+00> : vector<32x128xf32>
    %51 = tpu.matmul %49, %50, %cst_55 {dimension_numbers = #tpu.dot_dimension_numbers<[1], [0], [0], [1], [0, 0, 1, 1], [], []>} : vector<32x384xbf16>, vector<384x128xbf16>, vector<32x128xf32> -> vector<32x128xf32>
    %c0_56 = arith.constant 0 : index
    %c384_57 = arith.constant 384 : index
    %52 = vector.load %arg3[%c0_56, %c384_57] : memref<1x1024xf32, #tpu.memory_space<vmem>>, vector<1x128xf32>
    %53 = vector.broadcast %52 : vector<1x128xf32> to vector<32x128xf32>
    %54 = arith.addf %51, %53 : vector<32x128xf32>
    %cst_58 = arith.constant 0.000000e+00 : f32
    %55 = vector.broadcast %cst_58 : f32 to vector<32x128xf32>
    %56 = arith.maximumf %54, %55 : vector<32x128xf32>
    %57 = arith.truncf %56 : vector<32x128xf32> to vector<32x128xbf16>
    %58 = vector.shape_cast %57 : vector<32x128xbf16> to vector<2x16x128xbf16>
    %59 = vector.extract_strided_slice %58 {offsets = [0, 0, 0], sizes = [2, 15, 128], strides = [1, 1, 1]} : vector<2x16x128xbf16> to vector<2x15x128xbf16>
    %c0_59 = arith.constant 0 : index
    %c1_60 = arith.constant 1 : index
    %c0_61 = arith.constant 0 : index
    %60 = vector.load %arg6[%c0_59, %c1_60, %c0_61] : memref<2x16x384xbf16, #tpu.memory_space<vmem>>, vector<2x15x128xbf16>
    tpu.vector_store %arg6[%c0_59, %c1_60, %c0_61], %59 {strides = array<i32>} : memref<2x16x384xbf16, #tpu.memory_space<vmem>>, vector<2x15x128xbf16>,
    %c0_62 = arith.constant 0 : index
    %c0_63 = arith.constant 0 : index
    %c128_64 = arith.constant 128 : index
    %61 = vector.load %arg6[%c0_62, %c0_63, %c128_64] : memref<2x16x384xbf16, #tpu.memory_space<vmem>>, vector<2x16x128xbf16>
    tpu.vector_store %arg6[%c0_62, %c0_63, %c128_64], %58 {strides = array<i32>} : memref<2x16x384xbf16, #tpu.memory_space<vmem>>, vector<2x16x128xbf16>,
    %62 = vector.extract_strided_slice %58 {offsets = [0, 1, 0], sizes = [2, 15, 128], strides = [1, 1, 1]} : vector<2x16x128xbf16> to vector<2x15x128xbf16>
    %c0_65 = arith.constant 0 : index
    %c0_66 = arith.constant 0 : index
    %c256_67 = arith.constant 256 : index
    %63 = vector.load %arg6[%c0_65, %c0_66, %c256_67] : memref<2x16x384xbf16, #tpu.memory_space<vmem>>, vector<2x15x128xbf16>
    tpu.vector_store %arg6[%c0_65, %c0_66, %c256_67], %62 {strides = array<i32>} : memref<2x16x384xbf16, #tpu.memory_space<vmem>>, vector<2x15x128xbf16>,
    %c0_68 = arith.constant 0 : index
    %c0_69 = arith.constant 0 : index
    %c0_70 = arith.constant 0 : index
    %64 = vector.load %arg6[%c0_68, %c0_69, %c0_70] : memref<2x16x384xbf16, #tpu.memory_space<vmem>>, vector<2x16x384xbf16>
    %65 = vector.shape_cast %64 : vector<2x16x384xbf16> to vector<32x384xbf16>
    %c0_71 = arith.constant 0 : index
    %c512 = arith.constant 512 : index
    %66 = vector.load %arg2[%c0_71, %c512] : memref<384x1024xbf16, #tpu.memory_space<vmem>>, vector<384x128xbf16>
    %cst_72 = arith.constant dense<0.000000e+00> : vector<32x128xf32>
    %67 = tpu.matmul %65, %66, %cst_72 {dimension_numbers = #tpu.dot_dimension_numbers<[1], [0], [0], [1], [0, 0, 1, 1], [], []>} : vector<32x384xbf16>, vector<384x128xbf16>, vector<32x128xf32> -> vector<32x128xf32>
    %c0_73 = arith.constant 0 : index
    %c512_74 = arith.constant 512 : index
    %68 = vector.load %arg3[%c0_73, %c512_74] : memref<1x1024xf32, #tpu.memory_space<vmem>>, vector<1x128xf32>
    %69 = vector.broadcast %68 : vector<1x128xf32> to vector<32x128xf32>
    %70 = arith.addf %67, %69 : vector<32x128xf32>
    %71 = arith.addf %70, %40 : vector<32x128xf32>
    %cst_75 = arith.constant 0.000000e+00 : f32
    %72 = vector.broadcast %cst_75 : f32 to vector<32x128xf32>
    %73 = arith.maximumf %71, %72 : vector<32x128xf32>
    %74 = vector.shape_cast %73 : vector<32x128xf32> to vector<16x2x128xf32>
    %75 = vector.extract_strided_slice %74 {offsets = [0, 0, 0], sizes = [16, 1, 128], strides = [1, 1, 1]} : vector<16x2x128xf32> to vector<16x1x128xf32>
    %76 = vector.shape_cast %75 : vector<16x1x128xf32> to vector<16x128xf32>
    %77 = vector.extract_strided_slice %74 {offsets = [0, 1, 0], sizes = [16, 1, 128], strides = [1, 1, 1]} : vector<16x2x128xf32> to vector<16x1x128xf32>
    %78 = vector.shape_cast %77 : vector<16x1x128xf32> to vector<16x128xf32>
    %79 = arith.maximumf %76, %78 : vector<16x128xf32>
    %80 = arith.truncf %79 : vector<16x128xf32> to vector<16x128xbf16>
    %c0_76 = arith.constant 0 : index
    %c0_77 = arith.constant 0 : index
    %c0_78 = arith.constant 0 : index
    %81 = vector.load %arg4[%c0_76, %c0_77, %c0_78] : memref<2x128x128xbf16, #tpu.memory_space<vmem>>, vector<1x128x128xbf16>
    %82 = vector.shape_cast %81 : vector<1x128x128xbf16> to vector<128x128xbf16>
    %cst_79 = arith.constant dense<0.000000e+00> : vector<16x128xf32>
    %83 = tpu.matmul %80, %82, %cst_79 {dimension_numbers = #tpu.dot_dimension_numbers<[1], [0], [0], [1], [0, 0, 1, 1], [], []>} : vector<16x128xbf16>, vector<128x128xbf16>, vector<16x128xf32> -> vector<16x128xf32>
    %84 = vector.extract_strided_slice %83 {offsets = [0, 0], sizes = [16, 64], strides = [1, 1]} : vector<16x128xf32> to vector<16x64xf32>
    %85 = vector.extract_strided_slice %83 {offsets = [0, 64], sizes = [16, 64], strides = [1, 1]} : vector<16x128xf32> to vector<16x64xf32>
    %86 = arith.maximumf %84, %85 : vector<16x64xf32>
    %87 = arith.truncf %86 : vector<16x64xf32> to vector<16x64xbf16>
    %88 = vector.shape_cast %87 : vector<16x64xbf16> to vector<2x8x64xbf16>
    %89 = vector.extract_strided_slice %88 {offsets = [0, 0, 0], sizes = [2, 7, 64], strides = [1, 1, 1]} : vector<2x8x64xbf16> to vector<2x7x64xbf16>
    %c0_80 = arith.constant 0 : index
    %c1_81 = arith.constant 1 : index
    %c0_82 = arith.constant 0 : index
    %90 = vector.load %arg7[%c0_80, %c1_81, %c0_82] : memref<2x8x384xbf16, #tpu.memory_space<vmem>>, vector<2x7x64xbf16>
    tpu.vector_store %arg7[%c0_80, %c1_81, %c0_82], %89 {strides = array<i32>} : memref<2x8x384xbf16, #tpu.memory_space<vmem>>, vector<2x7x64xbf16>,
    %c0_83 = arith.constant 0 : index
    %c0_84 = arith.constant 0 : index
    %c128_85 = arith.constant 128 : index
    %91 = vector.load %arg7[%c0_83, %c0_84, %c128_85] : memref<2x8x384xbf16, #tpu.memory_space<vmem>>, vector<2x8x64xbf16>
    tpu.vector_store %arg7[%c0_83, %c0_84, %c128_85], %88 {strides = array<i32>} : memref<2x8x384xbf16, #tpu.memory_space<vmem>>, vector<2x8x64xbf16>,
    %92 = vector.extract_strided_slice %88 {offsets = [0, 1, 0], sizes = [2, 7, 64], strides = [1, 1, 1]} : vector<2x8x64xbf16> to vector<2x7x64xbf16>
    %c0_86 = arith.constant 0 : index
    %c0_87 = arith.constant 0 : index
    %c256_88 = arith.constant 256 : index
    %93 = vector.load %arg7[%c0_86, %c0_87, %c256_88] : memref<2x8x384xbf16, #tpu.memory_space<vmem>>, vector<2x7x64xbf16>
    tpu.vector_store %arg7[%c0_86, %c0_87, %c256_88], %92 {strides = array<i32>} : memref<2x8x384xbf16, #tpu.memory_space<vmem>>, vector<2x7x64xbf16>,
    %c0_89 = arith.constant 0 : index
    %c0_90 = arith.constant 0 : index
    %c0_91 = arith.constant 0 : index
    %94 = vector.load %arg7[%c0_89, %c0_90, %c0_91] : memref<2x8x384xbf16, #tpu.memory_space<vmem>>, vector<2x8x384xbf16>
    %95 = vector.shape_cast %94 : vector<2x8x384xbf16> to vector<16x384xbf16>
    %c0_92 = arith.constant 0 : index
    %c640 = arith.constant 640 : index
    %96 = vector.load %arg2[%c0_92, %c640] : memref<384x1024xbf16, #tpu.memory_space<vmem>>, vector<384x256xbf16>
    %cst_93 = arith.constant dense<0.000000e+00> : vector<16x256xf32>
    %97 = tpu.matmul %95, %96, %cst_93 {dimension_numbers = #tpu.dot_dimension_numbers<[1], [0], [0], [1], [0, 0, 1, 1], [], []>} : vector<16x384xbf16>, vector<384x256xbf16>, vector<16x256xf32> -> vector<16x256xf32>
    %c0_94 = arith.constant 0 : index
    %c640_95 = arith.constant 640 : index
    %98 = vector.load %arg3[%c0_94, %c640_95] : memref<1x1024xf32, #tpu.memory_space<vmem>>, vector<1x256xf32>
    %99 = vector.broadcast %98 : vector<1x256xf32> to vector<16x256xf32>
    %100 = arith.addf %97, %99 : vector<16x256xf32>
    %101 = vector.extract_strided_slice %100 {offsets = [0, 0], sizes = [16, 128], strides = [1, 1]} : vector<16x256xf32> to vector<16x128xf32>
    %cst_96 = arith.constant 0.000000e+00 : f32
    %102 = vector.broadcast %cst_96 : f32 to vector<16x128xf32>
    %103 = arith.maximumf %101, %102 : vector<16x128xf32>
    %104 = vector.extract_strided_slice %100 {offsets = [0, 128], sizes = [16, 128], strides = [1, 1]} : vector<16x256xf32> to vector<16x128xf32>
    %105 = arith.truncf %103 : vector<16x128xf32> to vector<16x128xbf16>
    %106 = vector.shape_cast %105 : vector<16x128xbf16> to vector<2x8x128xbf16>
    %107 = vector.extract_strided_slice %106 {offsets = [0, 0, 0], sizes = [2, 7, 128], strides = [1, 1, 1]} : vector<2x8x128xbf16> to vector<2x7x128xbf16>
    %c0_97 = arith.constant 0 : index
    %c1_98 = arith.constant 1 : index
    %c0_99 = arith.constant 0 : index
    %108 = vector.load %arg7[%c0_97, %c1_98, %c0_99] : memref<2x8x384xbf16, #tpu.memory_space<vmem>>, vector<2x7x128xbf16>
    tpu.vector_store %arg7[%c0_97, %c1_98, %c0_99], %107 {strides = array<i32>} : memref<2x8x384xbf16, #tpu.memory_space<vmem>>, vector<2x7x128xbf16>,
    %c0_100 = arith.constant 0 : index
    %c0_101 = arith.constant 0 : index
    %c128_102 = arith.constant 128 : index
    %109 = vector.load %arg7[%c0_100, %c0_101, %c128_102] : memref<2x8x384xbf16, #tpu.memory_space<vmem>>, vector<2x8x128xbf16>
    tpu.vector_store %arg7[%c0_100, %c0_101, %c128_102], %106 {strides = array<i32>} : memref<2x8x384xbf16, #tpu.memory_space<vmem>>, vector<2x8x128xbf16>,
    %110 = vector.extract_strided_slice %106 {offsets = [0, 1, 0], sizes = [2, 7, 128], strides = [1, 1, 1]} : vector<2x8x128xbf16> to vector<2x7x128xbf16>
    %c0_103 = arith.constant 0 : index
    %c0_104 = arith.constant 0 : index
    %c256_105 = arith.constant 256 : index
    %111 = vector.load %arg7[%c0_103, %c0_104, %c256_105] : memref<2x8x384xbf16, #tpu.memory_space<vmem>>, vector<2x7x128xbf16>
    tpu.vector_store %arg7[%c0_103, %c0_104, %c256_105], %110 {strides = array<i32>} : memref<2x8x384xbf16, #tpu.memory_space<vmem>>, vector<2x7x128xbf16>,
    %c0_106 = arith.constant 0 : index
    %c0_107 = arith.constant 0 : index
    %c0_108 = arith.constant 0 : index
    %112 = vector.load %arg7[%c0_106, %c0_107, %c0_108] : memref<2x8x384xbf16, #tpu.memory_space<vmem>>, vector<2x8x384xbf16>
    %113 = vector.shape_cast %112 : vector<2x8x384xbf16> to vector<16x384xbf16>
    %c0_109 = arith.constant 0 : index
    %c896 = arith.constant 896 : index
    %114 = vector.load %arg2[%c0_109, %c896] : memref<384x1024xbf16, #tpu.memory_space<vmem>>, vector<384x128xbf16>
    %cst_110 = arith.constant dense<0.000000e+00> : vector<16x128xf32>
    %115 = tpu.matmul %113, %114, %cst_110 {dimension_numbers = #tpu.dot_dimension_numbers<[1], [0], [0], [1], [0, 0, 1, 1], [], []>} : vector<16x384xbf16>, vector<384x128xbf16>, vector<16x128xf32> -> vector<16x128xf32>
    %c0_111 = arith.constant 0 : index
    %c896_112 = arith.constant 896 : index
    %116 = vector.load %arg3[%c0_111, %c896_112] : memref<1x1024xf32, #tpu.memory_space<vmem>>, vector<1x128xf32>
    %117 = vector.broadcast %116 : vector<1x128xf32> to vector<16x128xf32>
    %118 = arith.addf %115, %117 : vector<16x128xf32>
    %119 = arith.addf %118, %104 : vector<16x128xf32>
    %cst_113 = arith.constant 0.000000e+00 : f32
    %120 = vector.broadcast %cst_113 : f32 to vector<16x128xf32>
    %121 = arith.maximumf %119, %120 : vector<16x128xf32>
    %122 = vector.shape_cast %121 : vector<16x128xf32> to vector<8x2x128xf32>
    %123 = vector.extract_strided_slice %122 {offsets = [0, 0, 0], sizes = [8, 1, 128], strides = [1, 1, 1]} : vector<8x2x128xf32> to vector<8x1x128xf32>
    %124 = vector.shape_cast %123 : vector<8x1x128xf32> to vector<8x128xf32>
    %125 = vector.extract_strided_slice %122 {offsets = [0, 1, 0], sizes = [8, 1, 128], strides = [1, 1, 1]} : vector<8x2x128xf32> to vector<8x1x128xf32>
    %126 = vector.shape_cast %125 : vector<8x1x128xf32> to vector<8x128xf32>
    %127 = arith.maximumf %124, %126 : vector<8x128xf32>
    %128 = arith.truncf %127 : vector<8x128xf32> to vector<8x128xbf16>
    %c1_114 = arith.constant 1 : index
    %c0_115 = arith.constant 0 : index
    %c0_116 = arith.constant 0 : index
    %129 = vector.load %arg4[%c1_114, %c0_115, %c0_116] : memref<2x128x128xbf16, #tpu.memory_space<vmem>>, vector<1x128x128xbf16>
    %130 = vector.shape_cast %129 : vector<1x128x128xbf16> to vector<128x128xbf16>
    %cst_117 = arith.constant dense<0.000000e+00> : vector<8x128xf32>
    %131 = tpu.matmul %128, %130, %cst_117 {dimension_numbers = #tpu.dot_dimension_numbers<[1], [0], [0], [1], [0, 0, 1, 1], [], []>} : vector<8x128xbf16>, vector<128x128xbf16>, vector<8x128xf32> -> vector<8x128xf32>
    %132 = vector.extract_strided_slice %131 {offsets = [0, 0], sizes = [8, 64], strides = [1, 1]} : vector<8x128xf32> to vector<8x64xf32>
    %133 = vector.extract_strided_slice %131 {offsets = [0, 64], sizes = [8, 64], strides = [1, 1]} : vector<8x128xf32> to vector<8x64xf32>
    %134 = arith.maximumf %132, %133 : vector<8x64xf32>
    %135 = vector.shape_cast %134 : vector<8x64xf32> to vector<2x4x64xf32>
    %c0_118 = arith.constant 0 : index
    %c0_119 = arith.constant 0 : index
    %c0_120 = arith.constant 0 : index
    %136 = vector.load %arg5[%c0_118, %c0_119, %c0_120] : memref<2x4x64xf32, #tpu.memory_space<vmem>>, vector<2x4x64xf32>
    tpu.vector_store %arg5[%c0_118, %c0_119, %c0_120], %135 {strides = array<i32>} : memref<2x4x64xf32, #tpu.memory_space<vmem>>, vector<2x4x64xf32>,
    return
  }
  func.func @transform_0(%arg0: i32) -> (i32, i32, i32) {
    %c0_i32 = arith.constant 0 : i32
    %c0_i32_0 = arith.constant 0 : i32
    %c0_i32_1 = arith.constant 0 : i32
    %c0_i32_2 = arith.constant 0 : i32
    return %c0_i32, %c0_i32_0, %c0_i32_1 : i32, i32, i32
  }
  func.func @transform_1(%arg0: i32) -> (i32, i32) {
    %c0_i32 = arith.constant 0 : i32
    %c0_i32_0 = arith.constant 0 : i32
    %c0_i32_1 = arith.constant 0 : i32
    return %c0_i32, %c0_i32_0 : i32, i32
  }
  func.func @transform_2(%arg0: i32) -> (i32, i32) {
    %c0_i32 = arith.constant 0 : i32
    %c0_i32_0 = arith.constant 0 : i32
    %c0_i32_1 = arith.constant 0 : i32
    return %c0_i32, %c0_i32_0 : i32, i32
  }
  func.func @transform_3(%arg0: i32) -> (i32, i32, i32) {
    %c0_i32 = arith.constant 0 : i32
    %c0_i32_0 = arith.constant 0 : i32
    %c0_i32_1 = arith.constant 0 : i32
    %c0_i32_2 = arith.constant 0 : i32
    return %c0_i32, %c0_i32_0, %c0_i32_1 : i32, i32, i32
  }
  func.func @transform_4(%arg0: i32) -> (i32, i32, i32) {
    %c0_i32 = arith.constant 0 : i32
    %c0_i32_0 = arith.constant 0 : i32
    %c0_i32_1 = arith.constant 0 : i32
    %c0_i32_2 = arith.constant 0 : i32
    return %c0_i32, %c0_i32_0, %c0_i32_1 : i32, i32, i32
  }
}

</mosaic_0001>

<bundles_post_ra>
// kernel: tpu_custom_call.1
= control target key start
LH: loop header
LB: loop body
LE: loop exit
PB: predicated region body
PF: predicated region fallthrough
CT: control target
= control target key end

     0   :  { %9 = vsyncpa [#allocation5], 0  ;;  %s4782_s0 = inlined_call_operand.hbm [shape: f32[2,16,48], index: 0, kind: input, shape index: {}]   ;;  %s4783_s1 = inlined_call_operand.hbm [shape: bf16[384,1024], index: 1, kind: input, shape index: {}]   ;;  %s4784_s2 = inlined_call_operand.hbm [shape: f32[1,1024], index: 2, kind: input, shape index: {}]   ;;  %s4785_s3 = inlined_call_operand.hbm [shape: bf16[2,128,128], index: 3, kind: input, shape index: {}]   ;;  %s4786_s4 = inlined_call_operand.hbm [shape: f32[2,4,64], index: 4, kind: output, shape index: {}]  }
   0x1   :  { %10 = vsyncpa [#allocation8], 0 }
   0x2   :  { %11 = vsyncpa [#allocation11], 0  ;;  %s30_s17 = sshll.u32 %s4783_s1, 4  ;;  %s31_s17 = int_to_ptr.hbm [resolvable:$true] %s30_s17 }
   0x3   :  { %12 = vsyncpa [#allocation6], 0  ;;  %s4362_s18 = smov [#allocation7]   ;;  %s17_s22 = sshll.u32 %s4782_s0, 4  ;;  %s18_s22 = int_to_ptr.hbm [resolvable:$true] %s17_s22 }
   0x4   :  { %s32_s19 = sshll.u32 %s4362_s18, 4  ;;  %s4363_s23 = smov 512   ;;  %s33_s19 = int_to_ptr.vmem [resolvable:$true] %s32_s19 }
   0x5   :  { %s4364_s24 = smov 32   ;;  %s4365_s25 = smov [#allocation4]  }
   0x6   :  { %38 = dma.hbm_to_vmem [thread:$0]  %s31_s17, 24576, %s33_s19, [#allocation8], %s4363_s23, %s4363_s23, %s4364_s24  }
   0x7   :  { %s19_s26 = sshll.u32 %s4365_s25, 4  ;;  %s4366_s27 = smov 128   ;;  %s20_s26 = int_to_ptr.vmem [resolvable:$true] %s19_s26 }
   0x8   :  { %s4367_s28 = smov 8   ;;  %s44_s30 = sshll.u32 %s4784_s2, 4  ;;  %s45_s30 = int_to_ptr.hbm [resolvable:$true] %s44_s30 }
   0x9   :  { %25 = dma.hbm_to_vmem [thread:$0]  %s18_s22, 512, %s20_s26, [#allocation5], %s4366_s27, %s4366_s27, %s4367_s28  }
   0xa   :  { %s4368_s5 = smov [#allocation9]   ;;  %s54_s8 = sshll.u32 %s4785_s3, 4  ;;  %s55_s8 = int_to_ptr.hbm [resolvable:$true] %s54_s8 }
   0xb   :  { %s46_s6 = sshll.u32 %s4368_s5, 4  ;;  %s4369_s9 = smov [#allocation10]   ;;  %s47_s6 = int_to_ptr.vmem [resolvable:$true] %s46_s6 }
   0xc   :  { %49 = dma.hbm_to_vmem [thread:$0]  %s45_s30, 128, %s47_s6, [#allocation8]  }
   0xd   :  { %s56_s10 = sshll.u32 %s4369_s9, 4  ;;  %s4370_s11 = smov 64   ;;  %s57_s10 = int_to_ptr.vmem [resolvable:$true] %s56_s10 }
   0xe   :  { %s4371_s12 = smov 4  }
   0xf   :  { %62 = dma.hbm_to_vmem [thread:$0]  %s55_s8, 2048, %s57_s10, [#allocation11], %s4370_s11, %s4370_s11, %s4371_s12  }
  0x10   :  { %4354 = dma.done.wait [#allocation5], 512  }
  0x11   :  { %4355 = vsyncadd [#allocation5], 4294966784 }
  0x12   :  { %4356 = dma.done.wait [#allocation8], 24704  }
  0x13   :  { %4357 = vsyncadd [#allocation8], 4294942592 }
  0x14   :  { %4358 = dma.done.wait [#allocation11], 2048  }
  0x15   :  { %4359 = vsyncadd [#allocation11], 4294965248  ;;  %v4372_v0 = vmov 0   ;;  %v3081_v1 = vld [vmem:[#allocation7 + $0x1c0] sm:$0xf]  ;;  %vm139_vm2 = vcmask 388096  }
  0x16   :  { %80 = vst [vmem:[#allocation2] sm:$0xff] %v4372_v0  ;;  %v3996_v2 = vld [vmem:[#allocation7 + $0x1dc] sm:$0xf0]  ;;  %vm100_vm0 = vsmask.f32 256  ;;  %vm681_vm10 = vcmask 1043456  }
  0x17   :  { %82 = vst [vmem:[#allocation2 + $0xc] sm:$0xff] %v4372_v0  ;;  %v3145_v3 = vld [vmem:[#allocation7 + $0x3c0] sm:$0xf]  ;;  %v3082_v4 = vor.u32 %v3996_v2, %v3081_v1  ;;  %vm101_vm1 = vsmask.f32 4368  ;;  %vm1946_vm13 = vcmask 1041409  }
  0x18   :  { %81 = vst [vmem:[#allocation2 + $0x8] sm:$0xf] %v4372_v0  ;;  %v4012_v5 = vld [vmem:[#allocation7 + $0x3dc] sm:$0xf0]  ;;  %vm140_vm3 = vsmask.f32 7938  ;;  %vm4486_vm6 = vmor %vm100_vm0, %vm101_vm1 }
  0x19   :  { %83 = vst [vmem:[#allocation2 + $0x14] sm:$0xf] %v4372_v0  ;;  %v3209_v6 = vld [vmem:[#allocation7 + $0x5c0] sm:$0xf]  ;;  %v3146_v8 = vor.u32 %v4012_v5, %v3145_v3  ;;  %523 = vmatpush.bf16.msra.mxu0 %v3082_v4  ;;  %vm155_vm4 = vsmask.f32 3328  ;;  %vm4493_vm7 = vmand %vm139_vm2, %vm140_vm3 }
  0x1a   :  { %84 = vst [vmem:[#allocation2 + $0x18] sm:$0xff] %v4372_v0  ;;  %v4028_v7 = vld [vmem:[#allocation7 + $0x5dc] sm:$0xf0]  ;;  %v93_v4 = vld [vmem:[#allocation4 + $0x8] sm:$0xff]  ;;  %vm156_vm5 = vsmask.f32 7440  ;;  %vm4511_vm9 = vmand %vm139_vm2, %vm155_vm4 }
  0x1b   :  { %85 = vst [vmem:[#allocation2 + $0x20] sm:$0xf] %v4372_v0  ;;  %v3210_v9 = vor.u32 %v4028_v7, %v3209_v6  ;;  %v3073_v10 = vld [vmem:[#allocation7 + $0x180] sm:$0xf]  ;;  %542 = vmatpush.bf16.msra.mxu1 %v3146_v8  ;;  %v97_v8 = vpack.c.bf16 %v93_v4, %v93_v4  ;;  %vm4501_vm8 = vmor %vm155_vm4, %vm156_vm5  ;;  %vm1949_vm14 = vcmask 1042434   ;;  %vm1952_vm15 = vcmask 1043459  }
  0x1c   :  { %v3994_v11 = vld [vmem:[#allocation7 + $0x19c] sm:$0xf0]  ;;  %86 = vst [vmem:[#allocation2 + $0x24] sm:$0xff] %v4372_v0  ;;  %vm4580_vm11 = vmand %vm681_vm10, %vm140_vm3  ;;  %vm1955_vm0 = vcmask 1044484   ;;  %vm1958_vm1 = vcmask 1045509   ;;  %vm1964_vm5 = vcmask 1047559  }
  0x1d   :  { %v3137_v12 = vld [vmem:[#allocation7 + $0x380] sm:$0xf]  ;;  %v3074_v13 = vor.u32 %v3994_v11, %v3073_v10  ;;  %561 = vmatpush.bf16.msra.mxu2 %v3210_v9  ;;  %87 = vst [vmem:[#allocation2 + $0x2c] sm:$0xf] %v4372_v0  ;;  %v94_v9 = vld [vmem:[#allocation4 + $0x10] sm:$0xff]  ;;  %v95_v10 = vld [vmem:[#allocation4 + $0x18] sm:$0xff] }
  0x1e   :  { %v4010_v14 = vld [vmem:[#allocation7 + $0x39c] sm:$0xf0]  ;;  %88 = vst [vmem:[#allocation3] sm:$0xff] %v4372_v0  ;;  %vm4592_vm12 = vmand %vm681_vm10, %vm155_vm4  ;;  %s4373_s2 = smov [#allocation12]   ;;  %s2984_s15 = sshll.u32 %s4786_s4, 4  ;;  %s2985_s15 = int_to_ptr.hbm [resolvable:$true] %s2984_s15 }
  0x1f   :  { %v3201_v15 = vld [vmem:[#allocation7 + $0x580] sm:$0xf]  ;;  %v3138_v17 = vor.u32 %v4010_v14, %v3137_v12  ;;  %524 = vmatpush.bf16.msra.mxu0 %v3074_v13  ;;  %v98_v13 = vpack.c.bf16 %v94_v9, %v94_v9  ;;  %v4474_v14 = vpack.c.bf16 %v95_v10, %v95_v10  ;;  %89 = vst [vmem:[#allocation3 + $0x8] sm:$0xf] %v4372_v0  ;;  %s2982_s3 = sshll.u32 %s4373_s2, 4  ;;  %s2983_s3 = int_to_ptr.vmem [resolvable:$true] %s2982_s3 }
  0x20   :  { %v4026_v16 = vld [vmem:[#allocation7 + $0x59c] sm:$0xf0]  ;;  %90 = vst [vmem:[#allocation3 + $0xc] sm:$0xff] %v4372_v0 }
  0x21   :  { %v3202_v18 = vor.u32 %v4026_v16, %v3201_v15  ;;  %v3065_v19 = vld [vmem:[#allocation7 + $0x140] sm:$0xf]  ;;  %543 = vmatpush.bf16.msra.mxu1 %v3138_v17  ;;  %v112_v17 = vshrl.u32 %v97_v8, 16  ;;  %91 = vst [vmem:[#allocation3 + $0x14] sm:$0xf] %v4372_v0 }
  0x22   :  { %v3992_v20 = vld [vmem:[#allocation7 + $0x15c] sm:$0xf0]  ;;  %152 = vst.msk [vmem:[#allocation2 + $0x10] sm:$0xf] %vm139_vm2, %v97_v8 }
  0x23   :  { %v3129_v21 = vld [vmem:[#allocation7 + $0x340] sm:$0xf]  ;;  %v3066_v25 = vor.u32 %v3992_v20, %v3065_v19  ;;  %562 = vmatpush.bf16.msra.mxu2 %v3202_v18  ;;  %v115_v18 = vshll.u32 %v97_v8, 16  ;;  %v142_v19 = vld [vmem:[#allocation2] sm:$0xf]  ;;  %v120_v20 = vshrl.u32 %v98_v13, 16 }
  0x24   :  { %v4008_v22 = vld [vmem:[#allocation7 + $0x35c] sm:$0xf0]  ;;  %153 = vst.msk [vmem:[#allocation2 + $0x1c] sm:$0xf] %vm139_vm2, %v98_v13  ;;  %v3075_v8 = vld [vmem:[#allocation7 + $0x1a0] sm:$0xf0] }
  0x25   :  { %v3193_v23 = vld [vmem:[#allocation7 + $0x540] sm:$0xf]  ;;  %v3130_v26 = vor.u32 %v4008_v22, %v3129_v21  ;;  %525 = vmatpush.bf16.msra.mxu0 %v3066_v25  ;;  %v123_v21 = vshll.u32 %v98_v13, 16  ;;  %v128_v22 = vshrl.u32 %v4474_v14, 16  ;;  %154 = vst.msk [vmem:[#allocation2 + $0x28] sm:$0xf] %vm139_vm2, %v4474_v14 }
  0x26   :  { %v4024_v24 = vld [vmem:[#allocation7 + $0x55c] sm:$0xf0] }
  0x27   :  { %v3194_v27 = vor.u32 %v4024_v24, %v3193_v23  ;;  %v3057_v28 = vld [vmem:[#allocation7 + $0x100] sm:$0xf]  ;;  %544 = vmatpush.bf16.msra.mxu1 %v3130_v26  ;;  %v131_v23 = vshll.u32 %v4474_v14, 16  ;;  %v173_v13 = vrot.slane %v128_v22, 4 }
  0x28   :  { %v3990_v29 = vld [vmem:[#allocation7 + $0x11c] sm:$0xf0] }
  0x29   :  { %v3121_v30 = vld [vmem:[#allocation7 + $0x300] sm:$0xf]  ;;  %v3058_v41 = vor.u32 %v3990_v29, %v3057_v28  ;;  %563 = vmatpush.bf16.msra.mxu2 %v3194_v27  ;;  %v114_v28 = vrot.slane %v112_v17, 7  ;;  %v171_v10 = vrot.slane %v131_v23, 5 }
  0x2a   :  { %v4006_v31 = vld [vmem:[#allocation7 + $0x31c] sm:$0xf0] }
  0x2b   :  { %v3185_v32 = vld [vmem:[#allocation7 + $0x500] sm:$0xf]  ;;  %v3122_v45 = vor.u32 %v4006_v31, %v3121_v30  ;;  %526 = vmatpush.bf16.msra.mxu0 %v3058_v41 }
  0x2c   :  { %v4022_v33 = vld [vmem:[#allocation7 + $0x51c] sm:$0xf0] }
  0x2d   :  { %v3049_v34 = vld [vmem:[#allocation7 + $0xc0] sm:$0xf]  ;;  %v3186_v46 = vor.u32 %v4022_v33, %v3185_v32  ;;  %545 = vmatpush.bf16.msra.mxu1 %v3122_v45  ;;  %v162_v32 = vrot.slane %v115_v18, 5  ;;  %v164_v33 = vrot.slane %v112_v17, 4  ;;  %v3991_v17 = vld [vmem:[#allocation7 + $0x144] sm:$0xf] }
  0x2e   :  { %v3988_v35 = vld [vmem:[#allocation7 + $0xdc] sm:$0xf0] }
  0x2f   :  { %v4420_v36 = vld [vmem:[#allocation7 + $0x2c0] sm:$0xf]  ;;  %v3050_v56 = vor.u32 %v3988_v35, %v3049_v34  ;;  %564 = vmatpush.bf16.msra.mxu2 %v3186_v46  ;;  %v122_v34 = vrot.slane %v120_v20, 7  ;;  %v130_v35 = vrot.slane %v128_v22, 7  ;;  %v3995_v46 = vld [vmem:[#allocation7 + $0x1c4] sm:$0xf] }
  0x30   :  { %v4004_v37 = vld [vmem:[#allocation7 + $0x2dc] sm:$0xf0] }
  0x31   :  { %v3177_v38 = vld [vmem:[#allocation7 + $0x4c0] sm:$0xf]  ;;  %v3114_v57 = vor.u32 %v4004_v37, %v4420_v36  ;;  %527 = vmatpush.bf16.msra.mxu0 %v3050_v56  ;;  %v133_v45 = vor.u32 %v131_v23, %v130_v35  ;;  %v4027_v23 = vld [vmem:[#allocation7 + $0x5c4] sm:$0xf] }
  0x32   :  { %v4020_v39 = vld [vmem:[#allocation7 + $0x4dc] sm:$0xf0] }
  0x33   :  { %v4422_v40 = vld [vmem:[#allocation7 + $0x80] sm:$0xf]  ;;  %v3178_v58 = vor.u32 %v4020_v39, %v3177_v38  ;;  %546 = vmatpush.bf16.msra.mxu1 %v3114_v57  ;;  %v117_v38 = vor.u32 %v115_v18, %v114_v28  ;;  %v182_v39 = vld [vmem:[#allocation2 + $0x14] sm:$0xf]  ;;  %v3067_v18 = vld [vmem:[#allocation7 + $0x160] sm:$0xf0] }
  0x34   :  { %v4424_v42 = vld [vmem:[#allocation7 + $0x9c] sm:$0xf0] }
  0x35   :  { %v4426_v43 = vld [vmem:[#allocation7 + $0x280] sm:$0xf]  ;;  %v3042_v59 = vor.u32 %v4424_v42, %v4422_v40  ;;  %565 = vmatpush.bf16.msra.mxu2 %v3178_v58  ;;  %v147_v40 = vld [vmem:[#allocation2 + $0x18] sm:$0xf]  ;;  %v165_v42 = vor.u32 %v164_v33, %v162_v32  ;;  %v4025_v33 = vld [vmem:[#allocation7 + $0x584] sm:$0xf] }
  0x36   :  { %v4428_v44 = vld [vmem:[#allocation7 + $0x29c] sm:$0xf0] }
  0x37   :  { %v4430_v47 = vld [vmem:[#allocation7 + $0x480] sm:$0xf]  ;;  %v3106_v63 = vor.u32 %v4428_v44, %v4426_v43  ;;  %528 = vmatpush.bf16.msra.mxu0 %v3042_v59  ;;  %v125_v43 = vor.u32 %v123_v21, %v122_v34  ;;  %v126_v44 = vrot.slane %v122_v34, 4  ;;  %v167_v59 = vrot.slane %v120_v20, 4  ;;  %v3203_v34 = vld [vmem:[#allocation7 + $0x5a0] sm:$0xf0] }
  0x38   :  { %v4432_v48 = vld [vmem:[#allocation7 + $0x49c] sm:$0xf0] }
  0x39   :  { %v4434_v49 = vld [vmem:[#allocation7 + $0x40] sm:$0xf]  ;;  %v3170_v1 = vor.u32 %v4432_v48, %v4430_v47  ;;  %547 = vmatpush.bf16.msra.mxu1 %v3106_v63  ;;  %v3083_v47 = vld [vmem:[#allocation7 + $0x1e0] sm:$0xf0]  ;;  %v148_v4 = vsel %vm4493_vm7, %v125_v43, %v147_v40 }
  0x3a   :  { %v4436_v50 = vld [vmem:[#allocation7 + $0x5c] sm:$0xf0]  ;;  %v3993_v63 = vld [vmem:[#allocation7 + $0x184] sm:$0xf]  ;;  %149 = vst [vmem:[#allocation2 + $0x18] sm:$0xf] %v148_v4 }
  0x3b   :  { %v4438_v51 = vld [vmem:[#allocation7 + $0x240] sm:$0xf]  ;;  %v3034_v2 = vor.u32 %v4436_v50, %v4434_v49  ;;  %566 = vmatpush.bf16.msra.mxu2 %v3170_v1  ;;  %v134_v50 = vsel %vm4486_vm6, %v126_v44, %v133_v45  ;;  %v3131_v40 = vld [vmem:[#allocation7 + $0x360] sm:$0xf0] }
  0x3c   :  { %v4440_v52 = vld [vmem:[#allocation7 + $0x25c] sm:$0xf0]  ;;  %150 = vst.msk [vmem:[#allocation2 + $0x24] sm:$0xf] %vm139_vm2, %v134_v50  ;;  %v4023_v43 = vld [vmem:[#allocation7 + $0x544] sm:$0xf] }
  0x3d   :  { %v4442_v53 = vld [vmem:[#allocation7 + $0x440] sm:$0xf]  ;;  %v3098_v5 = vor.u32 %v4440_v52, %v4438_v51  ;;  %529 = vmatpush.bf16.msra.mxu0 %v3034_v2  ;;  %v174_v51 = vor.u32 %v173_v13, %v171_v10  ;;  %v3078_v52 = vor.u32 %v3993_v63, %v3075_v8  ;;  %v3195_v44 = vld [vmem:[#allocation7 + $0x560] sm:$0xf0] }
  0x3e   :  { %v4444_v54 = vld [vmem:[#allocation7 + $0x45c] sm:$0xf0]  ;;  %v3198_v45 = vor.u32 %v4023_v43, %v3195_v44  ;;  %v3187_v63 = vld [vmem:[#allocation7 + $0x520] sm:$0xf0]  ;;  %v3293_v43 = vld [vmem:[#allocation7 + $0x348] sm:$0xf] }
  0x3f   :  { %v4446_v55 = vld [vmem:[#allocation7] sm:$0xf]  ;;  %v3162_v6 = vor.u32 %v4444_v54, %v4442_v53  ;;  %548 = vmatpush.bf16.msra.mxu1 %v3098_v5  ;;  %v3147_v53 = vld [vmem:[#allocation7 + $0x3e0] sm:$0xf0]  ;;  %v3003_v54 = vld [vmem:[#allocation2 + $0xc] sm:$0xf0] }
  0x40   :  { %v4451_v60 = vld [vmem:[#allocation7 + $0x1c] sm:$0xf0]  ;;  %v175_v22 = vrot.slane %v174_v51, 4  ;;  %v3983_v50 = vld [vmem:[#allocation7 + $0x44] sm:$0xf] }
  0x41   :  { %v4453_v61 = vld [vmem:[#allocation7 + $0x200] sm:$0xf]  ;;  %v3026_v11 = vor.u32 %v4451_v60, %v4446_v55  ;;  %567 = vmatpush.bf16.msra.mxu2 %v3162_v6  ;;  %v3013_v4 = vld [vmem:[#allocation2 + $0x18] sm:$0xf]  ;;  %v4048_v44 = vld [vmem:[#allocation7 + $0x364] sm:$0xf0] }
  0x42   :  { %v4455_v62 = vld [vmem:[#allocation7 + $0x21c] sm:$0xf0] }
  0x43   :  { %v92_v3 = vld [vmem:[#allocation4] sm:$0xff]  ;;  %v3090_v12 = vor.u32 %v4455_v62, %v4453_v61  ;;  %530 = vmatpush.bf16.msra.mxu0 %v3026_v11  ;;  %v3070_v11 = vor.u32 %v3991_v17, %v3067_v18 }
  0x44   :  { %v96_v7 = vpack.c.bf16 %v92_v3, %v92_v3  ;;  %v4480_v24 = vld [vmem:[#allocation7 + $0x400] sm:$0xf]  ;;  %v166_v3 = vrot.slane %v165_v42, 4  ;;  %v3989_v61 = vld [vmem:[#allocation7 + $0x104] sm:$0xf] }
  0x45   :  { %v4482_v25 = vld [vmem:[#allocation7 + $0x41c] sm:$0xf0]  ;;  %549 = vmatpush.bf16.msra.mxu1 %v3090_v12  ;;  %v3059_v12 = vld [vmem:[#allocation7 + $0x120] sm:$0xf0] }
  0x46   :  { %v104_v15 = vshrl.u32 %v96_v7, 16  ;;  %v107_v16 = vshll.u32 %v96_v7, 16  ;;  %151 = vst.msk [vmem:[#allocation2 + $0x4] sm:$0xf] %vm139_vm2, %v96_v7  ;;  %v3154_v1 = vor.u32 %v4482_v25, %v4480_v24  ;;  %v168_v7 = vrot.slane %v123_v21, 5  ;;  %v4126_v26 = vld [vmem:[#allocation10 + $0x38] sm:$0xff] }
  0x47   :  { %v183_v49 = vsel %vm4511_vm9, %v166_v3, %v182_v39  ;;  %v3211_v25 = vld [vmem:[#allocation7 + $0x5e0] sm:$0xf0]  ;;  %v3015_v8 = vld [vmem:[#allocation2 + $0x24] sm:$0xf0] }
  0x48   :  { %v106_v27 = vrot.slane %v104_v15, 7  ;;  %v158_v29 = vrot.slane %v104_v15, 4  ;;  %v159_v30 = vrot.slane %v107_v16, 5  ;;  %v3086_v15 = vor.u32 %v3995_v46, %v3083_v47  ;;  %184 = vst [vmem:[#allocation2 + $0x14] sm:$0xf] %v183_v49  ;;  %568 = vmatpush.bf16.msra.mxu2 %v3154_v1 }
  0x49   :  { %v169_v2 = vor.u32 %v168_v7, %v167_v59  ;;  %v4007_v39 = vld [vmem:[#allocation7 + $0x344] sm:$0xf]  ;;  %v3978_v7 = vld [vmem:[#allocation2 + $0x1c] sm:$0xf] }
  0x4a   :  { %v109_v36 = vor.u32 %v107_v16, %v106_v27  ;;  %v110_v37 = vrot.slane %v106_v27, 4  ;;  %v160_v0 = vor.u32 %v159_v30, %v158_v29  ;;  %v186_v16 = vld [vmem:[#allocation2 + $0x2c] sm:$0xf]  ;;  %580 = vmatpush.bf16.msra.mxu3 %v3086_v15  ;;  %v3214_v27 = vor.u32 %v4027_v23, %v3211_v25 }
  0x4b   :  { %v170_v5 = vrot.slane %v169_v2, 4  ;;  %v187_v60 = vsel %vm4511_vm9, %v175_v22, %v186_v16  ;;  %v4009_v29 = vld [vmem:[#allocation7 + $0x384] sm:$0xf]  ;;  %v3134_v42 = vor.u32 %v4007_v39, %v3131_v40  ;;  %v4560_v18 = vor.u32 %v3978_v7, %v3015_v8  ;;  %v4057_v7 = vld [vmem:[#allocation7 + $0x5a4] sm:$0xf0] }
  0x4c   :  { %v118_v48 = vsel %vm4486_vm6, %v110_v37, %v117_v38  ;;  %v143_v56 = vsel %vm4493_vm7, %v109_v36, %v142_v19  ;;  %v161_v57 = vrot.slane %v160_v0, 4  ;;  %v4011_v19 = vld [vmem:[#allocation7 + $0x3c4] sm:$0xf]  ;;  %188 = vst [vmem:[#allocation2 + $0x2c] sm:$0xf] %v187_v60  ;;  %618 = vmatpush.bf16.msrb.mxu1 %v3214_v27  ;;  %v3062_v36 = vor.u32 %v3989_v61, %v3059_v12 }
  0x4d   :  { %144 = vst [vmem:[#allocation2] sm:$0xf] %v143_v56  ;;  %v3975_v20 = vld [vmem:[#allocation2 + $0x4] sm:$0xf]  ;;  %v3150_v6 = vor.u32 %v4011_v19, %v3147_v53  ;;  %v172_v24 = vsel %vm4501_vm8, %v170_v5, %v171_v10  ;;  %v3139_v30 = vld [vmem:[#allocation7 + $0x3a0] sm:$0xf0]  ;;  %v3206_v37 = vor.u32 %v4025_v33, %v3203_v34 }
  0x4e   :  { %146 = vst.msk [vmem:[#allocation2 + $0xc] sm:$0xf] %vm139_vm2, %v118_v48  ;;  %v163_v9 = vsel %vm4501_vm8, %v161_v57, %v162_v32  ;;  %v4540_v21 = vor.u32 %v3975_v20, %v3003_v54  ;;  %581 = vmatpush.bf16.msra.mxu3 %v3078_v52  ;;  %v3142_v32 = vor.u32 %v4009_v29, %v3139_v30  ;;  %v3987_v38 = vld [vmem:[#allocation7 + $0xc4] sm:$0xf]  ;;  %v3979_v10 = vld [vmem:[#allocation2 + $0x20] sm:$0xf0] }
  0x4f   :  { %180 = vst.msk [vmem:[#allocation2 + $0x8] sm:$0xf] %vm139_vm2, %v163_v9  ;;  %599 = vmatpush.bf16.msrb.mxu0 %v3150_v6  ;;  %v3977_v31 = vld [vmem:[#allocation2 + $0x10] sm:$0xf0]  ;;  %v3051_v0 = vld [vmem:[#allocation7 + $0xe0] sm:$0xf0]  ;;  %v3014_v53 = vor.u32 %v3979_v10, %v3013_v4 }
  0x50   :  { %185 = vst.msk [vmem:[#allocation2 + $0x20] sm:$0xf] %vm139_vm2, %v172_v24  ;;  %550 = vmatmul.bf16.vlgmr.msra.gmra.mxu1 %v4540_v21  ;;  %v3054_v46 = vor.u32 %v3987_v38, %v3051_v0  ;;  %v3985_v47 = vld [vmem:[#allocation7 + $0x84] sm:$0xf]  ;;  %v4050_v27 = vld [vmem:[#allocation7 + $0x3e4] sm:$0xf0] }
  0x51   :  { %619 = vmatpush.bf16.msrb.mxu1 %v3206_v37  ;;  %v4005_v48 = vld [vmem:[#allocation7 + $0x304] sm:$0xf]  ;;  %v4049_v33 = vld [vmem:[#allocation7 + $0x3a4] sm:$0xf0]  ;;  %vm1961_vm2 = vcmask 1046534  }
  0x52   :  { %582 = vmatpush.bf16.msra.mxu3 %v3070_v11  ;;  %v3123_v56 = vld [vmem:[#allocation7 + $0x320] sm:$0xf0]  ;;  %v3301_v11 = vld [vmem:[#allocation7 + $0x3c8] sm:$0xf] }
  0x53   :  { %600 = vmatpush.bf16.msrb.mxu0 %v3142_v32  ;;  %v3043_v57 = vld [vmem:[#allocation7 + $0xa0] sm:$0xf0]  ;;  %v3126_v58 = vor.u32 %v4005_v48, %v3123_v56  ;;  %v3302_v61 = vor.u32 %v4050_v27, %v3301_v11  ;;  %v3297_v32 = vld [vmem:[#allocation7 + $0x388] sm:$0xf] }
  0x54   :  { %v3001_v55 = vld [vmem:[#allocation2] sm:$0xf]  ;;  %v4021_v59 = vld [vmem:[#allocation7 + $0x504] sm:$0xf]  ;;  %v3046_v13 = vor.u32 %v3985_v47, %v3043_v57  ;;  %v4042_v0 = vld [vmem:[#allocation7 + $0x1e4] sm:$0xf0] }
  0x55   :  { %v3976_v62 = vld [vmem:[#allocation2 + $0x8] sm:$0xf0]  ;;  %620 = vmatpush.bf16.msrb.mxu1 %v3198_v45  ;;  %v3190_v9 = vor.u32 %v4021_v59, %v3187_v63  ;;  %v3333_v47 = vld [vmem:[#allocation7 + $0x5c8] sm:$0xf] }
  0x56   :  { %v4553_v28 = vor.u32 %v3976_v62, %v3001_v55  ;;  %v3009_v14 = vld [vmem:[#allocation2 + $0x8] sm:$0xf]  ;;  %583 = vmatpush.bf16.msra.mxu3 %v3062_v36  ;;  %v4003_v1 = vld [vmem:[#allocation7 + $0x2c4] sm:$0xf]  ;;  %v3298_v36 = vor.u32 %v4049_v33, %v3297_v32  ;;  %v4058_v48 = vld [vmem:[#allocation7 + $0x5e4] sm:$0xf0] }
  0x57   :  { %v4557_v35 = vor.u32 %v3977_v31, %v3009_v14  ;;  %601 = vmatpush.bf16.msrb.mxu0 %v3134_v42  ;;  %v3115_v3 = vld [vmem:[#allocation7 + $0x2e0] sm:$0xf0]  ;;  %v3021_v20 = vld [vmem:[#allocation2 + $0x20] sm:$0xf]  ;;  %v3334_v56 = vor.u32 %v4058_v48, %v3333_v47  ;;  %v3265_v57 = vld [vmem:[#allocation7 + $0x188] sm:$0xf] }
  0x58   :  { %531 = vmatmul.bf16.vlgmr.msra.gmra.mxu0 %v4553_v28  ;;  %v4019_v15 = vld [vmem:[#allocation7 + $0x4c4] sm:$0xf]  ;;  %v3118_v16 = vor.u32 %v4003_v1, %v3115_v3  ;;  %v3289_v63 = vld [vmem:[#allocation7 + $0x308] sm:$0xf] }
  0x59   :  { %569 = vmatmul.bf16.vlgmr.msra.gmra.mxu2 %v4557_v35  ;;  %v3179_v49 = vld [vmem:[#allocation7 + $0x4e0] sm:$0xf0]  ;;  %621 = vmatpush.bf16.msrb.mxu1 %v3190_v9  ;;  %v4047_v1 = vld [vmem:[#allocation7 + $0x324] sm:$0xf0] }
  0x5a   :  { %584 = vmatpush.bf16.msra.mxu3 %v3054_v46  ;;  %v3035_v2 = vld [vmem:[#allocation7 + $0x60] sm:$0xf0]  ;;  %v3182_v52 = vor.u32 %v4019_v15, %v3179_v49  ;;  %v3294_v46 = vor.u32 %v4048_v44, %v3293_v43  ;;  %v3290_v3 = vor.u32 %v4047_v1, %v3289_v63  ;;  %v3329_v4 = vld [vmem:[#allocation7 + $0x588] sm:$0xf] }
  0x5b   :  { %602 = vmatpush.bf16.msrb.mxu0 %v3126_v58  ;;  %v4001_v17 = vld [vmem:[#allocation7 + $0x284] sm:$0xf]  ;;  %v3038_v54 = vor.u32 %v3983_v50, %v3035_v2  ;;  %v4041_v58 = vld [vmem:[#allocation7 + $0x1a4] sm:$0xf0]  ;;  %v3330_v8 = vor.u32 %v4057_v7, %v3329_v4 }
  0x5c   :  { %v3107_v19 = vld [vmem:[#allocation7 + $0x2a0] sm:$0xf0]  ;;  %v3266_v59 = vor.u32 %v4041_v58, %v3265_v57  ;;  %v3261_v9 = vld [vmem:[#allocation7 + $0x148] sm:$0xf] }
  0x5d   :  { %v3980_v51 = vld [vmem:[#allocation2 + $0x28] sm:$0xf0]  ;;  %v3110_v24 = vor.u32 %v4001_v17, %v3107_v19  ;;  %622 = vmatpush.bf16.msrb.mxu1 %v3182_v52  ;;  %v4040_v10 = vld [vmem:[#allocation7 + $0x164] sm:$0xf0] }
  0x5e   :  { %585 = vmatpush.bf16.msra.mxu3 %v3046_v13  ;;  %v4017_v5 = vld [vmem:[#allocation7 + $0x484] sm:$0xf]  ;;  %v4563_v25 = vor.u32 %v3980_v51, %v3021_v20  ;;  %v3262_v13 = vor.u32 %v4040_v10, %v3261_v9  ;;  %v4046_v15 = vld [vmem:[#allocation7 + $0x2e4] sm:$0xf0] }
  0x5f   :  { %v3171_v6 = vld [vmem:[#allocation7 + $0x4a0] sm:$0xf0]  ;;  %603 = vmatpush.bf16.msrb.mxu0 %v3118_v16  ;;  %v3325_v50 = vld [vmem:[#allocation7 + $0x548] sm:$0xf] }
  0x60   :  { %v3981_v22 = vld [vmem:[#allocation7 + $0x4] sm:$0xf]  ;;  %555 = vmatmul.bf16.gmra.mxu1 %v4560_v18  ;;  %v3174_v55 = vor.u32 %v4017_v5, %v3171_v6  ;;  %v4056_v2 = vld [vmem:[#allocation7 + $0x564] sm:$0xf0] }
  0x61   :  { %v3027_v23 = vld [vmem:[#allocation7 + $0x20] sm:$0xf0]  ;;  %v3326_v16 = vor.u32 %v4056_v2, %v3325_v50  ;;  %v3257_v17 = vld [vmem:[#allocation7 + $0x108] sm:$0xf] }
  0x62   :  { %586 = vmatpush.bf16.msra.mxu3 %v3038_v54  ;;  %v3030_v60 = vor.u32 %v3981_v22, %v3027_v23  ;;  %623 = vmatpush.bf16.msrb.mxu1 %v3174_v55  ;;  %v3999_v62 = vld [vmem:[#allocation7 + $0x244] sm:$0xf]  ;;  %v4039_v19 = vld [vmem:[#allocation7 + $0x124] sm:$0xf0] }
  0x63   :  { %604 = vmatpush.bf16.msrb.mxu0 %v3110_v24  ;;  %v3099_v12 = vld [vmem:[#allocation7 + $0x260] sm:$0xf0]  ;;  %v3258_v20 = vor.u32 %v4039_v19, %v3257_v17  ;;  %v4045_v51 = vld [vmem:[#allocation7 + $0x2a4] sm:$0xf0]  ;;  %v683_v17 = vld [vmem:[#allocation2] sm:$0xf] }
  0x64   :  { %v3102_v14 = vor.u32 %v3999_v62, %v3099_v12  ;;  %v4015_v29 = vld [vmem:[#allocation7 + $0x444] sm:$0xf]  ;;  %v3321_v52 = vld [vmem:[#allocation7 + $0x508] sm:$0xf]  ;;  %v4569_v62 = vld [vmem:[#allocation9] sm:$0x3] }
  0x65   :  { %v3163_v30 = vld [vmem:[#allocation7 + $0x460] sm:$0xf0]  ;;  %v4055_v54 = vld [vmem:[#allocation7 + $0x524] sm:$0xf0] }
  0x66   :  { %587 = vmatpush.bf16.msra.mxu3 %v3030_v60  ;;  %v3166_v31 = vor.u32 %v4015_v29, %v3163_v30  ;;  %v3997_v34 = vld [vmem:[#allocation7 + $0x204] sm:$0xf]  ;;  %v3322_v5 = vor.u32 %v4055_v54, %v3321_v52  ;;  %v3253_v6 = vld [vmem:[#allocation7 + $0xc8] sm:$0xf] }
  0x67   :  { %605 = vmatpush.bf16.msrb.mxu0 %v3102_v14  ;;  %v3091_v37 = vld [vmem:[#allocation7 + $0x220] sm:$0xf0]  ;;  %v4038_v22 = vld [vmem:[#allocation7 + $0xe4] sm:$0xf0] }
  0x68   :  { %536 = vmatmul.bf16.gmra.mxu0 %v3014_v53  ;;  %624 = vmatpush.bf16.msrb.mxu1 %v3166_v31  ;;  %v3094_v38 = vor.u32 %v3997_v34, %v3091_v37  ;;  %v4013_v39 = vld [vmem:[#allocation7 + $0x404] sm:$0xf]  ;;  %v3254_v23 = vor.u32 %v4038_v22, %v3253_v6  ;;  %v3277_v24 = vld [vmem:[#allocation7 + $0x248] sm:$0xf] }
  0x69   :  { %574 = vmatmul.bf16.gmra.mxu2 %v4563_v25  ;;  %588 = vmatmul.bf16.vlgmr.msra.gmra.mxu3 %v4553_v28  ;;  %v3269_v28 = vld [vmem:[#allocation7 + $0x1c8] sm:$0xf]  ;;  %v3155_v42 = vld [vmem:[#allocation7 + $0x420] sm:$0xf0] }
  0x6a   :  { %981 = vmatpush.bf16.msrb.mxu3 %v3302_v61  ;;  %v3270_v40 = vor.u32 %v4042_v0, %v3269_v28  ;;  %v3158_v45 = vor.u32 %v4013_v39, %v3155_v42  ;;  %v4044_v55 = vld [vmem:[#allocation7 + $0x264] sm:$0xf0] }
  0x6b   :  { %606 = vmatpush.bf16.msrb.mxu0 %v3094_v38  ;;  %v3278_v60 = vor.u32 %v4044_v55, %v3277_v24  ;;  %v3317_v11 = vld [vmem:[#allocation7 + $0x4c8] sm:$0xf] }
  0x6c   :  { %962 = vmatpush.bf16.msrb.mxu2 %v3270_v40  ;;  %625 = vmatpush.bf16.msrb.mxu1 %v3158_v45  ;;  %v4054_v27 = vld [vmem:[#allocation7 + $0x4e4] sm:$0xf0] }
  0x6d   :  { %v3318_v61 = vor.u32 %v4054_v27, %v3317_v11  ;;  %v3249_v12 = vld [vmem:[#allocation7 + $0x88] sm:$0xf] }
  0x6e   :  { %982 = vmatpush.bf16.msrb.mxu3 %v3298_v36  ;;  %v4037_v14 = vld [vmem:[#allocation7 + $0xa4] sm:$0xf0]  ;;  %v4573_v36 = vperm.slane %v4569_v62, 0 }
  0x6f   :  { %1000 = vmatpush.bf16.msra.mxu0 %v3334_v56  ;;  %v3250_v29 = vor.u32 %v4037_v14, %v3249_v12  ;;  %v3273_v30 = vld [vmem:[#allocation7 + $0x208] sm:$0xf] }
  0x70   :  { %626 = vmatmul.bf16.vlgmr.msrb.gmra.mxu1 %v4557_v35  ;;  %963 = vmatpush.bf16.msrb.mxu2 %v3266_v59  ;;  %v3281_v35 = vld [vmem:[#allocation7 + $0x288] sm:$0xf] }
  0x71   :  { %v4043_v31 = vld [vmem:[#allocation7 + $0x224] sm:$0xf0] }
  0x72   :  { %983 = vmatpush.bf16.msrb.mxu3 %v3294_v46  ;;  %v3274_v32 = vor.u32 %v4043_v31, %v3273_v30  ;;  %v3313_v33 = vld [vmem:[#allocation7 + $0x488] sm:$0xf] }
  0x73   :  { %1001 = vmatpush.bf16.msra.mxu0 %v3330_v8  ;;  %v4053_v34 = vld [vmem:[#allocation7 + $0x4a4] sm:$0xf0] }
  0x74   :  { %964 = vmatpush.bf16.msrb.mxu2 %v3262_v13  ;;  %v3314_v37 = vor.u32 %v4053_v34, %v3313_v33  ;;  %v3245_v38 = vld [vmem:[#allocation7 + $0x48] sm:$0xf]  ;;  %v719_v34 = vld [vmem:[#allocation2 + $0x14] sm:$0xf] }
  0x75   :  { %v4036_v28 = vld [vmem:[#allocation7 + $0x64] sm:$0xf0] }
  0x76   :  { %984 = vmatpush.bf16.msrb.mxu3 %v3290_v3  ;;  %v3246_v0 = vor.u32 %v4036_v28, %v3245_v38  ;;  %v3309_v40 = vld [vmem:[#allocation7 + $0x448] sm:$0xf] }
  0x77   :  { %1002 = vmatpush.bf16.msra.mxu0 %v3326_v16  ;;  %v4052_v42 = vld [vmem:[#allocation7 + $0x464] sm:$0xf0]  ;;  %v4212_v16 = vld [vmem:[#allocation10 + $0x78] sm:$0xff] }
  0x78   :  { %607 = vmatmul.bf16.vlgmr.msrb.gmra.mxu0 %v4540_v21  ;;  %v3285_v21 = vld [vmem:[#allocation7 + $0x2c8] sm:$0xf]  ;;  %965 = vmatpush.bf16.msrb.mxu2 %v3258_v20  ;;  %v3310_v44 = vor.u32 %v4052_v42, %v3309_v40 }
  0x79   :  { %593 = vmatmul.bf16.gmra.mxu3 %v3014_v53  ;;  %v3286_v49 = vor.u32 %v4046_v15, %v3285_v21  ;;  %v3282_v53 = vor.u32 %v4045_v51, %v3281_v35  ;;  %v3241_v45 = vld [vmem:[#allocation7 + $0x8] sm:$0xf] }
  0x7a   :  { %v4035_v46 = vld [vmem:[#allocation7 + $0x24] sm:$0xf0] }
  0x7b   :  { %985 = vmatpush.bf16.msrb.mxu3 %v3286_v49  ;;  %1003 = vmatpush.bf16.msra.mxu0 %v3322_v5  ;;  %v3242_v47 = vor.u32 %v4035_v46, %v3241_v45  ;;  %v4051_v48 = vld [vmem:[#allocation7 + $0x424] sm:$0xf0] }
  0x7c   :  { %966 = vmatpush.bf16.msrb.mxu2 %v3254_v23 }
  0x7f   :  { %986 = vmatpush.bf16.msrb.mxu3 %v3282_v53  ;;  %1004 = vmatpush.bf16.msra.mxu0 %v3318_v61 }
  0x80   :  { %631 = vmatmul.bf16.gmra.mxu1 %v4563_v25  ;;  %967 = vmatpush.bf16.msrb.mxu2 %v3250_v29  ;;  %v3305_v25 = vld [vmem:[#allocation7 + $0x408] sm:$0xf] }
  0x81   :  { %v3306_v57 = vor.u32 %v4051_v48, %v3305_v25 }
  0x83   :  { %987 = vmatpush.bf16.msrb.mxu3 %v3278_v60  ;;  %1005 = vmatpush.bf16.msra.mxu0 %v3314_v37 }
  0x84   :  { %968 = vmatpush.bf16.msrb.mxu2 %v3246_v0 }
  0x87   :  { %988 = vmatpush.bf16.msrb.mxu3 %v3274_v32  ;;  %1006 = vmatpush.bf16.msra.mxu0 %v3310_v44 }
  0x88   :  { %612 = vmatmul.bf16.gmra.mxu0 %v4560_v18  ;;  %969 = vmatpush.bf16.msrb.mxu2 %v3242_v47 }
  0x8b   :  { %1007 = vmatpush.bf16.msra.mxu0 %v3306_v57 }
  0xcd   :  { %v551_v18 = vpop.f32.mrf.mxu1 }
  0xd5   :  { %v532_v39 = vpop.f32.mrf.mxu0  ;;  %v553_v1 = vpop.f32.mrf.mxu1 }
  0xd6   :  { %v533_v43 = vadd.f32 %v532_v39, %v4573_v36 }
  0xd8   :  { %v552_v56 = vadd.f32 %v551_v18, %v533_v43 }
  0xdc   :  { %v570_v58 = vpop.f32.mrf.mxu2 }
  0xdd   :  { %v534_v59 = vpop.f32.mrf.mxu0  ;;  %v571_v63 = vadd.f32 %v570_v58, %v552_v56  ;;  %v556_v51 = vpop.f32.mrf.mxu1  ;;  %v687_v56 = vld [vmem:[#allocation2 + $0x18] sm:$0xf] }
  0xde   :  { %v535_v4 = vadd.f32 %v534_v59, %v4573_v36 }
  0xdf   :  { %v637_v3 = vmax.f32 %v571_v63, 0.0 }
  0xe0   :  { %v554_v10 = vadd.f32 %v553_v1, %v535_v4 }
  0xe1   :  { %v641_v7 = vpack.c.bf16 %v637_v3, %v637_v3 }
  0xe3   :  { %v646_v8 = vshrl.u32 %v641_v7, 16  ;;  %v649_v9 = vshll.u32 %v641_v7, 16  ;;  %691 = vst [vmem:[#allocation2 + $0x4] sm:$0xf] %v641_v7 }
  0xe4   :  { %v572_v13 = vpop.f32.mrf.mxu2 }
  0xe5   :  { %v537_v21 = vpop.f32.mrf.mxu0  ;;  %v648_v15 = vrot.slane %v646_v8, 7  ;;  %v695_v49 = vrot.slane %v646_v8, 4  ;;  %v696_v50 = vrot.slane %v649_v9, 5  ;;  %v573_v2 = vadd.f32 %v572_v13, %v554_v10 }
  0xe6   :  { %v538_v19 = vadd.f32 %v537_v21, %v4573_v36 }
  0xe7   :  { %v651_v20 = vor.u32 %v649_v9, %v648_v15  ;;  %v638_v35 = vmax.f32 %v573_v2, 0.0  ;;  %v697_v52 = vor.u32 %v696_v50, %v695_v49  ;;  %v652_v12 = vrot.slane %v648_v15, 4 }
  0xe8   :  { %v557_v5 = vadd.f32 %v556_v51, %v538_v19  ;;  %v723_v51 = vld [vmem:[#allocation2 + $0x2c] sm:$0xf] }
  0xe9   :  { %v684_v53 = vsel %vm4580_vm11, %v651_v20, %v683_v17  ;;  %v642_v54 = vpack.c.bf16 %v638_v35, %v638_v35  ;;  %v698_v23 = vrot.slane %v697_v52, 4 }
  0xea   :  { %685 = vst [vmem:[#allocation2] sm:$0xf] %v684_v53  ;;  %v4029_v0 = vld [vmem:[#allocation2 + $0x4] sm:$0xf] }
  0xeb   :  { %v654_v6 = vshrl.u32 %v642_v54, 16  ;;  %v657_v22 = vshll.u32 %v642_v54, 16  ;;  %692 = vst [vmem:[#allocation2 + $0x10] sm:$0xf] %v642_v54 }
  0xec   :  { %v575_v24 = vpop.f32.mrf.mxu2 }
  0xed   :  { %v539_v55 = vpop.f32.mrf.mxu0  ;;  %v656_v60 = vrot.slane %v654_v6, 7  ;;  %v699_v11 = vrot.slane %v657_v22, 5  ;;  %v701_v27 = vrot.slane %v654_v6, 4  ;;  %v576_v61 = vadd.f32 %v575_v24, %v557_v5 }
  0xee   :  { %v540_v14 = vadd.f32 %v539_v55, %v4573_v36  ;;  %v558_v36 = vpop.f32.mrf.mxu1 }
  0xef   :  { %v659_v29 = vor.u32 %v657_v22, %v656_v60  ;;  %v700_v30 = vsel %vm4501_vm8, %v698_v23, %v699_v11  ;;  %v702_v31 = vor.u32 %v701_v27, %v699_v11  ;;  %v639_v32 = vmax.f32 %v576_v61, 0.0  ;;  %v4608_v61 = vpop.f32.mrf.mxu3 }
  0xf0   :  { %717 = vst [vmem:[#allocation2 + $0x8] sm:$0xf] %v700_v30  ;;  %v559_v18 = vadd.f32 %v558_v36, %v540_v14  ;;  %v3421_v14 = vld [vmem:[#allocation7 + $0x3cc] sm:$0xf] }
  0xf1   :  { %v660_v37 = vsel %vm4486_vm6, %v652_v12, %v659_v29  ;;  %v703_v38 = vrot.slane %v702_v31, 4  ;;  %v643_v28 = vpack.c.bf16 %v639_v32, %v639_v32  ;;  %v3217_v3 = vld [vmem:[#allocation2] sm:$0xf]  ;;  %v4080_v29 = vld [vmem:[#allocation7 + $0x3e8] sm:$0xf0] }
  0xf2   :  { %686 = vst [vmem:[#allocation2 + $0xc] sm:$0xf] %v660_v37  ;;  %v3219_v39 = vld [vmem:[#allocation2 + $0xc] sm:$0xf0]  ;;  %v3422_v31 = vor.u32 %v4080_v29, %v3421_v14  ;;  %v4079_v37 = vld [vmem:[#allocation7 + $0x3a8] sm:$0xf0] }
  0xf3   :  { %v720_v40 = vsel %vm4592_vm12, %v703_v38, %v719_v34  ;;  %v662_v42 = vshrl.u32 %v643_v28, 16  ;;  %v665_v43 = vshll.u32 %v643_v28, 16  ;;  %693 = vst [vmem:[#allocation2 + $0x1c] sm:$0xf] %v643_v28  ;;  %v3222_v44 = vor.u32 %v4029_v0, %v3219_v39  ;;  %v3417_v34 = vld [vmem:[#allocation7 + $0x38c] sm:$0xf] }
  0xf4   :  { %721 = vst [vmem:[#allocation2 + $0x14] sm:$0xf] %v720_v40  ;;  %v577_v45 = vpop.f32.mrf.mxu2  ;;  %1364 = vmatpush.bf16.msra.mxu2 %v3422_v31  ;;  %v3418_v38 = vor.u32 %v4079_v37, %v3417_v34  ;;  %v3389_v28 = vld [vmem:[#allocation7 + $0x1cc] sm:$0xf] }
  0xf5   :  { %v664_v46 = vrot.slane %v662_v42, 7  ;;  %v704_v47 = vrot.slane %v662_v42, 4  ;;  %v705_v25 = vrot.slane %v665_v43, 5  ;;  %v578_v48 = vadd.f32 %v577_v45, %v559_v18  ;;  %989 = vmatmul.bf16.vlgmr.msrb.gmra.mxu3 %v3222_v44  ;;  %v4610_v12 = vpop.f32.mrf.mxu0  ;;  %v4072_v36 = vld [vmem:[#allocation7 + $0x1e8] sm:$0xf0] }
  0xf6   :  { %v3390_v18 = vor.u32 %v4072_v36, %v3389_v28  ;;  %v3413_v0 = vld [vmem:[#allocation7 + $0x34c] sm:$0xf]  ;;  %v627_v34 = vpop.f32.mrf.mxu1 }
  0xf7   :  { %v667_v57 = vor.u32 %v665_v43, %v664_v46  ;;  %v640_v58 = vmax.f32 %v578_v48, 0.0  ;;  %v706_v63 = vor.u32 %v705_v25, %v704_v47  ;;  %v3225_v8 = vld [vmem:[#allocation2 + $0x8] sm:$0xf]  ;;  %v668_v17 = vrot.slane %v664_v46, 4  ;;  %v4612_v30 = vpop.f32.mrf.mxu3  ;;  %v4078_v39 = vld [vmem:[#allocation7 + $0x368] sm:$0xf0] }
  0xf8   :  { %1365 = vmatpush.bf16.msra.mxu2 %v3418_v38  ;;  %1345 = vmatpush.bf16.msra.mxu1 %v3390_v18  ;;  %v3414_v40 = vor.u32 %v4078_v39, %v3413_v0  ;;  %v3453_v42 = vld [vmem:[#allocation7 + $0x5cc] sm:$0xf] }
  0xf9   :  { %v688_v59 = vsel %vm4580_vm11, %v667_v57, %v687_v56  ;;  %v644_v1 = vpack.c.bf16 %v640_v58, %v640_v58  ;;  %v4030_v4 = vld [vmem:[#allocation2 + $0x8] sm:$0xf0]  ;;  %v707_v15 = vrot.slane %v706_v63, 4  ;;  %v4088_v43 = vld [vmem:[#allocation7 + $0x5e8] sm:$0xf0] }
  0xfa   :  { %689 = vst [vmem:[#allocation2 + $0x18] sm:$0xf] %v688_v59  ;;  %v3218_v7 = vor.u32 %v4030_v4, %v3217_v3  ;;  %v4032_v54 = vld [vmem:[#allocation2 + $0x1c] sm:$0xf]  ;;  %v3454_v45 = vor.u32 %v4088_v43, %v3453_v42  ;;  %v3385_v46 = vld [vmem:[#allocation7 + $0x18c] sm:$0xf] }
  0xfb   :  { %v670_v9 = vshrl.u32 %v644_v1, 16  ;;  %v673_v10 = vshll.u32 %v644_v1, 16  ;;  %694 = vst [vmem:[#allocation2 + $0x28] sm:$0xf] %v644_v1  ;;  %v4031_v13 = vld [vmem:[#allocation2 + $0x10] sm:$0xf0] }
  0xfc   :  { %970 = vmatmul.bf16.vlgmr.msrb.gmra.mxu2 %v3218_v7  ;;  %v3226_v21 = vor.u32 %v4031_v13, %v3225_v8  ;;  %v4071_v47 = vld [vmem:[#allocation7 + $0x1a8] sm:$0xf0]  ;;  %1383 = vmatpush.bf16.msra.mxu3 %v3454_v45  ;;  %v4629_v42 = vld [vmem:[#allocation9 + $0x2] ss:$0 sm:$0xff] }
  0xfd   :  { %v672_v49 = vrot.slane %v670_v9, 7  ;;  %v708_v50 = vrot.slane %v673_v10, 5  ;;  %v710_v2 = vrot.slane %v670_v9, 4  ;;  %v4614_v32 = vpop.f32.mrf.mxu0  ;;  %1366 = vmatpush.bf16.msra.mxu2 %v3414_v40  ;;  %v3386_v48 = vor.u32 %v4071_v47, %v3385_v46  ;;  %v3409_v56 = vld [vmem:[#allocation7 + $0x30c] sm:$0xf] }
  0xfe   :  { %1008 = vmatmul.bf16.vlgmr.msra.gmra.mxu0 %v3226_v21  ;;  %v4077_v57 = vld [vmem:[#allocation7 + $0x328] sm:$0xf0] }
  0xff   :  { %v675_v19 = vor.u32 %v673_v10, %v672_v49  ;;  %v709_v20 = vsel %vm4501_vm8, %v707_v15, %v708_v50  ;;  %v711_v35 = vor.u32 %v710_v2, %v708_v50  ;;  %v4616_v44 = vpop.f32.mrf.mxu3  ;;  %v3410_v58 = vor.u32 %v4077_v57, %v3409_v56  ;;  %v3449_v59 = vld [vmem:[#allocation7 + $0x58c] sm:$0xf]  ;;  %1346 = vmatpush.bf16.msra.mxu1 %v3386_v48 }
 0x100   :  { %722 = vst [vmem:[#allocation2 + $0x20] sm:$0xf] %v709_v20  ;;  %v4087_v63 = vld [vmem:[#allocation7 + $0x5a8] sm:$0xf0] }
 0x101   :  { %v676_v52 = vsel %vm4486_vm6, %v668_v17, %v675_v19  ;;  %v712_v53 = vrot.slane %v711_v35, 4  ;;  %v3229_v23 = vld [vmem:[#allocation2 + $0x18] sm:$0xf]  ;;  %v3450_v1 = vor.u32 %v4087_v63, %v3449_v59  ;;  %1367 = vmatpush.bf16.msra.mxu2 %v3410_v58  ;;  %v3381_v3 = vld [vmem:[#allocation7 + $0x14c] sm:$0xf] }
 0x102   :  { %690 = vst [vmem:[#allocation2 + $0x24] sm:$0xf] %v676_v52  ;;  %v3231_v5 = vld [vmem:[#allocation2 + $0x24] sm:$0xf0]  ;;  %v4070_v4 = vld [vmem:[#allocation7 + $0x168] sm:$0xf0] }
 0x103   :  { %v724_v6 = vsel %vm4592_vm12, %v712_v53, %v723_v51  ;;  %v3234_v22 = vor.u32 %v4032_v54, %v3231_v5  ;;  %1384 = vmatpush.bf16.msra.mxu3 %v3450_v1  ;;  %v3382_v7 = vor.u32 %v4070_v4, %v3381_v3  ;;  %v3405_v8 = vld [vmem:[#allocation7 + $0x2cc] sm:$0xf] }
 0x104   :  { %725 = vst [vmem:[#allocation2 + $0x2c] sm:$0xf] %v724_v6  ;;  %v4076_v9 = vld [vmem:[#allocation7 + $0x2e8] sm:$0xf0] }
 0x105   :  { %994 = vmatmul.bf16.gmra.mxu3 %v3234_v22  ;;  %v4618_v25 = vpop.f32.mrf.mxu0  ;;  %1347 = vmatpush.bf16.msra.mxu1 %v3382_v7  ;;  %v3406_v10 = vor.u32 %v4076_v9, %v3405_v8  ;;  %v3445_v13 = vld [vmem:[#allocation7 + $0x54c] sm:$0xf] }
 0x106   :  { %v4086_v21 = vld [vmem:[#allocation7 + $0x568] sm:$0xf0] }
 0x107   :  { %v3237_v60 = vld [vmem:[#allocation2 + $0x20] sm:$0xf]  ;;  %v3446_v15 = vor.u32 %v4086_v21, %v3445_v13  ;;  %v4620_v49 = vpop.f32.mrf.mxu3  ;;  %1368 = vmatpush.bf16.msra.mxu2 %v3406_v10  ;;  %v3377_v50 = vld [vmem:[#allocation7 + $0x10c] sm:$0xf]  ;;  %v629_v13 = vpop.f32.mrf.mxu1 }
 0x108   :  { %v4069_v2 = vld [vmem:[#allocation7 + $0x128] sm:$0xf0] }
 0x109   :  { %v4033_v24 = vld [vmem:[#allocation2 + $0x20] sm:$0xf0]  ;;  %1385 = vmatpush.bf16.msra.mxu3 %v3446_v15  ;;  %v3378_v17 = vor.u32 %v4069_v2, %v3377_v50  ;;  %v3401_v19 = vld [vmem:[#allocation7 + $0x28c] sm:$0xf] }
 0x10a   :  { %v3230_v55 = vor.u32 %v4033_v24, %v3229_v23  ;;  %v4075_v20 = vld [vmem:[#allocation7 + $0x2a8] sm:$0xf0] }
 0x10b   :  { %v4034_v11 = vld [vmem:[#allocation2 + $0x28] sm:$0xf0]  ;;  %v3402_v51 = vor.u32 %v4075_v20, %v3401_v19  ;;  %v3441_v52 = vld [vmem:[#allocation7 + $0x50c] sm:$0xf]  ;;  %1348 = vmatpush.bf16.msra.mxu1 %v3378_v17 }
 0x10c   :  { %975 = vmatmul.bf16.gmra.mxu2 %v3230_v55  ;;  %v3238_v27 = vor.u32 %v4034_v11, %v3237_v60  ;;  %v4085_v53 = vld [vmem:[#allocation7 + $0x528] sm:$0xf0] }
 0x10d   :  { %v4622_v35 = vpop.f32.mrf.mxu0  ;;  %v3442_v54 = vor.u32 %v4085_v53, %v3441_v52  ;;  %1369 = vmatpush.bf16.msra.mxu2 %v3402_v51  ;;  %v3373_v5 = vld [vmem:[#allocation7 + $0xcc] sm:$0xf] }
 0x10e   :  { %1013 = vmatmul.bf16.gmra.mxu0 %v3238_v27  ;;  %v4068_v6 = vld [vmem:[#allocation7 + $0xe8] sm:$0xf0]  ;;  %v4625_v27 = vperm.slane %v4569_v62, 1 }
 0x10f   :  { %1386 = vmatpush.bf16.msra.mxu3 %v3442_v54  ;;  %v3374_v22 = vor.u32 %v4068_v6, %v3373_v5  ;;  %v3397_v23 = vld [vmem:[#allocation7 + $0x24c] sm:$0xf] }
 0x110   :  { %v4074_v24 = vld [vmem:[#allocation7 + $0x268] sm:$0xf0]  ;;  %v590_v40 = vadd.f32 %v4608_v61, %v4625_v27  ;;  %v592_v10 = vadd.f32 %v4612_v30, %v4625_v27 }
 0x111   :  { %v3398_v55 = vor.u32 %v4074_v24, %v3397_v23  ;;  %v3437_v60 = vld [vmem:[#allocation7 + $0x4cc] sm:$0xf]  ;;  %1349 = vmatpush.bf16.msra.mxu1 %v3374_v22  ;;  %v595_v22 = vadd.f32 %v4616_v44, %v4625_v27  ;;  %v632_v23 = vpop.f32.mrf.mxu1 }
 0x112   :  { %v4084_v11 = vld [vmem:[#allocation7 + $0x4e8] sm:$0xf0]  ;;  %v609_v58 = vadd.f32 %v4610_v12, %v590_v40  ;;  %v611_v19 = vadd.f32 %v4614_v32, %v592_v10 }
 0x113   :  { %v3438_v14 = vor.u32 %v4084_v11, %v3437_v60  ;;  %1370 = vmatpush.bf16.msra.mxu2 %v3398_v55  ;;  %v3369_v29 = vld [vmem:[#allocation7 + $0x8c] sm:$0xf] }
 0x114   :  { %v4067_v31 = vld [vmem:[#allocation7 + $0xa8] sm:$0xf0]  ;;  %v628_v9 = vadd.f32 %v627_v34, %v609_v58  ;;  %v630_v30 = vadd.f32 %v629_v13, %v611_v19  ;;  %v614_v34 = vadd.f32 %v4618_v25, %v595_v22 }
 0x115   :  { %1387 = vmatpush.bf16.msra.mxu3 %v3438_v14  ;;  %v3370_v37 = vor.u32 %v4067_v31, %v3369_v29  ;;  %v3393_v38 = vld [vmem:[#allocation7 + $0x20c] sm:$0xf] }
 0x116   :  { %v4073_v28 = vld [vmem:[#allocation7 + $0x228] sm:$0xf0]  ;;  %v633_v25 = vadd.f32 %v632_v23, %v614_v34 }
 0x117   :  { %v3394_v18 = vor.u32 %v4073_v28, %v3393_v38  ;;  %v3433_v0 = vld [vmem:[#allocation7 + $0x48c] sm:$0xf]  ;;  %1350 = vmatpush.bf16.msra.mxu1 %v3370_v37  ;;  %v1067_v37 = vld [vmem:[#allocation2] sm:$0xf] }
 0x118   :  { %v4083_v39 = vld [vmem:[#allocation7 + $0x4a8] sm:$0xf0] }
 0x119   :  { %v3434_v62 = vor.u32 %v4083_v39, %v3433_v0  ;;  %1371 = vmatpush.bf16.msra.mxu2 %v3394_v18  ;;  %v3365_v45 = vld [vmem:[#allocation7 + $0x4c] sm:$0xf]  ;;  %v597_v0 = vadd.f32 %v4620_v49, %v4625_v27 }
 0x11a   :  { %v4066_v46 = vld [vmem:[#allocation7 + $0x68] sm:$0xf0] }
 0x11b   :  { %1388 = vmatpush.bf16.msra.mxu3 %v3434_v62  ;;  %v3366_v47 = vor.u32 %v4066_v46, %v3365_v45  ;;  %v3429_v56 = vld [vmem:[#allocation7 + $0x44c] sm:$0xf] }
 0x11c   :  { %v4082_v57 = vld [vmem:[#allocation7 + $0x468] sm:$0xf0] }
 0x11d   :  { %1351 = vmatpush.bf16.msra.mxu1 %v3366_v47  ;;  %v3430_v63 = vor.u32 %v4082_v57, %v3429_v56  ;;  %v3361_v61 = vld [vmem:[#allocation7 + $0xc] sm:$0xf]  ;;  %v616_v56 = vadd.f32 %v4622_v35, %v597_v0 }
 0x11e   :  { %v4065_v1 = vld [vmem:[#allocation7 + $0x28] sm:$0xf0] }
 0x11f   :  { %1389 = vmatpush.bf16.msra.mxu3 %v3430_v63  ;;  %v3362_v4 = vor.u32 %v4065_v1, %v3361_v61  ;;  %v3425_v7 = vld [vmem:[#allocation7 + $0x40c] sm:$0xf]  ;;  %v634_v1 = vpop.f32.mrf.mxu1 }
 0x120   :  { %v4081_v8 = vld [vmem:[#allocation7 + $0x428] sm:$0xf0] }
 0x121   :  { %1352 = vmatpush.bf16.msra.mxu1 %v3362_v4  ;;  %v3426_v15 = vor.u32 %v4081_v8, %v3425_v7  ;;  %v1102_v35 = vld [vmem:[#allocation2 + $0x14] sm:$0xf] }
 0x123   :  { %1390 = vmatpush.bf16.msra.mxu3 %v3426_v15 }
 0x127   :  { %2030 = vmatpush.bf16.msrb.mxu3 %v4126_v26 }
 0x178   :  { %v990_v36 = vpop.f32.mrf.mxu3 }
 0x17b   :  { %v1009_v43 = vpop.f32.mrf.mxu0 }
 0x17f   :  { %v971_v48 = vpop.f32.mrf.mxu2 }
 0x180   :  { %v972_v59 = vadd.f32 %v4629_v42, %v971_v48  ;;  %v992_v12 = vpop.f32.mrf.mxu3 }
 0x182   :  { %v991_v3 = vadd.f32 %v990_v36, %v972_v59 }
 0x183   :  { %v1011_v2 = vpop.f32.mrf.mxu0 }
 0x184   :  { %v1010_v21 = vadd.f32 %v1009_v43, %v991_v3 }
 0x186   :  { %v1019_v50 = vadd.f32 %v1010_v21, %v628_v9 }
 0x187   :  { %v973_v17 = vpop.f32.mrf.mxu2 }
 0x188   :  { %v4636_v20 = vmax.f32 %v1019_v50, 0.0  ;;  %v974_v51 = vadd.f32 %v4629_v42, %v973_v17  ;;  %v995_v11 = vpop.f32.mrf.mxu3 }
 0x18a   :  { %v1027_v52 = vpack.c.bf16 %v4636_v20, %v4636_v20  ;;  %v993_v53 = vadd.f32 %v992_v12, %v974_v51  ;;  %v635_v12 = vadd.f32 %v634_v1, %v616_v56  ;;  %v3537_v1 = vld [vmem:[#allocation7 + $0x390] sm:$0xf] }
 0x18b   :  { %v1014_v38 = vpop.f32.mrf.mxu0 }
 0x18c   :  { %v1032_v54 = vshrl.u32 %v1027_v52, 16  ;;  %v1035_v5 = vshll.u32 %v1027_v52, 16  ;;  %1075 = vst [vmem:[#allocation2 + $0x4] sm:$0xf] %v1027_v52  ;;  %v1012_v6 = vadd.f32 %v1011_v2, %v993_v53 }
 0x18e   :  { %v1034_v24 = vrot.slane %v1032_v54, 7  ;;  %v1079_v55 = vrot.slane %v1032_v54, 4  ;;  %v1080_v32 = vrot.slane %v1035_v5, 5  ;;  %v1020_v60 = vadd.f32 %v1012_v6, %v630_v30  ;;  %v1071_v6 = vld [vmem:[#allocation2 + $0x18] sm:$0xf] }
 0x18f   :  { %v976_v14 = vpop.f32.mrf.mxu2 }
 0x190   :  { %v1037_v29 = vor.u32 %v1035_v5, %v1034_v24  ;;  %v4643_v31 = vmax.f32 %v1020_v60, 0.0  ;;  %v977_v28 = vadd.f32 %v4629_v42, %v976_v14  ;;  %v1081_v44 = vor.u32 %v1080_v32, %v1079_v55  ;;  %v997_v4 = vpop.f32.mrf.mxu3 }
 0x191   :  { %v1038_v57 = vrot.slane %v1034_v24, 4 }
 0x192   :  { %v1068_v36 = vsel %vm4580_vm11, %v1037_v29, %v1067_v37  ;;  %v1028_v18 = vpack.c.bf16 %v4643_v31, %v4643_v31  ;;  %v996_v39 = vadd.f32 %v995_v11, %v977_v28  ;;  %v1082_v45 = vrot.slane %v1081_v44, 4 }
 0x193   :  { %1069 = vst [vmem:[#allocation2] sm:$0xf] %v1068_v36  ;;  %v1016_v13 = vpop.f32.mrf.mxu0  ;;  %v4059_v21 = vld [vmem:[#allocation2 + $0x4] sm:$0xf] }
 0x194   :  { %v1040_v40 = vshrl.u32 %v1028_v18, 16  ;;  %v1043_v62 = vshll.u32 %v1028_v18, 16  ;;  %1076 = vst [vmem:[#allocation2 + $0x10] sm:$0xf] %v1028_v18  ;;  %v1015_v43 = vadd.f32 %v1014_v38, %v996_v39 }
 0x196   :  { %v1042_v46 = vrot.slane %v1040_v40, 7  ;;  %v1083_v47 = vrot.slane %v1043_v62, 5  ;;  %v1085_v48 = vrot.slane %v1040_v40, 4  ;;  %v1021_v58 = vadd.f32 %v1015_v43, %v633_v25  ;;  %v1106_v43 = vld [vmem:[#allocation2 + $0x2c] sm:$0xf] }
 0x197   :  { %v978_v59 = vpop.f32.mrf.mxu2 }
 0x198   :  { %v1045_v63 = vor.u32 %v1043_v62, %v1042_v46  ;;  %v1084_v49 = vsel %vm4501_vm8, %v1082_v45, %v1083_v47  ;;  %v1086_v27 = vor.u32 %v1085_v48, %v1083_v47  ;;  %v979_v61 = vadd.f32 %v4629_v42, %v978_v59 }
 0x199   :  { %1101 = vst [vmem:[#allocation2 + $0x8] sm:$0xf] %v1084_v49  ;;  %v4657_v3 = vmax.f32 %v1021_v58, 0.0 }
 0x19a   :  { %v1046_v7 = vsel %vm4486_vm6, %v1038_v57, %v1045_v63  ;;  %v1087_v8 = vrot.slane %v1086_v27, 4  ;;  %v998_v9 = vadd.f32 %v997_v4, %v979_v61  ;;  %v3337_v24 = vld [vmem:[#allocation2] sm:$0xf]  ;;  %v3541_v27 = vld [vmem:[#allocation7 + $0x3d0] sm:$0xf] }
 0x19b   :  { %1070 = vst [vmem:[#allocation2 + $0xc] sm:$0xf] %v1046_v7  ;;  %v1029_v10 = vpack.c.bf16 %v4657_v3, %v4657_v3  ;;  %v3339_v15 = vld [vmem:[#allocation2 + $0xc] sm:$0xf0]  ;;  %v4110_v61 = vld [vmem:[#allocation7 + $0x3ec] sm:$0xf0] }
 0x19c   :  { %v1103_v42 = vsel %vm4592_vm12, %v1087_v8, %v1102_v35  ;;  %v1017_v50 = vadd.f32 %v1016_v13, %v998_v9  ;;  %v3342_v2 = vor.u32 %v4059_v21, %v3339_v15  ;;  %v3542_v4 = vor.u32 %v4110_v61, %v3541_v27  ;;  %v4109_v7 = vld [vmem:[#allocation7 + $0x3ac] sm:$0xf0] }
 0x19d   :  { %1104 = vst [vmem:[#allocation2 + $0x14] sm:$0xf] %v1103_v42  ;;  %v1048_v17 = vshrl.u32 %v1029_v10, 16  ;;  %v1051_v19 = vshll.u32 %v1029_v10, 16  ;;  %v3538_v8 = vor.u32 %v4109_v7, %v3537_v1  ;;  %v3509_v35 = vld [vmem:[#allocation7 + $0x1d0] sm:$0xf] }
 0x19e   :  { %1077 = vst [vmem:[#allocation2 + $0x1c] sm:$0xf] %v1029_v10  ;;  %v1022_v51 = vadd.f32 %v1017_v50, %v635_v12  ;;  %1372 = vmatmul.bf16.vlgmr.msra.gmra.mxu2 %v3342_v2  ;;  %1743 = vmatpush.bf16.msrb.mxu1 %v3542_v4  ;;  %v4102_v9 = vld [vmem:[#allocation7 + $0x1ec] sm:$0xf0]  ;;  %v4677_v4 = vld [vmem:[#allocation9 + $0x3] ss:$0 sm:$0xff] }
 0x19f   :  { %v1050_v52 = vrot.slane %v1048_v17, 7  ;;  %v1088_v53 = vrot.slane %v1048_v17, 4  ;;  %v1089_v30 = vrot.slane %v1051_v19, 5  ;;  %v3510_v10 = vor.u32 %v4102_v9, %v3509_v35  ;;  %v3533_v13 = vld [vmem:[#allocation7 + $0x350] sm:$0xf] }
 0x1a0   :  { %v4665_v54 = vmax.f32 %v1022_v51, 0.0  ;;  %v3345_v11 = vld [vmem:[#allocation2 + $0x8] sm:$0xf]  ;;  %v4108_v21 = vld [vmem:[#allocation7 + $0x36c] sm:$0xf0] }
 0x1a1   :  { %v1053_v5 = vor.u32 %v1051_v19, %v1050_v52  ;;  %v1090_v22 = vor.u32 %v1089_v30, %v1088_v53  ;;  %v1054_v18 = vrot.slane %v1050_v52, 4  ;;  %v3534_v15 = vor.u32 %v4108_v21, %v3533_v13  ;;  %v3573_v12 = vld [vmem:[#allocation7 + $0x5d0] sm:$0xf]  ;;  %1724 = vmatpush.bf16.msrb.mxu0 %v3510_v10 }
 0x1a2   :  { %v1030_v23 = vpack.c.bf16 %v4665_v54, %v4665_v54  ;;  %v4060_v55 = vld [vmem:[#allocation2 + $0x8] sm:$0xf0]  ;;  %1744 = vmatpush.bf16.msrb.mxu1 %v3538_v8  ;;  %v4118_v42 = vld [vmem:[#allocation7 + $0x5ec] sm:$0xf0] }
 0x1a3   :  { %v1072_v32 = vsel %vm4580_vm11, %v1053_v5, %v1071_v6  ;;  %v3338_v60 = vor.u32 %v4060_v55, %v3337_v24  ;;  %v1091_v38 = vrot.slane %v1090_v22, 4  ;;  %v3574_v50 = vor.u32 %v4118_v42, %v3573_v12  ;;  %v3505_v2 = vld [vmem:[#allocation7 + $0x190] sm:$0xf] }
 0x1a4   :  { %1073 = vst [vmem:[#allocation2 + $0x18] sm:$0xf] %v1072_v32  ;;  %v1056_v14 = vshrl.u32 %v1030_v23, 16  ;;  %v1059_v29 = vshll.u32 %v1030_v23, 16  ;;  %v4061_v34 = vld [vmem:[#allocation2 + $0x10] sm:$0xf0] }
 0x1a5   :  { %1078 = vst [vmem:[#allocation2 + $0x28] sm:$0xf] %v1030_v23  ;;  %1353 = vmatmul.bf16.vlgmr.msra.gmra.mxu1 %v3338_v60  ;;  %v3346_v37 = vor.u32 %v4061_v34, %v3345_v11  ;;  %v4062_v46 = vld [vmem:[#allocation2 + $0x1c] sm:$0xf]  ;;  %v4101_v17 = vld [vmem:[#allocation7 + $0x1ac] sm:$0xf0]  ;;  %1762 = vmatpush.bf16.msrb.mxu2 %v3574_v50 }
 0x1a6   :  { %v1058_v28 = vrot.slane %v1056_v14, 7  ;;  %v1092_v36 = vrot.slane %v1059_v29, 5  ;;  %v1094_v44 = vrot.slane %v1056_v14, 4  ;;  %1745 = vmatpush.bf16.msrb.mxu1 %v3534_v15  ;;  %v3506_v19 = vor.u32 %v4101_v17, %v3505_v2  ;;  %v3529_v51 = vld [vmem:[#allocation7 + $0x310] sm:$0xf] }
 0x1a7   :  { %1391 = vmatmul.bf16.vlgmr.msra.gmra.mxu3 %v3346_v37  ;;  %v4107_v52 = vld [vmem:[#allocation7 + $0x32c] sm:$0xf0] }
 0x1a8   :  { %v1061_v0 = vor.u32 %v1059_v29, %v1058_v28  ;;  %v1093_v39 = vsel %vm4501_vm8, %v1091_v38, %v1092_v36  ;;  %v1095_v40 = vor.u32 %v1094_v44, %v1092_v36  ;;  %v3530_v53 = vor.u32 %v4107_v52, %v3529_v51  ;;  %v3569_v30 = vld [vmem:[#allocation7 + $0x590] sm:$0xf]  ;;  %1725 = vmatpush.bf16.msrb.mxu0 %v3506_v19 }
 0x1a9   :  { %1105 = vst [vmem:[#allocation2 + $0x20] sm:$0xf] %v1093_v39  ;;  %v4117_v5 = vld [vmem:[#allocation7 + $0x5ac] sm:$0xf0] }
 0x1aa   :  { %v1062_v62 = vsel %vm4486_vm6, %v1054_v18, %v1061_v0  ;;  %v1096_v25 = vrot.slane %v1095_v40, 4  ;;  %v3570_v6 = vor.u32 %v4117_v5, %v3569_v30  ;;  %1746 = vmatpush.bf16.msrb.mxu1 %v3530_v53  ;;  %v3501_v22 = vld [vmem:[#allocation7 + $0x150] sm:$0xf] }
 0x1ab   :  { %1074 = vst [vmem:[#allocation2 + $0x24] sm:$0xf] %v1062_v62  ;;  %v3349_v56 = vld [vmem:[#allocation2 + $0x18] sm:$0xf] }
 0x1ac   :  { %v1107_v45 = vsel %vm4592_vm12, %v1096_v25, %v1106_v43  ;;  %v3351_v47 = vld [vmem:[#allocation2 + $0x24] sm:$0xf0]  ;;  %v4100_v23 = vld [vmem:[#allocation7 + $0x16c] sm:$0xf0]  ;;  %1763 = vmatpush.bf16.msrb.mxu2 %v3570_v6 }
 0x1ad   :  { %1108 = vst [vmem:[#allocation2 + $0x2c] sm:$0xf] %v1107_v45  ;;  %v3354_v48 = vor.u32 %v4062_v46, %v3351_v47  ;;  %v3502_v24 = vor.u32 %v4100_v23, %v3501_v22  ;;  %v3525_v55 = vld [vmem:[#allocation7 + $0x2d0] sm:$0xf] }
 0x1ae   :  { %v4106_v32 = vld [vmem:[#allocation7 + $0x2ec] sm:$0xf0] }
 0x1af   :  { %1377 = vmatmul.bf16.gmra.mxu2 %v3354_v48  ;;  %v3526_v60 = vor.u32 %v4106_v32, %v3525_v55  ;;  %v3565_v11 = vld [vmem:[#allocation7 + $0x550] sm:$0xf]  ;;  %1726 = vmatpush.bf16.msrb.mxu0 %v3502_v24 }
 0x1b0   :  { %v3357_v59 = vld [vmem:[#allocation2 + $0x20] sm:$0xf]  ;;  %v4116_v14 = vld [vmem:[#allocation7 + $0x56c] sm:$0xf0] }
 0x1b1   :  { %v3566_v29 = vor.u32 %v4116_v14, %v3565_v11  ;;  %1747 = vmatpush.bf16.msrb.mxu1 %v3526_v60  ;;  %v3497_v34 = vld [vmem:[#allocation7 + $0x110] sm:$0xf] }
 0x1b2   :  { %v4063_v57 = vld [vmem:[#allocation2 + $0x20] sm:$0xf0]  ;;  %v4099_v37 = vld [vmem:[#allocation7 + $0x12c] sm:$0xf0] }
 0x1b3   :  { %v3350_v58 = vor.u32 %v4063_v57, %v3349_v56  ;;  %1764 = vmatpush.bf16.msrb.mxu2 %v3566_v29  ;;  %v3498_v38 = vor.u32 %v4099_v37, %v3497_v34  ;;  %v3521_v28 = vld [vmem:[#allocation7 + $0x290] sm:$0xf] }
 0x1b4   :  { %v4064_v63 = vld [vmem:[#allocation2 + $0x28] sm:$0xf0]  ;;  %v4105_v36 = vld [vmem:[#allocation7 + $0x2ac] sm:$0xf0] }
 0x1b5   :  { %1358 = vmatmul.bf16.gmra.mxu1 %v3350_v58  ;;  %v3358_v49 = vor.u32 %v4064_v63, %v3357_v59  ;;  %v3522_v44 = vor.u32 %v4105_v36, %v3521_v28  ;;  %v3561_v18 = vld [vmem:[#allocation7 + $0x510] sm:$0xf]  ;;  %1727 = vmatpush.bf16.msrb.mxu0 %v3498_v38 }
 0x1b6   :  { %v4115_v0 = vld [vmem:[#allocation7 + $0x52c] sm:$0xf0] }
 0x1b7   :  { %1396 = vmatmul.bf16.gmra.mxu3 %v3358_v49  ;;  %v3562_v39 = vor.u32 %v4115_v0, %v3561_v18  ;;  %1748 = vmatpush.bf16.msrb.mxu1 %v3522_v44  ;;  %v3493_v40 = vld [vmem:[#allocation7 + $0xd0] sm:$0xf]  ;;  %v1446_v44 = vld [vmem:[#allocation2] sm:$0xf] }
 0x1b8   :  { %v4098_v62 = vld [vmem:[#allocation7 + $0xec] sm:$0xf0] }
 0x1b9   :  { %1765 = vmatpush.bf16.msrb.mxu2 %v3562_v39  ;;  %v3494_v25 = vor.u32 %v4098_v62, %v3493_v40  ;;  %v3517_v43 = vld [vmem:[#allocation7 + $0x250] sm:$0xf] }
 0x1ba   :  { %v4104_v45 = vld [vmem:[#allocation7 + $0x26c] sm:$0xf0] }
 0x1bb   :  { %v3518_v46 = vor.u32 %v4104_v45, %v3517_v43  ;;  %v3557_v47 = vld [vmem:[#allocation7 + $0x4d0] sm:$0xf]  ;;  %1728 = vmatpush.bf16.msrb.mxu0 %v3494_v25 }
 0x1bc   :  { %v4114_v48 = vld [vmem:[#allocation7 + $0x4ec] sm:$0xf0] }
 0x1bd   :  { %v3558_v56 = vor.u32 %v4114_v48, %v3557_v47  ;;  %1749 = vmatpush.bf16.msrb.mxu1 %v3518_v46  ;;  %v3489_v57 = vld [vmem:[#allocation7 + $0x90] sm:$0xf] }
 0x1be   :  { %v4097_v58 = vld [vmem:[#allocation7 + $0xac] sm:$0xf0] }
 0x1bf   :  { %1766 = vmatpush.bf16.msrb.mxu2 %v3558_v56  ;;  %v3490_v59 = vor.u32 %v4097_v58, %v3489_v57  ;;  %v3513_v63 = vld [vmem:[#allocation7 + $0x210] sm:$0xf] }
 0x1c0   :  { %v4103_v49 = vld [vmem:[#allocation7 + $0x22c] sm:$0xf0] }
 0x1c1   :  { %v3514_v27 = vor.u32 %v4103_v49, %v3513_v63  ;;  %v3553_v61 = vld [vmem:[#allocation7 + $0x490] sm:$0xf]  ;;  %1729 = vmatpush.bf16.msrb.mxu0 %v3490_v59 }
 0x1c2   :  { %v4113_v1 = vld [vmem:[#allocation7 + $0x4ac] sm:$0xf0] }
 0x1c3   :  { %v3554_v7 = vor.u32 %v4113_v1, %v3553_v61  ;;  %1750 = vmatpush.bf16.msrb.mxu1 %v3514_v27  ;;  %v3485_v9 = vld [vmem:[#allocation7 + $0x50] sm:$0xf] }
 0x1c4   :  { %v4096_v10 = vld [vmem:[#allocation7 + $0x6c] sm:$0xf0] }
 0x1c5   :  { %1767 = vmatpush.bf16.msrb.mxu2 %v3554_v7  ;;  %v3486_v13 = vor.u32 %v4096_v10, %v3485_v9  ;;  %v3549_v21 = vld [vmem:[#allocation7 + $0x450] sm:$0xf]  ;;  %v1481_v10 = vld [vmem:[#allocation2 + $0x14] sm:$0xf] }
 0x1c6   :  { %v4112_v15 = vld [vmem:[#allocation7 + $0x46c] sm:$0xf0] }
 0x1c7   :  { %1730 = vmatpush.bf16.msrb.mxu0 %v3486_v13  ;;  %v3550_v42 = vor.u32 %v4112_v15, %v3549_v21  ;;  %v3481_v50 = vld [vmem:[#allocation7 + $0x10] sm:$0xf] }
 0x1c8   :  { %v4095_v2 = vld [vmem:[#allocation7 + $0x2c] sm:$0xf0] }
 0x1c9   :  { %1768 = vmatpush.bf16.msrb.mxu2 %v3550_v42  ;;  %v3482_v17 = vor.u32 %v4095_v2, %v3481_v50  ;;  %v3545_v19 = vld [vmem:[#allocation7 + $0x410] sm:$0xf] }
 0x1ca   :  { %v4111_v51 = vld [vmem:[#allocation7 + $0x42c] sm:$0xf0] }
 0x1cb   :  { %1731 = vmatpush.bf16.msrb.mxu0 %v3482_v17  ;;  %v3546_v53 = vor.u32 %v4111_v51, %v3545_v19 }
 0x1cd   :  { %1769 = vmatpush.bf16.msrb.mxu2 %v3546_v53 }
 0x221   :  { %v1373_v8 = vpop.f32.mrf.mxu2 }
 0x222   :  { %v1354_v35 = vpop.f32.mrf.mxu1 }
 0x223   :  { %v1355_v12 = vadd.f32 %v4677_v4, %v1354_v35 }
 0x225   :  { %v1374_v52 = vadd.f32 %v1373_v8, %v1355_v12 }
 0x229   :  { %v1375_v22 = vpop.f32.mrf.mxu2 }
 0x22a   :  { %v1356_v30 = vpop.f32.mrf.mxu1  ;;  %v1392_v5 = vpop.f32.mrf.mxu3 }
 0x22b   :  { %v1393_v6 = vadd.f32 %v1392_v5, %v1374_v52  ;;  %v1357_v24 = vadd.f32 %v4677_v4, %v1356_v30 }
 0x22d   :  { %v1402_v23 = vmax.f32 %v1393_v6, 0.0  ;;  %v1376_v14 = vadd.f32 %v1375_v22, %v1357_v24  ;;  %v1450_v22 = vld [vmem:[#allocation2 + $0x18] sm:$0xf] }
 0x22f   :  { %v1406_v55 = vpack.c.bf16 %v1402_v23, %v1402_v23 }
 0x231   :  { %v1411_v32 = vshrl.u32 %v1406_v55, 16  ;;  %v1414_v60 = vshll.u32 %v1406_v55, 16  ;;  %1454 = vst [vmem:[#allocation2 + $0x4] sm:$0xf] %v1406_v55 }
 0x232   :  { %v1359_v11 = vpop.f32.mrf.mxu1  ;;  %v1394_v38 = vpop.f32.mrf.mxu3 }
 0x233   :  { %v1413_v29 = vrot.slane %v1411_v32, 7  ;;  %v1458_v34 = vrot.slane %v1411_v32, 4  ;;  %v1459_v37 = vrot.slane %v1414_v60, 5  ;;  %v1395_v28 = vadd.f32 %v1394_v38, %v1376_v14  ;;  %v1378_v18 = vpop.f32.mrf.mxu2 }
 0x234   :  { %v1360_v0 = vadd.f32 %v4677_v4, %v1359_v11 }
 0x235   :  { %v1416_v36 = vor.u32 %v1414_v60, %v1413_v29  ;;  %v1403_v39 = vmax.f32 %v1395_v28, 0.0  ;;  %v1460_v62 = vor.u32 %v1459_v37, %v1458_v34  ;;  %v1417_v49 = vrot.slane %v1413_v29, 4 }
 0x236   :  { %v1379_v47 = vadd.f32 %v1378_v18, %v1360_v0 }
 0x237   :  { %v1447_v40 = vsel %vm4580_vm11, %v1416_v36, %v1446_v44  ;;  %v1407_v25 = vpack.c.bf16 %v1403_v39, %v1403_v39  ;;  %v1461_v48 = vrot.slane %v1460_v62, 4 }
 0x238   :  { %1448 = vst [vmem:[#allocation2] sm:$0xf] %v1447_v40  ;;  %v4089_v12 = vld [vmem:[#allocation2 + $0x4] sm:$0xf] }
 0x239   :  { %v1419_v43 = vshrl.u32 %v1407_v25, 16  ;;  %v1422_v45 = vshll.u32 %v1407_v25, 16  ;;  %1455 = vst [vmem:[#allocation2 + $0x10] sm:$0xf] %v1407_v25 }
 0x23a   :  { %v1361_v46 = vpop.f32.mrf.mxu1  ;;  %v1397_v56 = vpop.f32.mrf.mxu3 }
 0x23b   :  { %v1421_v57 = vrot.slane %v1419_v43, 7  ;;  %v1462_v58 = vrot.slane %v1422_v45, 5  ;;  %v1464_v59 = vrot.slane %v1419_v43, 4  ;;  %v1398_v63 = vadd.f32 %v1397_v56, %v1379_v47  ;;  %v1380_v13 = vpop.f32.mrf.mxu2 }
 0x23c   :  { %v1362_v27 = vadd.f32 %v4677_v4, %v1361_v46 }
 0x23d   :  { %v1424_v61 = vor.u32 %v1422_v45, %v1421_v57  ;;  %v1463_v1 = vsel %vm4501_vm8, %v1461_v48, %v1462_v58  ;;  %v1465_v7 = vor.u32 %v1464_v59, %v1462_v58  ;;  %v1404_v8 = vmax.f32 %v1398_v63, 0.0  ;;  %v1485_v45 = vld [vmem:[#allocation2 + $0x2c] sm:$0xf] }
 0x23e   :  { %1480 = vst [vmem:[#allocation2 + $0x8] sm:$0xf] %v1463_v1  ;;  %v1381_v15 = vadd.f32 %v1380_v13, %v1362_v27  ;;  %v4125_v27 = vld [vmem:[#allocation10 + $0x30] sm:$0xff] }
 0x23f   :  { %v1425_v35 = vsel %vm4486_vm6, %v1417_v49, %v1424_v61  ;;  %v1466_v9 = vrot.slane %v1465_v7, 4  ;;  %v1408_v21 = vpack.c.bf16 %v1404_v8, %v1404_v8  ;;  %v3457_v32 = vld [vmem:[#allocation2] sm:$0xf]  ;;  %v4699_v61 = vld [vmem:[#allocation9 + $0x4] ss:$0 sm:$0xff]  ;;  %2031 = vmatpush.bf16.msrb.mxu3 %v4125_v27  ;;  %v4124_v8 = vld [vmem:[#allocation10 + $0x28] sm:$0xff] }
 0x240   :  { %1449 = vst [vmem:[#allocation2 + $0xc] sm:$0xf] %v1425_v35  ;;  %v3459_v42 = vld [vmem:[#allocation2 + $0xc] sm:$0xf0] }
 0x241   :  { %v1482_v4 = vsel %vm4592_vm12, %v1466_v9, %v1481_v10  ;;  %v1427_v50 = vshrl.u32 %v1408_v21, 16  ;;  %v1430_v2 = vshll.u32 %v1408_v21, 16  ;;  %1456 = vst [vmem:[#allocation2 + $0x1c] sm:$0xf] %v1408_v21  ;;  %v3462_v17 = vor.u32 %v4089_v12, %v3459_v42  ;;  %v4123_v9 = vld [vmem:[#allocation10 + $0x20] sm:$0xff]  ;;  %v4122_v12 = vld [vmem:[#allocation10 + $0x18] sm:$0xff] }
 0x242   :  { %1483 = vst [vmem:[#allocation2 + $0x14] sm:$0xf] %v1482_v4  ;;  %v1399_v19 = vpop.f32.mrf.mxu3 }
 0x243   :  { %v1429_v51 = vrot.slane %v1427_v50, 7  ;;  %v1467_v52 = vrot.slane %v1427_v50, 4  ;;  %v1468_v53 = vrot.slane %v1430_v2, 5  ;;  %v1400_v30 = vadd.f32 %v1399_v19, %v1381_v15  ;;  %1751 = vmatmul.bf16.vlgmr.msrb.gmra.mxu1 %v3462_v17  ;;  %2032 = vmatpush.bf16.msrb.mxu3 %v4124_v8  ;;  %v4121_v17 = vld [vmem:[#allocation10 + $0x10] sm:$0xff] }
 0x245   :  { %v1432_v5 = vor.u32 %v1430_v2, %v1429_v51  ;;  %v1405_v6 = vmax.f32 %v1400_v30, 0.0  ;;  %v1469_v24 = vor.u32 %v1468_v53, %v1467_v52  ;;  %v3465_v14 = vld [vmem:[#allocation2 + $0x8] sm:$0xf]  ;;  %v1433_v0 = vrot.slane %v1429_v51, 4 }
 0x247   :  { %v1451_v23 = vsel %vm4580_vm11, %v1432_v5, %v1450_v22  ;;  %v1409_v55 = vpack.c.bf16 %v1405_v6, %v1405_v6  ;;  %v4090_v60 = vld [vmem:[#allocation2 + $0x8] sm:$0xf0]  ;;  %v1470_v28 = vrot.slane %v1469_v24, 4  ;;  %2033 = vmatpush.bf16.msrb.mxu3 %v4123_v9  ;;  %v4120_v22 = vld [vmem:[#allocation10 + $0x8] sm:$0xff] }
 0x248   :  { %1452 = vst [vmem:[#allocation2 + $0x18] sm:$0xf] %v1451_v23  ;;  %v3458_v11 = vor.u32 %v4090_v60, %v3457_v32  ;;  %v4092_v46 = vld [vmem:[#allocation2 + $0x1c] sm:$0xf] }
 0x249   :  { %v1435_v29 = vshrl.u32 %v1409_v55, 16  ;;  %v1438_v34 = vshll.u32 %v1409_v55, 16  ;;  %1457 = vst [vmem:[#allocation2 + $0x28] sm:$0xf] %v1409_v55  ;;  %v4091_v37 = vld [vmem:[#allocation2 + $0x10] sm:$0xf0] }
 0x24a   :  { %1732 = vmatmul.bf16.vlgmr.msrb.gmra.mxu0 %v3458_v11  ;;  %v3466_v38 = vor.u32 %v4091_v37, %v3465_v14 }
 0x24b   :  { %v1437_v36 = vrot.slane %v1435_v29, 7  ;;  %v1471_v44 = vrot.slane %v1438_v34, 5  ;;  %v1473_v18 = vrot.slane %v1435_v29, 4  ;;  %2034 = vmatpush.bf16.msrb.mxu3 %v4122_v12  ;;  %v4119_v29 = vld [vmem:[#allocation10] sm:$0xff] }
 0x24c   :  { %1770 = vmatmul.bf16.vlgmr.msrb.gmra.mxu2 %v3466_v38 }
 0x24d   :  { %v1440_v39 = vor.u32 %v1438_v34, %v1437_v36  ;;  %v1472_v40 = vsel %vm4501_vm8, %v1470_v28, %v1471_v44  ;;  %v1474_v62 = vor.u32 %v1473_v18, %v1471_v44 }
 0x24e   :  { %1484 = vst [vmem:[#allocation2 + $0x20] sm:$0xf] %v1472_v40 }
 0x24f   :  { %v1441_v25 = vsel %vm4486_vm6, %v1433_v0, %v1440_v39  ;;  %v1475_v43 = vrot.slane %v1474_v62, 4  ;;  %v3469_v57 = vld [vmem:[#allocation2 + $0x18] sm:$0xf]  ;;  %2035 = vmatpush.bf16.msrb.mxu3 %v4121_v17  ;;  %vm2072_vm6 = vcmask 519168  }
 0x250   :  { %1453 = vst [vmem:[#allocation2 + $0x24] sm:$0xf] %v1441_v25  ;;  %v3471_v47 = vld [vmem:[#allocation2 + $0x24] sm:$0xf0]  ;;  %vm4736_vm7 = vmand %vm2072_vm6, %vm140_vm3 }
 0x251   :  { %v1486_v48 = vsel %vm4592_vm12, %v1475_v43, %v1485_v45  ;;  %v3474_v56 = vor.u32 %v4092_v46, %v3471_v47  ;;  %vm4742_vm8 = vmand %vm2072_vm6, %vm155_vm4 }
 0x252   :  { %1487 = vst [vmem:[#allocation2 + $0x2c] sm:$0xf] %v1486_v48 }
 0x253   :  { %1756 = vmatmul.bf16.gmra.mxu1 %v3474_v56  ;;  %2036 = vmatpush.bf16.msrb.mxu3 %v4120_v22 }
 0x255   :  { %v3477_v59 = vld [vmem:[#allocation2 + $0x20] sm:$0xf] }
 0x257   :  { %v4093_v58 = vld [vmem:[#allocation2 + $0x20] sm:$0xf0]  ;;  %2037 = vmatpush.bf16.msrb.mxu3 %v4119_v29 }
 0x258   :  { %v3470_v41 = vor.u32 %v4093_v58, %v3469_v57 }
 0x259   :  { %v4094_v63 = vld [vmem:[#allocation2 + $0x28] sm:$0xf0] }
 0x25a   :  { %1737 = vmatmul.bf16.gmra.mxu0 %v3470_v41  ;;  %v3478_v49 = vor.u32 %v4094_v63, %v3477_v59 }
 0x25c   :  { %1775 = vmatmul.bf16.gmra.mxu2 %v3478_v49 }
 0x2c0   :  { %v1752_v1 = vpop.f32.mrf.mxu1 }
 0x2c7   :  { %v1733_v7 = vpop.f32.mrf.mxu0 }
 0x2c8   :  { %v1734_v35 = vadd.f32 %v4699_v61, %v1733_v7  ;;  %v1754_v42 = vpop.f32.mrf.mxu1 }
 0x2ca   :  { %v1753_v10 = vadd.f32 %v1752_v1, %v1734_v35 }
 0x2cf   :  { %v1735_v13 = vpop.f32.mrf.mxu0  ;;  %v1771_v21 = vpop.f32.mrf.mxu2 }
 0x2d0   :  { %v1772_v15 = vadd.f32 %v1771_v21, %v1753_v10  ;;  %v1736_v50 = vadd.f32 %v4699_v61, %v1735_v13  ;;  %v1757_v34 = vpop.f32.mrf.mxu1 }
 0x2d2   :  { %v1781_v4 = vadd.f32 %v1772_v15, %v4636_v20  ;;  %v1755_v5 = vadd.f32 %v1754_v42, %v1736_v50 }
 0x2d4   :  { %v1785_v2 = vmax.f32 %v1781_v4, 0.0 }
 0x2d6   :  { %v1793_v19 = vrot.slane %v1785_v2, 2  ;;  %v1794_v51 = vrot.slane %v1785_v2, 4  ;;  %v1795_v52 = vrot.slane %v1785_v2, 6  ;;  %v3575_v53 = vrot.slane %v1785_v2, 9 }
 0x2d7   :  { %v1738_v30 = vpop.f32.mrf.mxu0  ;;  %v1773_v6 = vpop.f32.mrf.mxu2 }
 0x2d8   :  { %v3576_v23 = vrot.slane %v1793_v19, 9  ;;  %v3577_v24 = vrot.slane %v1794_v51, 9  ;;  %v3578_v55 = vrot.slane %v1795_v52, 9  ;;  %v1774_v32 = vadd.f32 %v1773_v6, %v1755_v5  ;;  %v1759_v35 = vpop.f32.mrf.mxu1 }
 0x2d9   :  { %v1865_v60 = vmax.f32 %v1785_v2, %v3575_v53  ;;  %v1739_v14 = vadd.f32 %v4699_v61, %v1738_v30 }
 0x2da   :  { %v1866_v20 = vmax.f32 %v1793_v19, %v3576_v23  ;;  %v1867_v11 = vmax.f32 %v1794_v51, %v3577_v24  ;;  %v1782_v37 = vadd.f32 %v1774_v32, %v4643_v31  ;;  %v1868_v44 = vmax.f32 %v1795_v52, %v3578_v55 }
 0x2db   :  { %v1881_v18 = vpack.c.bf16 %v1865_v60, %v1865_v60  ;;  %v1758_v39 = vadd.f32 %v1757_v34, %v1739_v14 }
 0x2dc   :  { %v1882_v38 = vpack.c.bf16 %v1866_v20, %v1866_v20  ;;  %v1883_v28 = vpack.c.bf16 %v1867_v11, %v1867_v11  ;;  %v1786_v36 = vmax.f32 %v1782_v37, 0.0  ;;  %v1884_v41 = vpack.c.bf16 %v1868_v44, %v1868_v44 }
 0x2dd   :  { %v1929_v49 = vunpack.c.l.b16 %v1881_v18 }
 0x2de   :  { %v1930_v0 = vunpack.c.l.b16 %v1882_v38  ;;  %v1796_v40 = vrot.slane %v1786_v36, 2  ;;  %v1797_v62 = vrot.slane %v1786_v36, 4  ;;  %v1798_v25 = vrot.slane %v1786_v36, 6 }
 0x2df   :  { %v3579_v43 = vrot.slane %v1786_v36, 9  ;;  %v1740_v45 = vpop.f32.mrf.mxu0  ;;  %v1776_v46 = vpop.f32.mrf.mxu2  ;;  %v1931_v47 = vunpack.c.l.b16 %v1883_v28  ;;  %v1932_v13 = vunpack.c.l.b16 %v1884_v41 }
 0x2e0   :  { %v1945_v48 = vrot.slane %v1930_v0, 7  ;;  %v3580_v56 = vrot.slane %v1796_v40, 9  ;;  %v3581_v57 = vrot.slane %v1797_v62, 9  ;;  %v1777_v31 = vadd.f32 %v1776_v46, %v1758_v39 }
 0x2e1   :  { %v1869_v58 = vmax.f32 %v1786_v36, %v3579_v43  ;;  %v1741_v59 = vadd.f32 %v4699_v61, %v1740_v45  ;;  %v3582_v63 = vrot.slane %v1798_v25, 9  ;;  %v1948_v1 = vrot.slane %v1931_v47, 6 }
 0x2e2   :  { %v1783_v27 = vadd.f32 %v1777_v31, %v4657_v3  ;;  %v1870_v7 = vmax.f32 %v1796_v40, %v3580_v56  ;;  %v1947_v8 = vsel %vm1946_vm13, %v1945_v48, %v1929_v49  ;;  %v1871_v10 = vmax.f32 %v1797_v62, %v3581_v57 }
 0x2e3   :  { %v1885_v26 = vpack.c.bf16 %v1869_v58, %v1869_v58  ;;  %v1760_v21 = vadd.f32 %v1759_v35, %v1741_v59  ;;  %v1872_v15 = vmax.f32 %v1798_v25, %v3582_v63  ;;  %v1950_v19 = vsel %vm1949_vm14, %v1948_v1, %v1947_v8 }
 0x2e4   :  { %v1787_v9 = vmax.f32 %v1783_v27, 0.0  ;;  %v1886_v2 = vpack.c.bf16 %v1870_v7, %v1870_v7  ;;  %v1887_v30 = vpack.c.bf16 %v1871_v10, %v1871_v10  ;;  %v1951_v5 = vrot.slane %v1932_v13, 5 }
 0x2e5   :  { %v1933_v12 = vunpack.c.l.b16 %v1885_v26  ;;  %v1888_v20 = vpack.c.bf16 %v1872_v15, %v1872_v15 }
 0x2e6   :  { %v1799_v61 = vrot.slane %v1787_v9, 2  ;;  %v1800_v42 = vrot.slane %v1787_v9, 4  ;;  %v1801_v4 = vrot.slane %v1787_v9, 6  ;;  %v3583_v3 = vrot.slane %v1787_v9, 9 }
 0x2e7   :  { %v1778_v50 = vpop.f32.mrf.mxu2  ;;  %v1954_v23 = vrot.slane %v1933_v12, 4  ;;  %v1934_v11 = vunpack.c.l.b16 %v1886_v2  ;;  %v1953_v14 = vsel %vm1952_vm15, %v1951_v5, %v1950_v19  ;;  %v1935_v38 = vunpack.c.l.b16 %v1887_v30  ;;  %v3757_v5 = vld [vmem:[#allocation7 + $0x3d4] sm:$0xf] }
 0x2e8   :  { %v1779_v17 = vadd.f32 %v1778_v50, %v1760_v21  ;;  %v3584_v51 = vrot.slane %v1799_v61, 9  ;;  %v3585_v52 = vrot.slane %v1800_v42, 9  ;;  %v3586_v53 = vrot.slane %v1801_v4, 9 }
 0x2e9   :  { %v1873_v6 = vmax.f32 %v1787_v9, %v3583_v3  ;;  %v1956_v40 = vsel %vm1955_vm0, %v1954_v23, %v1953_v14  ;;  %v1957_v45 = vrot.slane %v1934_v11, 3  ;;  %v1936_v1 = vunpack.c.l.b16 %v1888_v20  ;;  %v3685_v20 = vld [vmem:[#allocation7 + $0x194] sm:$0xf] }
 0x2ea   :  { %v1784_v22 = vadd.f32 %v1779_v17, %v4665_v54  ;;  %v1874_v24 = vmax.f32 %v1799_v61, %v3584_v51  ;;  %v1875_v55 = vmax.f32 %v1800_v42, %v3585_v52  ;;  %v1876_v32 = vmax.f32 %v1801_v4, %v3586_v53  ;;  %v4143_v14 = vld [vmem:[#allocation7 + $0x1b0] sm:$0xf0] }
 0x2eb   :  { %v1889_v29 = vpack.c.bf16 %v1873_v6, %v1873_v6  ;;  %v1959_v8 = vsel %vm1958_vm1, %v1957_v45, %v1956_v40  ;;  %v1960_v35 = vrot.slane %v1935_v38, 2  ;;  %v1963_v3 = vrot.slane %v1936_v1, 1  ;;  %v4161_v6 = vld [vmem:[#allocation7 + $0x3f0] sm:$0xf0] }
 0x2ec   :  { %v1788_v60 = vmax.f32 %v1784_v22, 0.0  ;;  %v1890_v34 = vpack.c.bf16 %v1874_v24, %v1874_v24  ;;  %v1891_v37 = vpack.c.bf16 %v1875_v55, %v1875_v55  ;;  %v1892_v28 = vpack.c.bf16 %v1876_v32, %v1876_v32  ;;  %v3749_v22 = vld [vmem:[#allocation7 + $0x394] sm:$0xf] }
 0x2ed   :  { %v1937_v46 = vunpack.c.l.b16 %v1889_v29  ;;  %v1962_v50 = vsel %vm1961_vm2, %v1960_v35, %v1959_v8  ;;  %v3758_v23 = vor.u32 %v4161_v6, %v3757_v5  ;;  %v4159_v24 = vld [vmem:[#allocation7 + $0x3b0] sm:$0xf0] }
 0x2ee   :  { %v1802_v36 = vrot.slane %v1788_v60, 2  ;;  %v1803_v44 = vrot.slane %v1788_v60, 4  ;;  %v1804_v18 = vrot.slane %v1788_v60, 6  ;;  %v1938_v0 = vunpack.c.l.b16 %v1890_v34  ;;  %v3693_v55 = vld [vmem:[#allocation7 + $0x1d4] sm:$0xf] }
 0x2ef   :  { %v1939_v54 = vunpack.c.l.b16 %v1891_v37  ;;  %v3587_v39 = vrot.slane %v1788_v60, 9  ;;  %v1940_v57 = vunpack.c.l.b16 %v1892_v28  ;;  %v1965_v52 = vsel %vm1964_vm5, %v1963_v3, %v1962_v50  ;;  %v4145_v32 = vld [vmem:[#allocation7 + $0x1f0] sm:$0xf0]  ;;  %2428 = vmatpush.bf16.msra.mxu1 %v3758_v23 }
 0x2f0   :  { %v3588_v62 = vrot.slane %v1802_v36, 9  ;;  %v3589_v25 = vrot.slane %v1803_v44, 9  ;;  %v3590_v43 = vrot.slane %v1804_v18, 9  ;;  %v1966_v47 = vrot.slane %v1938_v0, 7  ;;  %v3741_v29 = vld [vmem:[#allocation7 + $0x354] sm:$0xf] }
 0x2f1   :  { %v1968_v48 = vrot.slane %v1939_v54, 6  ;;  %v1877_v56 = vmax.f32 %v1788_v60, %v3587_v39  ;;  %v1970_v10 = vrot.slane %v1940_v57, 5  ;;  %v3694_v60 = vor.u32 %v4145_v32, %v3693_v55  ;;  %v4157_v34 = vld [vmem:[#allocation7 + $0x370] sm:$0xf0] }
 0x2f2   :  { %v1878_v58 = vmax.f32 %v1802_v36, %v3588_v62  ;;  %v1879_v31 = vmax.f32 %v1803_v44, %v3589_v25  ;;  %v1880_v41 = vmax.f32 %v1804_v18, %v3590_v43  ;;  %v1967_v59 = vsel %vm1946_vm13, %v1966_v47, %v1937_v46  ;;  %v3677_v38 = vld [vmem:[#allocation7 + $0x154] sm:$0xf]  ;;  %v4144_v36 = vld [vmem:[#allocation7 + $0x1d8] sm:$0xf] }
 0x2f3   :  { %v1893_v63 = vpack.c.bf16 %v1877_v56, %v1877_v56  ;;  %v1969_v9 = vsel %vm1949_vm14, %v1968_v48, %v1967_v59  ;;  %v3750_v11 = vor.u32 %v4159_v24, %v3749_v22  ;;  %2414 = vmatpush.bf16.msra.mxu0 %v3694_v60  ;;  %v3686_v37 = vor.u32 %v4143_v14, %v3685_v20  ;;  %v4141_v28 = vld [vmem:[#allocation7 + $0x170] sm:$0xf0]  ;;  %v3695_v18 = vld [vmem:[#allocation7 + $0x1f4] sm:$0xf0] }
 0x2f4   :  { %v1894_v49 = vpack.c.bf16 %v1878_v58, %v1878_v58  ;;  %v1895_v26 = vpack.c.bf16 %v1879_v31, %v1879_v31  ;;  %v1896_v27 = vpack.c.bf16 %v1880_v41, %v1880_v41  ;;  %v1971_v61 = vsel %vm1952_vm15, %v1970_v10, %v1969_v9  ;;  %v3821_v0 = vld [vmem:[#allocation7 + $0x5d4] sm:$0xf]  ;;  %v4142_v47 = vld [vmem:[#allocation7 + $0x198] sm:$0xf] }
 0x2f5   :  { %v1941_v7 = vunpack.c.l.b16 %v1893_v63  ;;  %2429 = vmatpush.bf16.msra.mxu1 %v3750_v11  ;;  %v3742_v44 = vor.u32 %v4157_v34, %v3741_v29  ;;  %v4177_v54 = vld [vmem:[#allocation7 + $0x5f0] sm:$0xf0]  ;;  %v3678_v62 = vor.u32 %v4141_v28, %v3677_v38  ;;  %v3698_v43 = vor.u32 %v4144_v36, %v3695_v18  ;;  %v3687_v48 = vld [vmem:[#allocation7 + $0x1b4] sm:$0xf0] }
 0x2f6   :  { %v1942_v13 = vunpack.c.l.b16 %v1894_v49  ;;  %v1943_v21 = vunpack.c.l.b16 %v1895_v26  ;;  %v1944_v15 = vunpack.c.l.b16 %v1896_v27  ;;  %v3733_v39 = vld [vmem:[#allocation7 + $0x314] sm:$0xf]  ;;  %v3822_v45 = vor.u32 %v4177_v54, %v3821_v0  ;;  %v4138_v60 = vld [vmem:[#allocation7 + $0x118] sm:$0xf] }
 0x2f7   :  { %v1972_v12 = vrot.slane %v1941_v7, 4  ;;  %2415 = vmatpush.bf16.msra.mxu0 %v3686_v37  ;;  %v4155_v40 = vld [vmem:[#allocation7 + $0x330] sm:$0xf0]  ;;  %2456 = vmatpush.bf16.msra.mxu3 %v3698_v43  ;;  %v3690_v56 = vor.u32 %v4142_v47, %v3687_v48  ;;  %v3671_v20 = vld [vmem:[#allocation7 + $0x134] sm:$0xf0] }
 0x2f8   :  { %v1974_v42 = vrot.slane %v1942_v13, 3  ;;  %v1976_v4 = vrot.slane %v1943_v21, 2  ;;  %v1978_v19 = vrot.slane %v1944_v15, 1  ;;  %v3669_v25 = vld [vmem:[#allocation7 + $0x114] sm:$0xf]  ;;  %2442 = vmatpush.bf16.msra.mxu2 %v3822_v45  ;;  %v3734_v31 = vor.u32 %v4155_v40, %v3733_v39 }
 0x2f9   :  { %v1973_v2 = vsel %vm1955_vm0, %v1972_v12, %v1971_v61  ;;  %v4139_v46 = vld [vmem:[#allocation7 + $0x130] sm:$0xf0]  ;;  %2430 = vmatpush.bf16.msra.mxu1 %v3742_v44  ;;  %v3674_v11 = vor.u32 %v4138_v60, %v3671_v20  ;;  %v4174_v14 = vld [vmem:[#allocation7 + $0x598] sm:$0xf] }
 0x2fa   :  { %v1975_v17 = vsel %vm1958_vm1, %v1974_v42, %v1973_v2  ;;  %v3813_v57 = vld [vmem:[#allocation7 + $0x594] sm:$0xf]  ;;  %v3670_v49 = vor.u32 %v4139_v46, %v3669_v25  ;;  %v3815_v29 = vld [vmem:[#allocation7 + $0x5b4] sm:$0xf0] }
 0x2fb   :  { %v1977_v51 = vsel %vm1961_vm2, %v1976_v4, %v1975_v17  ;;  %v4175_v58 = vld [vmem:[#allocation7 + $0x5b0] sm:$0xf0]  ;;  %2416 = vmatpush.bf16.msra.mxu0 %v3678_v62  ;;  %2457 = vmatpush.bf16.msra.mxu3 %v3690_v56  ;;  %v4140_v17 = vld [vmem:[#allocation7 + $0x158] sm:$0xf]  ;;  %v3818_v38 = vor.u32 %v4174_v14, %v3815_v29 }
 0x2fc   :  { %v1979_v53 = vsel %vm1964_vm5, %v1978_v19, %v1977_v51  ;;  %v3814_v41 = vor.u32 %v4175_v58, %v3813_v57  ;;  %v3725_v59 = vld [vmem:[#allocation7 + $0x2d4] sm:$0xf]  ;;  %v3679_v51 = vld [vmem:[#allocation7 + $0x174] sm:$0xf0] }
 0x2fd   :  { %v1980_v30 = vpack.c.b16 %v1979_v53, %v1965_v52  ;;  %v4153_v63 = vld [vmem:[#allocation7 + $0x2f0] sm:$0xf0]  ;;  %2431 = vmatpush.bf16.msra.mxu1 %v3734_v31  ;;  %v4176_v52 = vld [vmem:[#allocation7 + $0x5d8] sm:$0xf] }
 0x2fe   :  { %v3661_v26 = vld [vmem:[#allocation7 + $0xd4] sm:$0xf]  ;;  %2443 = vmatpush.bf16.msra.mxu2 %v3814_v41  ;;  %v3726_v1 = vor.u32 %v4153_v63, %v3725_v59  ;;  %v3823_v53 = vld [vmem:[#allocation7 + $0x5f4] sm:$0xf0] }
 0x2ff   :  { %2038 = vmatmul.bf16.vlgmr.msrb.gmra.mxu3 %v1980_v30  ;;  %v4137_v27 = vld [vmem:[#allocation7 + $0xf0] sm:$0xf0]  ;;  %2417 = vmatpush.bf16.msra.mxu0 %v3670_v49  ;;  %v3682_v30 = vor.u32 %v4140_v17, %v3679_v51  ;;  %v3826_v22 = vor.u32 %v4176_v52, %v3823_v53  ;;  %v4136_v0 = vld [vmem:[#allocation7 + $0xd8] sm:$0xf] }
 0x300   :  { %v3717_v7 = vld [vmem:[#allocation7 + $0x294] sm:$0xf]  ;;  %v3662_v35 = vor.u32 %v4137_v27, %v3661_v26  ;;  %v3663_v54 = vld [vmem:[#allocation7 + $0xf4] sm:$0xf0] }
 0x301   :  { %v4151_v8 = vld [vmem:[#allocation7 + $0x2b0] sm:$0xf0]  ;;  %2432 = vmatpush.bf16.msra.mxu1 %v3726_v1  ;;  %2458 = vmatpush.bf16.msra.mxu3 %v3682_v30  ;;  %v4160_v39 = vld [vmem:[#allocation7 + $0x3d8] sm:$0xf]  ;;  %v3666_v40 = vor.u32 %v4136_v0, %v3663_v54 }
 0x302   :  { %v3653_v9 = vld [vmem:[#allocation7 + $0x94] sm:$0xf]  ;;  %v3718_v13 = vor.u32 %v4151_v8, %v3717_v7  ;;  %v3759_v62 = vld [vmem:[#allocation7 + $0x3f4] sm:$0xf0] }
 0x303   :  { %v4135_v10 = vld [vmem:[#allocation7 + $0xb0] sm:$0xf0]  ;;  %2418 = vmatpush.bf16.msra.mxu0 %v3662_v35  ;;  %v4172_v25 = vld [vmem:[#allocation7 + $0x558] sm:$0xf]  ;;  %v3762_v45 = vor.u32 %v4160_v39, %v3759_v62 }
 0x304   :  { %v3709_v21 = vld [vmem:[#allocation7 + $0x254] sm:$0xf]  ;;  %v3654_v12 = vor.u32 %v4135_v10, %v3653_v9  ;;  %v3807_v43 = vld [vmem:[#allocation7 + $0x574] sm:$0xf0] }
 0x305   :  { %v4149_v15 = vld [vmem:[#allocation7 + $0x270] sm:$0xf0]  ;;  %2433 = vmatpush.bf16.msra.mxu1 %v3718_v13  ;;  %2459 = vmatpush.bf16.msra.mxu3 %v3674_v11  ;;  %v3810_v48 = vor.u32 %v4172_v25, %v3807_v43  ;;  %v4134_v57 = vld [vmem:[#allocation7 + $0x98] sm:$0xf] }
 0x306   :  { %v3710_v42 = vor.u32 %v4149_v15, %v3709_v21  ;;  %v3701_v2 = vld [vmem:[#allocation7 + $0x214] sm:$0xf]  ;;  %v3655_v58 = vld [vmem:[#allocation7 + $0xb4] sm:$0xf0] }
 0x307   :  { %2419 = vmatpush.bf16.msra.mxu0 %v3654_v12  ;;  %v4147_v3 = vld [vmem:[#allocation7 + $0x230] sm:$0xf0]  ;;  %v4158_v31 = vld [vmem:[#allocation7 + $0x398] sm:$0xf]  ;;  %v3658_v41 = vor.u32 %v4134_v57, %v3655_v58 }
 0x308   :  { %v3702_v19 = vor.u32 %v4147_v3, %v3701_v2  ;;  %v3805_v5 = vld [vmem:[#allocation7 + $0x554] sm:$0xf]  ;;  %v3751_v59 = vld [vmem:[#allocation7 + $0x3b4] sm:$0xf0] }
 0x309   :  { %2434 = vmatpush.bf16.msra.mxu1 %v3710_v42  ;;  %v4173_v6 = vld [vmem:[#allocation7 + $0x570] sm:$0xf0]  ;;  %2460 = vmatpush.bf16.msra.mxu3 %v3666_v40  ;;  %v4170_v63 = vld [vmem:[#allocation7 + $0x518] sm:$0xf]  ;;  %v3754_v26 = vor.u32 %v4158_v31, %v3751_v59 }
 0x30a   :  { %v3806_v23 = vor.u32 %v4173_v6, %v3805_v5  ;;  %v3645_v24 = vld [vmem:[#allocation7 + $0x54] sm:$0xf]  ;;  %v3799_v49 = vld [vmem:[#allocation7 + $0x534] sm:$0xf0] }
 0x30b   :  { %v4133_v55 = vld [vmem:[#allocation7 + $0x70] sm:$0xf0]  ;;  %v3802_v7 = vor.u32 %v4170_v63, %v3799_v49  ;;  %v4132_v35 = vld [vmem:[#allocation7 + $0x58] sm:$0xf] }
 0x30c   :  { %v3646_v32 = vor.u32 %v4133_v55, %v3645_v24  ;;  %2444 = vmatpush.bf16.msra.mxu2 %v3806_v23  ;;  %v3797_v34 = vld [vmem:[#allocation7 + $0x514] sm:$0xf]  ;;  %v3647_v9 = vld [vmem:[#allocation7 + $0x74] sm:$0xf0] }
 0x30d   :  { %2435 = vmatpush.bf16.msra.mxu1 %v3702_v19  ;;  %v4171_v37 = vld [vmem:[#allocation7 + $0x530] sm:$0xf0]  ;;  %2461 = vmatpush.bf16.msra.mxu3 %v3658_v41  ;;  %v4156_v10 = vld [vmem:[#allocation7 + $0x358] sm:$0xf]  ;;  %v3650_v13 = vor.u32 %v4132_v35, %v3647_v9 }
 0x30e   :  { %2420 = vmatpush.bf16.msra.mxu0 %v3646_v32  ;;  %v3798_v28 = vor.u32 %v4171_v37, %v3797_v34  ;;  %v3637_v36 = vld [vmem:[#allocation7 + $0x14] sm:$0xf]  ;;  %v3743_v21 = vld [vmem:[#allocation7 + $0x374] sm:$0xf0] }
 0x30f   :  { %v4131_v44 = vld [vmem:[#allocation7 + $0x30] sm:$0xf0]  ;;  %v3746_v42 = vor.u32 %v4156_v10, %v3743_v21  ;;  %v4168_v2 = vld [vmem:[#allocation7 + $0x4d8] sm:$0xf]  ;;  %v2097_v21 = vld [vmem:[#allocation3 + $0x14] sm:$0xf] }
 0x310   :  { %v3638_v18 = vor.u32 %v4131_v44, %v3637_v36  ;;  %2445 = vmatpush.bf16.msra.mxu2 %v3798_v28  ;;  %v3789_v46 = vld [vmem:[#allocation7 + $0x4d4] sm:$0xf]  ;;  %v3791_v3 = vld [vmem:[#allocation7 + $0x4f4] sm:$0xf0] }
 0x311   :  { %2484 = vmatpush.bf16.msrb.mxu1 %v3826_v22  ;;  %v4169_v47 = vld [vmem:[#allocation7 + $0x4f0] sm:$0xf0]  ;;  %v4130_v17 = vld [vmem:[#allocation7 + $0x18] sm:$0xf]  ;;  %v3794_v19 = vor.u32 %v4168_v2, %v3791_v3  ;;  %2462 = vmatpush.bf16.msra.mxu3 %v3650_v13  ;;  %v4184_v13 = vld [vmem:[#allocation7 + $0xf8] sm:$0xf0] }
 0x312   :  { %2421 = vmatpush.bf16.msra.mxu0 %v3638_v18  ;;  %v3790_v56 = vor.u32 %v4169_v47, %v3789_v46  ;;  %v3781_v27 = vld [vmem:[#allocation7 + $0x494] sm:$0xf]  ;;  %v3639_v51 = vld [vmem:[#allocation7 + $0x34] sm:$0xf0] }
 0x313   :  { %v4167_v1 = vld [vmem:[#allocation7 + $0x4b0] sm:$0xf0]  ;;  %v4154_v52 = vld [vmem:[#allocation7 + $0x318] sm:$0xf]  ;;  %v3642_v30 = vor.u32 %v4130_v17, %v3639_v51 }
 0x314   :  { %2446 = vmatpush.bf16.msra.mxu2 %v3790_v56  ;;  %v3782_v8 = vor.u32 %v4167_v1, %v3781_v27  ;;  %v3773_v15 = vld [vmem:[#allocation7 + $0x454] sm:$0xf]  ;;  %v3735_v53 = vld [vmem:[#allocation7 + $0x334] sm:$0xf0]  ;;  %v2074_v27 = vld [vmem:[#allocation3] sm:$0xf] }
 0x315   :  { %2485 = vmatpush.bf16.msrb.mxu1 %v3818_v38  ;;  %v4165_v12 = vld [vmem:[#allocation7 + $0x470] sm:$0xf0]  ;;  %v3738_v5 = vor.u32 %v4154_v52, %v3735_v53  ;;  %v4166_v23 = vld [vmem:[#allocation7 + $0x498] sm:$0xf]  ;;  %2463 = vmatpush.bf16.msra.mxu3 %v3642_v30 }
 0x316   :  { %2470 = vmatpush.bf16.msrb.mxu0 %v3762_v45  ;;  %v3765_v6 = vld [vmem:[#allocation7 + $0x414] sm:$0xf]  ;;  %v3783_v55 = vld [vmem:[#allocation7 + $0x4b4] sm:$0xf0] }
 0x317   :  { %v4163_v22 = vld [vmem:[#allocation7 + $0x430] sm:$0xf0]  ;;  %v3786_v32 = vor.u32 %v4166_v23, %v3783_v55  ;;  %v4152_v60 = vld [vmem:[#allocation7 + $0x2d8] sm:$0xf]  ;;  %v3901_v55 = vld [vmem:[#allocation7 + $0x3dc] sm:$0xf] }
 0x318   :  { %2447 = vmatpush.bf16.msra.mxu2 %v3782_v8  ;;  %v3766_v24 = vor.u32 %v4163_v22, %v3765_v6  ;;  %v3727_v20 = vld [vmem:[#allocation7 + $0x2f4] sm:$0xf0]  ;;  %v2077_v1 = vld [vmem:[#allocation3 + $0xc] sm:$0xf] }
 0x319   :  { %2486 = vmatpush.bf16.msrb.mxu1 %v3810_v48  ;;  %v3730_v11 = vor.u32 %v4152_v60, %v3727_v20  ;;  %v4164_v14 = vld [vmem:[#allocation7 + $0x458] sm:$0xf]  ;;  %v3897_v20 = vld [vmem:[#allocation7 + $0x39c] sm:$0xf] }
 0x31a   :  { %2471 = vmatpush.bf16.msrb.mxu0 %v3754_v26  ;;  %v3775_v29 = vld [vmem:[#allocation7 + $0x474] sm:$0xf0] }
 0x31b   :  { %v4150_v34 = vld [vmem:[#allocation7 + $0x298] sm:$0xf]  ;;  %v3778_v37 = vor.u32 %v4164_v14, %v3775_v29  ;;  %v3869_v29 = vld [vmem:[#allocation7 + $0x1dc] sm:$0xf] }
 0x31c   :  { %v3719_v38 = vld [vmem:[#allocation7 + $0x2b4] sm:$0xf0] }
 0x31d   :  { %2487 = vmatpush.bf16.msrb.mxu1 %v3802_v7  ;;  %v4162_v28 = vld [vmem:[#allocation7 + $0x418] sm:$0xf]  ;;  %v3722_v44 = vor.u32 %v4150_v34, %v3719_v38  ;;  %v4188_v34 = vld [vmem:[#allocation7 + $0x1f8] sm:$0xf0] }
 0x31e   :  { %2472 = vmatpush.bf16.msrb.mxu0 %v3746_v42  ;;  %v3767_v36 = vld [vmem:[#allocation7 + $0x434] sm:$0xf0]  ;;  %v3893_v38 = vld [vmem:[#allocation7 + $0x35c] sm:$0xf] }
 0x31f   :  { %v3770_v18 = vor.u32 %v4162_v28, %v3767_v36  ;;  %v4148_v0 = vld [vmem:[#allocation7 + $0x258] sm:$0xf]  ;;  %v4194_v28 = vld [vmem:[#allocation7 + $0x378] sm:$0xf0] }
 0x320   :  { %v3711_v54 = vld [vmem:[#allocation7 + $0x274] sm:$0xf0]  ;;  %v3894_v36 = vor.u32 %v4194_v28, %v3893_v38  ;;  %v3905_v28 = vld [vmem:[#allocation7 + $0x41c] sm:$0xf] }
 0x321   :  { %2488 = vmatpush.bf16.msrb.mxu1 %v3794_v19  ;;  %v3714_v25 = vor.u32 %v4148_v0, %v3711_v54  ;;  %v4146_v46 = vld [vmem:[#allocation7 + $0x218] sm:$0xf]  ;;  %v3865_v54 = vld [vmem:[#allocation7 + $0x19c] sm:$0xf] }
 0x322   :  { %2473 = vmatpush.bf16.msrb.mxu0 %v3738_v5  ;;  %v3703_v47 = vld [vmem:[#allocation7 + $0x234] sm:$0xf0] }
 0x323   :  { %v3706_v57 = vor.u32 %v4146_v46, %v3703_v47  ;;  %v4203_v46 = vld [vmem:[#allocation7 + $0x5b8] sm:$0xf0] }
 0x325   :  { %2489 = vmatpush.bf16.msrb.mxu1 %v3786_v32  ;;  %v4196_v32 = vld [vmem:[#allocation7 + $0x3f8] sm:$0xf0] }
 0x326   :  { %2474 = vmatpush.bf16.msrb.mxu0 %v3730_v11  ;;  %v3902_v60 = vor.u32 %v4196_v32, %v3901_v55  ;;  %v4195_v11 = vld [vmem:[#allocation7 + $0x3b8] sm:$0xf0] }
 0x327   :  { %v3898_v14 = vor.u32 %v4195_v11, %v3897_v20  ;;  %v3845_v32 = vld [vmem:[#allocation7 + $0x5c] sm:$0xf] }
 0x328   :  { %2772 = vmatpush.bf16.msrb.mxu3 %v3902_v60  ;;  %v4182_v60 = vld [vmem:[#allocation7 + $0x78] sm:$0xf0] }
 0x329   :  { %2490 = vmatpush.bf16.msrb.mxu1 %v3778_v37  ;;  %v3870_v37 = vor.u32 %v4188_v34, %v3869_v29  ;;  %v3846_v20 = vor.u32 %v4182_v60, %v3845_v32  ;;  %v3909_v11 = vld [vmem:[#allocation7 + $0x45c] sm:$0xf]  ;;  %v4210_v32 = vld [vmem:[#allocation10 + $0x68] sm:$0xff] }
 0x32a   :  { %2475 = vmatpush.bf16.msrb.mxu0 %v3722_v44  ;;  %v3933_v44 = vld [vmem:[#allocation7 + $0x5dc] sm:$0xf] }
 0x32b   :  { %v3841_v29 = vld [vmem:[#allocation7 + $0x1c] sm:$0xf] }
 0x32c   :  { %2773 = vmatpush.bf16.msrb.mxu3 %v3898_v14  ;;  %v4198_v14 = vld [vmem:[#allocation7 + $0x478] sm:$0xf0] }
 0x32d   :  { %2491 = vmatpush.bf16.msrb.mxu1 %v3770_v18  ;;  %v4204_v18 = vld [vmem:[#allocation7 + $0x5f8] sm:$0xf0]  ;;  %v3910_v34 = vor.u32 %v4198_v14, %v3909_v11  ;;  %v4208_v11 = vld [vmem:[#allocation10 + $0x58] sm:$0xff] }
 0x32e   :  { %2476 = vmatpush.bf16.msrb.mxu0 %v3714_v25  ;;  %v3934_v0 = vor.u32 %v4204_v18, %v3933_v44  ;;  %v4193_v25 = vld [vmem:[#allocation7 + $0x338] sm:$0xf0] }
 0x32f   :  { %v4207_v14 = vld [vmem:[#allocation10 + $0x50] sm:$0xff] }
 0x330   :  { %2774 = vmatpush.bf16.msrb.mxu3 %v3894_v36  ;;  %v4197_v36 = vld [vmem:[#allocation7 + $0x438] sm:$0xf0] }
 0x332   :  { %2477 = vmatpush.bf16.msrb.mxu0 %v3706_v57 }
 0x382   :  { %v4723_v61 = vpop.f32.mrf.mxu3 }
 0x38a   :  { %v4725_v4 = vpop.f32.mrf.mxu3 }
 0x38b   :  { %v4225_v50 = vpack.i.bf16 %v4725_v4, %v4723_v61 }
 0x38d   :  { %4226 = vrot.lane.b32.xlu0 %v4225_v50, %s4370_s11  ;;  %v3774_v50 = vor.u32 %v4165_v12, %v3773_v15  ;;  %v2094_v12 = vld [vmem:[#allocation3 + $0x8] sm:$0xf] }
 0x38f   :  { %2448 = vmatpush.bf16.msra.mxu2 %v3774_v50 }
 0x393   :  { %2449 = vmatpush.bf16.msra.mxu2 %v3766_v24 }
 0x397   :  { %2758 = vmatpush.bf16.msrb.mxu2 %v3870_v37  ;;  %v4181_v37 = vld [vmem:[#allocation7 + $0x38] sm:$0xf0] }
 0x398   :  { %v3842_v18 = vor.u32 %v4181_v37, %v3841_v29 }
 0x3ff   :  { %v4227_v39 = vpop.permute.xlu0 %4226 }
 0x400   :  { %v4229_v40 = vunpack.i.h.bf16 %v4227_v39  ;;  %v4228_v62 = vunpack.i.l.bf16 %v4227_v39  ;;  %v4187_v39 = vld [vmem:[#allocation7 + $0x1b8] sm:$0xf0] }
 0x402   :  { %v2053_v43 = vmax.f32 %v4725_v4, %v4229_v40  ;;  %v2052_v45 = vmax.f32 %v4723_v61, %v4228_v62  ;;  %v3866_v40 = vor.u32 %v4187_v39, %v3865_v54  ;;  %v3889_v62 = vld [vmem:[#allocation7 + $0x31c] sm:$0xf] }
 0x404   :  { %v2055_v48 = vpack.c.bf16 %v2053_v43, %v2053_v43  ;;  %v2054_v56 = vpack.c.bf16 %v2052_v45, %v2052_v45  ;;  %v3890_v43 = vor.u32 %v4193_v25, %v3889_v62  ;;  %v3929_v45 = vld [vmem:[#allocation7 + $0x59c] sm:$0xf]  ;;  %2759 = vmatpush.bf16.msrb.mxu2 %v3866_v40 }
 0x405   :  { %v3930_v47 = vor.u32 %v4203_v46, %v3929_v45 }
 0x406   :  { %v2064_v58 = vshrl.u32 %v2055_v48, 16  ;;  %v2067_v31 = vshll.u32 %v2055_v48, 16  ;;  %2082 = vst.msk [vmem:[#allocation3 + $0x10] sm:$0xf] %vm2072_vm6, %v2055_v48  ;;  %v2057_v41 = vshrl.u32 %v2054_v56, 16  ;;  %v2060_v59 = vshll.u32 %v2054_v56, 16  ;;  %2775 = vmatpush.bf16.msrb.mxu3 %v3890_v43 }
 0x407   :  { %2081 = vst.msk [vmem:[#allocation3 + $0x4] sm:$0xf] %vm2072_vm6, %v2054_v56  ;;  %v3861_v48 = vld [vmem:[#allocation7 + $0x15c] sm:$0xf] }
 0x408   :  { %v2066_v63 = vrot.slane %v2064_v58, 7  ;;  %v2087_v4 = vrot.slane %v2064_v58, 4  ;;  %v2088_v49 = vrot.slane %v2067_v31, 5  ;;  %v2059_v61 = vrot.slane %v2057_v41, 7  ;;  %v4186_v56 = vld [vmem:[#allocation7 + $0x178] sm:$0xf0] }
 0x409   :  { %v2083_v7 = vrot.slane %v2057_v41, 4  ;;  %v2084_v8 = vrot.slane %v2060_v59, 5  ;;  %v3862_v57 = vor.u32 %v4186_v56, %v3861_v48  ;;  %v3885_v58 = vld [vmem:[#allocation7 + $0x2dc] sm:$0xf] }
 0x40a   :  { %v2069_v35 = vor.u32 %v2067_v31, %v2066_v63  ;;  %v2089_v9 = vor.u32 %v2088_v49, %v2087_v4  ;;  %v2062_v10 = vor.u32 %v2060_v59, %v2059_v61  ;;  %v4192_v31 = vld [vmem:[#allocation7 + $0x2f8] sm:$0xf0] }
 0x40b   :  { %v2085_v15 = vor.u32 %v2084_v8, %v2083_v7  ;;  %v3886_v41 = vor.u32 %v4192_v31, %v3885_v58  ;;  %v3925_v59 = vld [vmem:[#allocation7 + $0x55c] sm:$0xf]  ;;  %2760 = vmatpush.bf16.msrb.mxu2 %v3862_v57 }
 0x40c   :  { %v2078_v42 = vsel %vm4736_vm7, %v2069_v35, %v2077_v1  ;;  %v2090_v50 = vrot.slane %v2089_v9, 4  ;;  %v2075_v2 = vsel %vm4736_vm7, %v2062_v10, %v2074_v27  ;;  %v4202_v63 = vld [vmem:[#allocation7 + $0x578] sm:$0xf0] }
 0x40d   :  { %2079 = vst [vmem:[#allocation3 + $0xc] sm:$0xf] %v2078_v42  ;;  %v2086_v3 = vrot.slane %v2085_v15, 4  ;;  %v3627_v17 = vld [vmem:[#allocation3 + $0xc] sm:$0xf0]  ;;  %v3926_v4 = vor.u32 %v4202_v63, %v3925_v59  ;;  %2776 = vmatpush.bf16.msrb.mxu3 %v3886_v41 }
 0x40e   :  { %v2098_v19 = vsel %vm4742_vm8, %v2090_v50, %v2097_v21  ;;  %2076 = vst [vmem:[#allocation3] sm:$0xf] %v2075_v2  ;;  %v4127_v51 = vld [vmem:[#allocation3 + $0x4] sm:$0xf]  ;;  %v3857_v49 = vld [vmem:[#allocation7 + $0x11c] sm:$0xf] }
 0x40f   :  { %2099 = vst [vmem:[#allocation3 + $0x14] sm:$0xf] %v2098_v19  ;;  %v2095_v52 = vsel %vm4742_vm8, %v2086_v3, %v2094_v12  ;;  %v3630_v53 = vor.u32 %v4127_v51, %v3627_v17  ;;  %v4185_v61 = vld [vmem:[#allocation7 + $0x138] sm:$0xf0]  ;;  %v4754_v3 = vld [vmem:[#allocation9 + $0x5] sm:$0x3] }
 0x410   :  { %2096 = vst [vmem:[#allocation3 + $0x8] sm:$0xf] %v2095_v52  ;;  %v3858_v26 = vor.u32 %v4185_v61, %v3857_v49  ;;  %v3881_v27 = vld [vmem:[#allocation7 + $0x29c] sm:$0xf] }
 0x411   :  { %2436 = vmatmul.bf16.vlgmr.msra.gmra.mxu1 %v3630_v53  ;;  %v4191_v1 = vld [vmem:[#allocation7 + $0x2b8] sm:$0xf0] }
 0x412   :  { %v3882_v7 = vor.u32 %v4191_v1, %v3881_v27  ;;  %v3921_v8 = vld [vmem:[#allocation7 + $0x51c] sm:$0xf]  ;;  %2761 = vmatpush.bf16.msrb.mxu2 %v3858_v26  ;;  %2955 = vmatpush.bf16.msra.mxu1 %v4212_v16 }
 0x413   :  { %v4201_v35 = vld [vmem:[#allocation7 + $0x538] sm:$0xf0] }
 0x414   :  { %v4128_v30 = vld [vmem:[#allocation3 + $0x8] sm:$0xf0]  ;;  %v3922_v9 = vor.u32 %v4201_v35, %v3921_v8  ;;  %2777 = vmatpush.bf16.msrb.mxu3 %v3882_v7  ;;  %v3853_v10 = vld [vmem:[#allocation7 + $0xdc] sm:$0xf] }
 0x415   :  { %v3625_v5 = vld [vmem:[#allocation3] sm:$0xf]  ;;  %v3854_v21 = vor.u32 %v4184_v13, %v3853_v10  ;;  %v3877_v15 = vld [vmem:[#allocation7 + $0x25c] sm:$0xf] }
 0x416   :  { %v3626_v6 = vor.u32 %v4128_v30, %v3625_v5  ;;  %v4129_v22 = vld [vmem:[#allocation3 + $0x10] sm:$0xf0]  ;;  %v2154_v5 = vperm.slane %v4754_v3, 0  ;;  %v2518_v61 = vld [vmem:[#allocation3] sm:$0xf] }
 0x417   :  { %v3633_v23 = vld [vmem:[#allocation3 + $0x8] sm:$0xf]  ;;  %v4190_v12 = vld [vmem:[#allocation7 + $0x278] sm:$0xf0]  ;;  %2762 = vmatpush.bf16.msrb.mxu2 %v3854_v21 }
 0x418   :  { %2422 = vmatmul.bf16.vlgmr.msra.gmra.mxu0 %v3626_v6  ;;  %2464 = vmatmul.bf16.vlgmr.msra.gmra.mxu3 %v3626_v6  ;;  %v3634_v24 = vor.u32 %v4129_v22, %v3633_v23  ;;  %v3878_v42 = vor.u32 %v4190_v12, %v3877_v15  ;;  %v3917_v50 = vld [vmem:[#allocation7 + $0x4dc] sm:$0xf]  ;;  %v2536_v7 = vld [vmem:[#allocation3 + $0x8] sm:$0xf] }
 0x419   :  { %2786 = vmatpush.bf16.msra.mxu0 %v3934_v0  ;;  %v4200_v2 = vld [vmem:[#allocation7 + $0x4f8] sm:$0xf0]  ;;  %v3906_v0 = vor.u32 %v4197_v36, %v3905_v28  ;;  %v4233_v28 = vld [vmem:[#allocation9 + $0x7] ss:$0 sm:$0xff] }
 0x41a   :  { %2450 = vmatmul.bf16.vlgmr.msra.gmra.mxu2 %v3634_v24  ;;  %v3918_v17 = vor.u32 %v4200_v2, %v3917_v50  ;;  %2778 = vmatpush.bf16.msrb.mxu3 %v3878_v42  ;;  %v3849_v19 = vld [vmem:[#allocation7 + $0x9c] sm:$0xf]  ;;  %v2521_v42 = vld [vmem:[#allocation3 + $0xc] sm:$0xf] }
 0x41b   :  { %v4183_v51 = vld [vmem:[#allocation7 + $0xb8] sm:$0xf0] }
 0x41c   :  { %v3850_v52 = vor.u32 %v4183_v51, %v3849_v19  ;;  %v4189_v30 = vld [vmem:[#allocation7 + $0x238] sm:$0xf0] }
 0x41d   :  { %2787 = vmatpush.bf16.msra.mxu0 %v3930_v47  ;;  %v3913_v22 = vld [vmem:[#allocation7 + $0x49c] sm:$0xf] }
 0x41e   :  { %v4199_v23 = vld [vmem:[#allocation7 + $0x4b8] sm:$0xf0]  ;;  %2763 = vmatpush.bf16.msrb.mxu2 %v3850_v52 }
 0x41f   :  { %v3914_v55 = vor.u32 %v4199_v23, %v3913_v22 }
 0x421   :  { %2492 = vmatmul.bf16.vlgmr.msrb.gmra.mxu1 %v3634_v24  ;;  %2788 = vmatpush.bf16.msra.mxu0 %v3926_v4 }
 0x422   :  { %2764 = vmatpush.bf16.msrb.mxu2 %v3846_v20  ;;  %v4209_v20 = vld [vmem:[#allocation10 + $0x60] sm:$0xff] }
 0x425   :  { %2789 = vmatpush.bf16.msra.mxu0 %v3922_v9 }
 0x426   :  { %2765 = vmatpush.bf16.msrb.mxu2 %v3842_v18  ;;  %v4205_v18 = vld [vmem:[#allocation10 + $0x40] sm:$0xff] }
 0x428   :  { %2478 = vmatmul.bf16.vlgmr.msrb.gmra.mxu0 %v3630_v53  ;;  %v3873_v53 = vld [vmem:[#allocation7 + $0x21c] sm:$0xf] }
 0x429   :  { %2790 = vmatpush.bf16.msra.mxu0 %v3918_v17  ;;  %v3874_v6 = vor.u32 %v4189_v30, %v3873_v53  ;;  %v2539_v17 = vld [vmem:[#allocation3 + $0x14] sm:$0xf] }
 0x42b   :  { %2779 = vmatpush.bf16.msrb.mxu3 %v3874_v6 }
 0x42d   :  { %2791 = vmatpush.bf16.msra.mxu0 %v3914_v55  ;;  %v4211_v55 = vld [vmem:[#allocation10 + $0x70] sm:$0xff] }
 0x42e   :  { %2956 = vmatpush.bf16.msra.mxu1 %v4211_v55 }
 0x431   :  { %2792 = vmatpush.bf16.msra.mxu0 %v3910_v34  ;;  %v2155_v34 = vperm.slane %v4754_v3, 1 }
 0x432   :  { %2957 = vmatpush.bf16.msra.mxu1 %v4210_v32 }
 0x435   :  { %2793 = vmatpush.bf16.msra.mxu0 %v3906_v0 }
 0x436   :  { %2958 = vmatpush.bf16.msra.mxu1 %v4209_v20 }
 0x43a   :  { %2959 = vmatpush.bf16.msra.mxu1 %v4208_v11 }
 0x43e   :  { %2960 = vmatpush.bf16.msra.mxu1 %v4207_v14 }
 0x48e   :  { %v2437_v44 = vpop.f32.mrf.mxu1 }
 0x495   :  { %v2423_v24 = vpop.f32.mrf.mxu0 }
 0x496   :  { %v2424_v38 = vadd.f32 %v2423_v24, %v2154_v5  ;;  %v2439_v46 = vpop.f32.mrf.mxu1 }
 0x498   :  { %v2438_v54 = vadd.f32 %v2437_v44, %v2424_v38  ;;  %v4206_v38 = vld [vmem:[#allocation10 + $0x48] sm:$0xff] }
 0x499   :  { %2961 = vmatpush.bf16.msra.mxu1 %v4206_v38 }
 0x49b   :  { %v2465_v60 = vpop.f32.mrf.mxu3 }
 0x49c   :  { %v2466_v36 = vadd.f32 %v2465_v60, %v2155_v34 }
 0x49d   :  { %v2425_v39 = vpop.f32.mrf.mxu0  ;;  %v2451_v40 = vpop.f32.mrf.mxu2  ;;  %2962 = vmatpush.bf16.msra.mxu1 %v4205_v18 }
 0x49e   :  { %v2452_v62 = vadd.f32 %v2451_v40, %v2438_v54  ;;  %v2426_v25 = vadd.f32 %v2425_v39, %v2154_v5  ;;  %v2493_v40 = vpop.f32.mrf.mxu1 }
 0x4a0   :  { %v2498_v43 = vmax.f32 %v2452_v62, 0.0  ;;  %v2440_v56 = vadd.f32 %v2439_v46, %v2426_v25 }
 0x4a2   :  { %v2500_v45 = vpack.c.bf16 %v2498_v43, %v2498_v43 }
 0x4a3   :  { %v2467_v29 = vpop.f32.mrf.mxu3 }
 0x4a4   :  { %v2503_v47 = vshrl.u32 %v2500_v45, 16  ;;  %v2506_v48 = vshll.u32 %v2500_v45, 16  ;;  %2524 = vst [vmem:[#allocation3 + $0x4] sm:$0xf] %v2500_v45 }
 0x4a5   :  { %v2453_v57 = vpop.f32.mrf.mxu2  ;;  %v2479_v33 = vpop.f32.mrf.mxu0 }
 0x4a6   :  { %v2505_v58 = vrot.slane %v2503_v47, 7  ;;  %v2526_v31 = vrot.slane %v2503_v47, 4  ;;  %v2527_v41 = vrot.slane %v2506_v48, 5  ;;  %v2454_v59 = vadd.f32 %v2453_v57, %v2440_v56 }
 0x4a7   :  { %v2480_v0 = vadd.f32 %v2479_v33, %v2466_v36  ;;  %v2468_v47 = vadd.f32 %v2467_v29, %v2155_v34 }
 0x4a8   :  { %v2508_v63 = vor.u32 %v2506_v48, %v2505_v58  ;;  %v2528_v4 = vor.u32 %v2527_v41, %v2526_v31  ;;  %v2499_v49 = vmax.f32 %v2454_v59, 0.0 }
 0x4a9   :  { %v2494_v43 = vadd.f32 %v2493_v40, %v2480_v0 }
 0x4aa   :  { %v2519_v26 = vsel %vm4580_vm11, %v2508_v63, %v2518_v61  ;;  %v2529_v27 = vrot.slane %v2528_v4, 4  ;;  %v2501_v1 = vpack.c.bf16 %v2499_v49, %v2499_v49  ;;  %v2495_v49 = vpop.f32.mrf.mxu1 }
 0x4ab   :  { %2520 = vst [vmem:[#allocation3] sm:$0xf] %v2519_v26  ;;  %v4178_v19 = vld [vmem:[#allocation3 + $0x4] sm:$0xf] }
 0x4ac   :  { %v2537_v8 = vsel %vm4592_vm12, %v2529_v27, %v2536_v7  ;;  %v2510_v35 = vshrl.u32 %v2501_v1, 16  ;;  %v2513_v9 = vshll.u32 %v2501_v1, 16  ;;  %2525 = vst [vmem:[#allocation3 + $0x10] sm:$0xf] %v2501_v1 }
 0x4ad   :  { %2538 = vst [vmem:[#allocation3 + $0x8] sm:$0xf] %v2537_v8  ;;  %v2481_v37 = vpop.f32.mrf.mxu0 }
 0x4ae   :  { %v2512_v10 = vrot.slane %v2510_v35, 7  ;;  %v2530_v13 = vrot.slane %v2510_v35, 4  ;;  %v2531_v21 = vrot.slane %v2513_v9, 5  ;;  %v2482_v57 = vadd.f32 %v2481_v37, %v2468_v47 }
 0x4b0   :  { %v2515_v15 = vor.u32 %v2513_v9, %v2512_v10  ;;  %v2532_v12 = vor.u32 %v2531_v21, %v2530_v13  ;;  %v2496_v8 = vadd.f32 %v2495_v49, %v2482_v57 }
 0x4b2   :  { %v2522_v50 = vsel %vm4580_vm11, %v2515_v15, %v2521_v42  ;;  %v2533_v2 = vrot.slane %v2532_v12, 4  ;;  %v3829_v30 = vld [vmem:[#allocation3] sm:$0xf] }
 0x4b3   :  { %2523 = vst [vmem:[#allocation3 + $0xc] sm:$0xf] %v2522_v50  ;;  %v3831_v51 = vld [vmem:[#allocation3 + $0xc] sm:$0xf0] }
 0x4b4   :  { %v2540_v52 = vsel %vm4592_vm12, %v2533_v2, %v2539_v17  ;;  %v3834_v53 = vor.u32 %v4178_v19, %v3831_v51  ;;  %v3837_v22 = vld [vmem:[#allocation3 + $0x8] sm:$0xf] }
 0x4b5   :  { %2541 = vst [vmem:[#allocation3 + $0x14] sm:$0xf] %v2540_v52 }
 0x4b6   :  { %2780 = vmatmul.bf16.vlgmr.msrb.gmra.mxu3 %v3834_v53 }
 0x4ba   :  { %v4179_v5 = vld [vmem:[#allocation3 + $0x8] sm:$0xf0] }
 0x4bb   :  { %v3830_v6 = vor.u32 %v4179_v5, %v3829_v30 }
 0x4bc   :  { %v4180_v23 = vld [vmem:[#allocation3 + $0x10] sm:$0xf0] }
 0x4bd   :  { %2766 = vmatmul.bf16.vlgmr.msrb.gmra.mxu2 %v3830_v6  ;;  %v3838_v24 = vor.u32 %v4180_v23, %v3837_v22 }
 0x4bf   :  { %2794 = vmatmul.bf16.vlgmr.msra.gmra.mxu0 %v3838_v24 }
 0x539   :  { %v2781_v54 = vpop.f32.mrf.mxu3 }
 0x53c   :  { %v2795_v62 = vpop.f32.mrf.mxu0 }
 0x540   :  { %v2767_v44 = vpop.f32.mrf.mxu2 }
 0x541   :  { %v2768_v39 = vadd.f32 %v4233_v28, %v2767_v44  ;;  %v2783_v63 = vpop.f32.mrf.mxu3 }
 0x543   :  { %v2782_v25 = vadd.f32 %v2781_v54, %v2768_v39 }
 0x544   :  { %v2797_v7 = vpop.f32.mrf.mxu0 }
 0x545   :  { %v2796_v45 = vadd.f32 %v2795_v62, %v2782_v25 }
 0x547   :  { %v2800_v46 = vadd.f32 %v2796_v45, %v2494_v43 }
 0x548   :  { %v2769_v3 = vpop.f32.mrf.mxu2 }
 0x549   :  { %v2802_v48 = vmax.f32 %v2800_v46, 0.0  ;;  %v2770_v56 = vadd.f32 %v4233_v28, %v2769_v3 }
 0x54b   :  { %v2806_v58 = vrot.slane %v2802_v48, 2  ;;  %v2807_v31 = vrot.slane %v2802_v48, 4  ;;  %v2808_v41 = vrot.slane %v2802_v48, 6  ;;  %v3935_v59 = vrot.slane %v2802_v48, 9 }
 0x54c   :  { %v2784_v4 = vadd.f32 %v2783_v63, %v2770_v56 }
 0x54d   :  { %v3936_v61 = vrot.slane %v2806_v58, 9  ;;  %v3937_v26 = vrot.slane %v2807_v31, 9  ;;  %v3938_v27 = vrot.slane %v2808_v41, 9  ;;  %v2842_v1 = vmax.f32 %v2802_v48, %v3935_v59 }
 0x54e   :  { %v2798_v35 = vadd.f32 %v2797_v7, %v2784_v4 }
 0x54f   :  { %v2843_v9 = vmax.f32 %v2806_v58, %v3936_v61  ;;  %v2844_v10 = vmax.f32 %v2807_v31, %v3937_v26  ;;  %v2845_v13 = vmax.f32 %v2808_v41, %v3938_v27  ;;  %v2850_v15 = vpack.c.bf16 %v2842_v1, %v2842_v1 }
 0x550   :  { %v2801_v21 = vadd.f32 %v2798_v35, %v2496_v8 }
 0x551   :  { %v2851_v12 = vpack.c.bf16 %v2843_v9, %v2843_v9  ;;  %v2852_v42 = vpack.c.bf16 %v2844_v10, %v2844_v10  ;;  %v2853_v2 = vpack.c.bf16 %v2845_v13, %v2845_v13  ;;  %v2883_v5 = vunpack.c.l.b16 %v2850_v15 }
 0x552   :  { %v2803_v50 = vmax.f32 %v2801_v21, 0.0 }
 0x553   :  { %v2884_v17 = vunpack.c.l.b16 %v2851_v12  ;;  %v2885_v19 = vunpack.c.l.b16 %v2852_v42  ;;  %v2886_v32 = vunpack.c.l.b16 %v2853_v2 }
 0x554   :  { %v2809_v51 = vrot.slane %v2803_v50, 2  ;;  %v3939_v52 = vrot.slane %v2803_v50, 9  ;;  %v2810_v53 = vrot.slane %v2803_v50, 4  ;;  %v2811_v30 = vrot.slane %v2803_v50, 6 }
 0x555   :  { %v2891_v6 = vrot.slane %v2884_v17, 7  ;;  %v2893_v22 = vrot.slane %v2885_v19, 6  ;;  %v2895_v36 = vrot.slane %v2886_v32, 5 }
 0x556   :  { %v2846_v23 = vmax.f32 %v2803_v50, %v3939_v52  ;;  %v3940_v24 = vrot.slane %v2809_v51, 9  ;;  %v3941_v16 = vrot.slane %v2810_v53, 9  ;;  %v3942_v55 = vrot.slane %v2811_v30, 9 }
 0x557   :  { %v2892_v60 = vsel %vm1946_vm13, %v2891_v6, %v2883_v5 }
 0x558   :  { %v2847_v33 = vmax.f32 %v2809_v51, %v3940_v24  ;;  %v2848_v20 = vmax.f32 %v2810_v53, %v3941_v16  ;;  %v2849_v11 = vmax.f32 %v2811_v30, %v3942_v55  ;;  %v2854_v14 = vpack.c.bf16 %v2846_v23, %v2846_v23 }
 0x559   :  { %v2894_v29 = vsel %vm1949_vm14, %v2893_v22, %v2892_v60 }
 0x55a   :  { %v2855_v34 = vpack.c.bf16 %v2847_v33, %v2847_v33  ;;  %v2856_v37 = vpack.c.bf16 %v2848_v20, %v2848_v20  ;;  %v2857_v38 = vpack.c.bf16 %v2849_v11, %v2849_v11  ;;  %v2887_v28 = vunpack.c.l.b16 %v2854_v14 }
 0x55b   :  { %v2896_v39 = vsel %vm1952_vm15, %v2895_v36, %v2894_v29 }
 0x55c   :  { %v2888_v44 = vunpack.c.l.b16 %v2855_v34  ;;  %v2889_v18 = vunpack.c.l.b16 %v2856_v37  ;;  %v2890_v0 = vunpack.c.l.b16 %v2857_v38  ;;  %v2897_v54 = vrot.slane %v2887_v28, 4 }
 0x55e   :  { %v2898_v40 = vsel %vm1955_vm0, %v2897_v54, %v2896_v39  ;;  %v2899_v62 = vrot.slane %v2888_v44, 3  ;;  %v2901_v25 = vrot.slane %v2889_v18, 2  ;;  %v2903_v45 = vrot.slane %v2890_v0, 1 }
 0x560   :  { %v2900_v43 = vsel %vm1958_vm1, %v2899_v62, %v2898_v40 }
 0x561   :  { %v2902_v46 = vsel %vm1961_vm2, %v2901_v25, %v2900_v43 }
 0x562   :  { %v2904_v47 = vsel %vm1964_vm5, %v2903_v45, %v2902_v46 }
 0x563   :  { %v2905_v3 = vpack.c.b16 %v2904_v47, %v2904_v47 }
 0x565   :  { %2963 = vmatmul.bf16.vlgmr.msra.gmra.mxu1 %v2905_v3 }
 0x5e2   :  { %v2964_v48 = vpop.f32.mrf.mxu1 }
 0x5e3   :  { %2969 = vrot.lane.b32.xlu0 %v2964_v48, %s4370_s11 }
 0x5ea   :  { %v2966_v56 = vpop.f32.mrf.mxu1 }
 0x655   :  { %v2970_v57 = vpop.permute.xlu0 %2969 }
 0x656   :  { %v2972_v58 = vmax.f32 %v2964_v48, %v2970_v57 }
 0x658   :  { %v2974_v31 = vrot.slane %v2972_v58, 4  ;;  %2976 = vst.msk [vmem:[#allocation12] sm:$0xf] %vm2072_vm6, %v2972_v58 }
 0x65a   :  { %2977 = vst.msk [vmem:[#allocation12 + $0x4] sm:$0xf] %vm2072_vm6, %v2974_v31 }
 0x65b   :  { %2990 = dma.vmem_to_hbm [thread:$0]  %s2983_s3, 128, %s2985_s15, [#allocation6], %s4370_s11, %s4370_s11, %s4371_s12  }
 0x65c   :  { %4360 = dma.done.wait [#allocation6], 128  }
 0x65d   :  { %4361 = vsyncadd [#allocation6], 4294967168 }
 0x65e   :  { %2995 = vsyncpa [#allocation5], 1 }
 0x65f   :  { %2996 = vsyncpa [#allocation8], 1 }
 0x660   :  { %2997 = vsyncpa [#allocation11], 1 }
 0x661   :  { %2998 = vsyncpa [#allocation6], 1 }

</bundles_post_ra>
